<compile_context>
chip_gen: v6e
topology: v6e:2x2x1
jax: 0.10.0
libtpu: 0.0.40
codegen_flags: <defaults>
</compile_context>

<pallas_src>
import numpy as np
import jax
import jax.numpy as jnp
from jax.experimental import pallas as pl
from jax.experimental.pallas import tpu as pltpu

EPS = 1e-8                        # asteroid gLN epsilon
DOT_DTYPE = jnp.bfloat16          # MXU operand dtype (accumulation is f32)
_VMEM_BUDGET = 24 * 1024 * 1024   # per-block working-set budget (v7x-safe)


# ---------------------------------------------------------------------------
# Pallas kernel 1: fused bidirectional LSTM (1 layer) + output Linear.
# ---------------------------------------------------------------------------
def bilstm_linear_kernel(x_ref, wih8_ref, b8_ref, whh4_f_ref, whh4_b_ref,
                         wlin_f_ref, wlin_b_ref, blin_ref,
                         y_ref,
                         x8_scr, hf_scr, hb_scr, h_f, c_f, h_b, c_b):
    """One batch tile of a 1-layer BiLSTM followed by Linear(2H -> N).

    x_ref    : [T, BB, N]  bf16   time-major input tile
    wih8_ref : [N, 8H]     bf16   input->gates, fwd 4H then bwd 4H (i,f,g,o)
    b8_ref   : [1, 8H]     f32    combined bias (b_ih + b_hh), same layout
    whh4_*   : [H, 4H]     bf16   hidden->gates per direction
    wlin_*   : [H, N]      bf16   output Linear split into fwd / bwd halves
    blin_ref : [1, N]      f32
    y_ref    : [T, BB, N]  f32
    """
    T, BB, N = x_ref.shape
    H = h_f.shape[-1]
    H4 = 4 * H

    # -- hoisted input projection: one large-M MXU matmul over all timesteps --
    x_all = x_ref[...].reshape(T * BB, N)
    x8 = jnp.dot(x_all, wih8_ref[...], preferred_element_type=jnp.float32)
    x8_scr[...] = (x8 + b8_ref[...]).reshape(T, BB, 2 * H4)

    zeros = jnp.zeros((BB, H), jnp.float32)
    h_f[...] = zeros
    c_f[...] = zeros
    h_b[...] = zeros
    c_b[...] = zeros

    def lstm_gates(pre, c_prev):
        # pre: [BB, 4H] pre-activations, gate order (i, f, g, o); f32 math.
        i = jax.nn.sigmoid(pre[:, 0:H])
        f = jax.nn.sigmoid(pre[:, H:2 * H])
        g = jnp.tanh(pre[:, 2 * H:3 * H])
        o = jax.nn.sigmoid(pre[:, 3 * H:4 * H])
        c_new = f * c_prev + i * g
        h_new = o * jnp.tanh(c_new)
        return h_new, c_new

    # -- recurrence: forward + backward chains advanced each iteration --
    @pl.loop(0, T)
    def _(t):
        tr = T - 1 - t

        pre_f = x8_scr[t][:, 0:H4] + jnp.dot(
            h_f[...].astype(DOT_DTYPE), whh4_f_ref[...],
            preferred_element_type=jnp.float32)
        h_new_f, c_new_f = lstm_gates(pre_f, c_f[...])
        h_f[...] = h_new_f
        c_f[...] = c_new_f
        hf_scr[t] = h_new_f

        pre_b = x8_scr[tr][:, H4:2 * H4] + jnp.dot(
            h_b[...].astype(DOT_DTYPE), whh4_b_ref[...],
            preferred_element_type=jnp.float32)
        h_new_b, c_new_b = lstm_gates(pre_b, c_b[...])
        h_b[...] = h_new_b
        c_b[...] = c_new_b
        hb_scr[tr] = h_new_b

    # -- hoisted output projection + single write of the output block --
    hf_all = hf_scr[...].reshape(T * BB, H).astype(DOT_DTYPE)
    hb_all = hb_scr[...].reshape(T * BB, H).astype(DOT_DTYPE)
    y = (jnp.dot(hf_all, wlin_f_ref[...], preferred_element_type=jnp.float32)
         + jnp.dot(hb_all, wlin_b_ref[...], preferred_element_type=jnp.float32)
         + blin_ref[...])
    y_ref[...] = y.reshape(T, BB, N)


def _row_bytes(T, N, H):
    """Approx. resident VMEM bytes per flattened-batch row inside the kernel."""
    return (2 * T * N * 2          # x block (bf16), double-buffered
            + 2 * T * N * 4        # y block (f32), double-buffered
            + 2 * T * 8 * H * 4    # hoisted gate projection scratch + transient
            + 2 * T * H * 4        # stored fwd/bwd hidden states
            + 4 * H * 4)           # running h/c state, both directions


def _pick_bb_tile(bb, row_bytes, budget=_VMEM_BUDGET):
    """Largest multiple-of-16 divisor of `bb` whose footprint fits the budget."""
    max_rows = max(16, (budget // row_bytes) // 16 * 16)
    tile = min(bb, max_rows)
    tile = max(16, tile - tile % 16)
    while tile > 16 and bb % tile:
        tile -= 16
    return tile


def bilstm_linear(x_tm, p):
    """x_tm: [T, BB, N] f32 -> [T, BB, N] f32  (BiLSTM(H) + Linear(2H->N))."""
    T, BB, N = x_tm.shape
    H = p['whh_f'].shape[-1]

    # -- pack weights: fuse the 4 gates (and both directions for the input
    #    projection) along the lane axis; cast MXU operands to bf16. --
    def pack_dir(wih, whh, b):
        wih4 = jnp.transpose(wih, (1, 0, 2)).reshape(N, 4 * H)   # [N, 4H]
        whh4 = jnp.transpose(whh, (1, 0, 2)).reshape(H, 4 * H)   # [H, 4H]
        b4 = b.reshape(1, 4 * H)                                 # [1, 4H]
        return wih4, whh4, b4

    wih4_f, whh4_f, b4_f = pack_dir(p['wih_f'], p['whh_f'], p['b_f'])
    wih4_b, whh4_b, b4_b = pack_dir(p['wih_b'], p['whh_b'], p['b_b'])
    wih8 = jnp.concatenate([wih4_f, wih4_b], axis=1).astype(DOT_DTYPE)  # [N,8H]
    b8 = jnp.concatenate([b4_f, b4_b], axis=1)                          # f32

    # -- pad the flattened batch to a multiple of 16 so in-kernel leading-dim
    #    reshapes are layout-trivial for f32 (8-sublane) and bf16 (16-sublane)
    #    packing; padded rows are independent and dropped afterwards. --
    BB_pad = ((BB + 15) // 16) * 16
    if BB_pad != BB:
        x_tm = jnp.pad(x_tm, ((0, 0), (0, BB_pad - BB), (0, 0)))

    row_bytes = _row_bytes(T, N, H)
    bb_tile = _pick_bb_tile(BB_pad, row_bytes)
    grid = (BB_pad // bb_tile,)

    cparams = dict(dimension_semantics=("parallel",))
    est = bb_tile * row_bytes + 256 * 1024        # + packed weights (tiny)
    if est > 12 * 1024 * 1024:
        # Raise the scoped-VMEM limit explicitly (kept below v7x's 64 MiB).
        cparams['vmem_limit_bytes'] = int(min(2 * est, 48 * 1024 * 1024))

    y = pl.pallas_call(
        bilstm_linear_kernel,
        out_shape=jax.ShapeDtypeStruct((T, BB_pad, N), jnp.float32),
        grid_spec=pltpu.PrefetchScalarGridSpec(
            num_scalar_prefetch=0,
            grid=grid,
            in_specs=[
                pl.BlockSpec((T, bb_tile, N), lambda i: (0, i, 0)),   # x
                pl.BlockSpec((N, 8 * H), lambda i: (0, 0)),           # wih8
                pl.BlockSpec((1, 8 * H), lambda i: (0, 0)),           # b8
                pl.BlockSpec((H, 4 * H), lambda i: (0, 0)),           # whh4_f
                pl.BlockSpec((H, 4 * H), lambda i: (0, 0)),           # whh4_b
                pl.BlockSpec((H, N), lambda i: (0, 0)),               # wlin_f
                pl.BlockSpec((H, N), lambda i: (0, 0)),               # wlin_b
                pl.BlockSpec((1, N), lambda i: (0, 0)),               # blin
            ],
            out_specs=pl.BlockSpec((T, bb_tile, N), lambda i: (0, i, 0)),
            scratch_shapes=[
                pltpu.VMEM((T, bb_tile, 8 * H), jnp.float32),  # hoisted gates
                pltpu.VMEM((T, bb_tile, H), jnp.float32),      # fwd hiddens
                pltpu.VMEM((T, bb_tile, H), jnp.float32),      # bwd hiddens
                pltpu.VMEM((bb_tile, H), jnp.float32),         # h_f
                pltpu.VMEM((bb_tile, H), jnp.float32),         # c_f
                pltpu.VMEM((bb_tile, H), jnp.float32),         # h_b
                pltpu.VMEM((bb_tile, H), jnp.float32),         # c_b
            ]),
        compiler_params=pltpu.CompilerParams(**cparams),
    )(x_tm.astype(DOT_DTYPE), wih8, b8,
      whh4_f.astype(DOT_DTYPE), whh4_b.astype(DOT_DTYPE),
      p['wlin_f'].astype(DOT_DTYPE), p['wlin_b'].astype(DOT_DTYPE),
      p['blin'])

    return y[:, :BB, :] if BB_pad != BB else y


# ---------------------------------------------------------------------------
# Pallas kernel 2: global layer norm (gLN) + residual add, gridded over batch.
#   out = res + gamma * (x - mean) / sqrt(var + eps) + beta
#   (mean/var over all dims except batch, exactly like asteroid GlobLN)
# ---------------------------------------------------------------------------
def gln_residual_kernel(res_ref, x_ref, gamma_ref, beta_ref, out_ref):
    x = x_ref[...]
    mean = jnp.mean(x, axis=(1, 2), keepdims=True)
    var = jnp.mean(jnp.square(x - mean), axis=(1, 2), keepdims=True)
    normed = (x - mean) * jax.lax.rsqrt(var + EPS)
    out_ref[...] = res_ref[...] + normed * gamma_ref[...] + beta_ref[...]


def gln_residual(res, branch, gamma, beta):
    B, N, K, L = res.shape
    KL = K * L
    # NOTE: for very large N*K*L per sample, switch to a two-pass
    # sum / sum-of-squares accumulation over K*L tiles instead of one block.
    out = pl.pallas_call(
        gln_residual_kernel,
        out_shape=jax.ShapeDtypeStruct((B, N, KL), jnp.float32),
        grid_spec=pltpu.PrefetchScalarGridSpec(
            num_scalar_prefetch=0,
            grid=(B,),                      # per-sample reduction: parallel
            in_specs=[
                pl.BlockSpec((1, N, KL), lambda b: (b, 0, 0)),
                pl.BlockSpec((1, N, KL), lambda b: (b, 0, 0)),
                pl.BlockSpec((1, N, 1), lambda b: (0, 0, 0)),
                pl.BlockSpec((1, N, 1), lambda b: (0, 0, 0)),
            ],
            out_specs=pl.BlockSpec((1, N, KL), lambda b: (b, 0, 0))),
        compiler_params=pltpu.CompilerParams(
            dimension_semantics=("parallel",)),
    )(res.reshape(B, N, KL), branch.reshape(B, N, KL),
      gamma.reshape(1, N, 1), beta.reshape(1, N, 1))
    return out.reshape(B, N, K, L)


# ---------------------------------------------------------------------------
# ReccurentBlock forward (glue: reshapes / transposes in plain JAX)
# ---------------------------------------------------------------------------
def recurrent_block(x, params):
    B, N, K, L = x.shape
    # ---- intra-chunk path: sequence axis = K, batch = B*L ----
    xi = jnp.transpose(x, (2, 0, 3, 1)).reshape(K, B * L, N)      # [K, B*L, N]
    yi = bilstm_linear(xi, params['intra'])                        # [K, B*L, N]
    yi = jnp.transpose(yi.reshape(K, B, L, N), (1, 3, 0, 2))       # [B, N, K, L]
    out = gln_residual(x, yi, params['intra_gamma'], params['intra_beta'])

    # ---- inter-chunk path: sequence axis = L, batch = B*K ----
    xo = jnp.transpose(out, (3, 0, 2, 1)).reshape(L, B * K, N)     # [L, B*K, N]
    yo = bilstm_linear(xo, params['inter'])                        # [L, B*K, N]
    yo = jnp.transpose(yo.reshape(L, B, K, N), (1, 3, 2, 0))       # [B, N, K, L]
    out = gln_residual(out, yo, params['inter_gamma'], params['inter_beta'])
    return out


# ---------------------------------------------------------------------------
# Deterministic parameter init (shapes implied by the PyTorch module)
# ---------------------------------------------------------------------------
def init_params(key, N, H):
    keys = jax.random.split(key, 24)
    it = iter(keys)

    def u(shape, scale=0.25):
        return jax.random.uniform(next(it), shape, jnp.float32, -scale, scale)

    def lstm_linear_params():
        return dict(
            wih_f=u((4, N, H)), whh_f=u((4, H, H)), b_f=u((4, 1, H)),
            wih_b=u((4, N, H)), whh_b=u((4, H, H)), b_b=u((4, 1, H)),
            wlin_f=u((H, N)), wlin_b=u((H, N)), blin=u((1, N)),
        )

    params = dict(intra=lstm_linear_params(), inter=lstm_linear_params())
    params['intra_gamma'] = 1.0 + u((N,), 0.1)
    params['intra_beta'] = u((N,), 0.1)
    params['inter_gamma'] = 1.0 + u((N,), 0.1)
    params['inter_beta'] = u((N,), 0.1)
    return params


# ---------------------------------------------------------------------------
# Pure-JAX f32 reference (for verification only)
# ---------------------------------------------------------------------------
def _ref_lstm_dir(x_tm, wih, whh, b, reverse):
    T, BB, _ = x_tm.shape
    H = whh.shape[-1]
    xs = x_tm[::-1] if reverse else x_tm

    def step(carry, xt):
        h, c = carry
        i = jax.nn.sigmoid(xt @ wih[0] + h @ whh[0] + b[0])
        f = jax.nn.sigmoid(xt @ wih[1] + h @ whh[1] + b[1])
        g = jnp.tanh(xt @ wih[2] + h @ whh[2] + b[2])
        o = jax.nn.sigmoid(xt @ wih[3] + h @ whh[3] + b[3])
        c = f * c + i * g
        h = o * jnp.tanh(c)
        return (h, c), h

    h0 = jnp.zeros((BB, H), jnp.float32)
    (_, _), hs = jax.lax.scan(step, (h0, h0), xs)
    return hs[::-1] if reverse else hs


def _ref_bilstm_linear(x_tm, p):
    hf = _ref_lstm_dir(x_tm, p['wih_f'], p['whh_f'], p['b_f'], reverse=False)
    hb = _ref_lstm_dir(x_tm, p['wih_b'], p['whh_b'], p['b_b'], reverse=True)
    return hf @ p['wlin_f'] + hb @ p['wlin_b'] + p['blin']


def _ref_gln_residual(res, x, gamma, beta):
    mean = jnp.mean(x, axis=(1, 2, 3), keepdims=True)
    var = jnp.mean((x - mean) ** 2, axis=(1, 2, 3), keepdims=True)
    normed = (x - mean) / jnp.sqrt(var + EPS)
    return res + normed * gamma.reshape(1, -1, 1, 1) + beta.reshape(1, -1, 1, 1)


def reference_block(x, params):
    B, N, K, L = x.shape
    xi = jnp.transpose(x, (2, 0, 3, 1)).reshape(K, B * L, N)
    yi = _ref_bilstm_linear(xi, params['intra'])
    yi = jnp.transpose(yi.reshape(K, B, L, N), (1, 3, 0, 2))
    out = _ref_gln_residual(x, yi, params['intra_gamma'], params['intra_beta'])
    xo = jnp.transpose(out, (3, 0, 2, 1)).reshape(L, B * K, N)
    yo = _ref_bilstm_linear(xo, params['inter'])
    yo = jnp.transpose(yo.reshape(L, B, K, N), (1, 3, 2, 0))
    return _ref_gln_residual(out, yo, params['inter_gamma'], params['inter_beta'])


if __name__ == "__main__":
    # small shapes: batch=2, in_chan(feats)=8, chunk_size K=16, num_chunks L=8,
    # hidden=16
    B, N, K, L, H = 2, 8, 16, 8, 16
    key = jax.random.PRNGKey(0)
    kx, kp = jax.random.split(key)
    x = jax.random.normal(kx, (B, N, K, L), jnp.float32)
    params = init_params(kp, N, H)

    out = jax.jit(recurrent_block)(x, params)
    out = jax.block_until_ready(out)

    # Tolerance reflects bf16 MXU operands (f32 accumulate / f32 cell state)
    # amplified by the two global-norm stages; reference is pure f32.
    ref = reference_block(x, params)
    np.testing.assert_allclose(np.asarray(out), np.asarray(ref),
                               rtol=5e-2, atol=8e-2)
    print("KERNEL_OK")
</pallas_src>

<mosaic_0001>
module attributes {stable_mosaic.version = 11 : i64} {
  func.func @bilstm_linear_kernel(%arg0: i32, %arg1: memref<16x16x8xbf16, #tpu.memory_space<vmem>>, %arg2: memref<8x128xbf16, #tpu.memory_space<vmem>>, %arg3: memref<1x128xf32, #tpu.memory_space<vmem>>, %arg4: memref<16x64xbf16, #tpu.memory_space<vmem>>, %arg5: memref<16x64xbf16, #tpu.memory_space<vmem>>, %arg6: memref<16x8xbf16, #tpu.memory_space<vmem>>, %arg7: memref<16x8xbf16, #tpu.memory_space<vmem>>, %arg8: memref<1x8xf32, #tpu.memory_space<vmem>>, %arg9: memref<16x16x8xf32, #tpu.memory_space<vmem>>, %arg10: memref<16x16x128xf32, #tpu.memory_space<vmem>>, %arg11: memref<16x16x16xf32, #tpu.memory_space<vmem>>, %arg12: memref<16x16x16xf32, #tpu.memory_space<vmem>>, %arg13: memref<16x16xf32, #tpu.memory_space<vmem>>, %arg14: memref<16x16xf32, #tpu.memory_space<vmem>>, %arg15: memref<16x16xf32, #tpu.memory_space<vmem>>, %arg16: memref<16x16xf32, #tpu.memory_space<vmem>>) attributes {dimension_semantics = [#tpu.dimension_semantics<parallel>], iteration_bounds = array<i64: 1>, scalar_prefetch = 0 : i64, scratch_operands = 7 : i64, tpu.core_type = #tpu.core_type<tc>, window_params = [{transform_indices = @transform_0, window_bounds = array<i64: 16, 16, 8>}, {pipeline_mode = #tpu.pipeline_mode<synchronous>, transform_indices = @transform_1, window_bounds = array<i64: 8, 128>}, {pipeline_mode = #tpu.pipeline_mode<synchronous>, transform_indices = @transform_2, window_bounds = array<i64: 1, 128>}, {pipeline_mode = #tpu.pipeline_mode<synchronous>, transform_indices = @transform_3, window_bounds = array<i64: 16, 64>}, {pipeline_mode = #tpu.pipeline_mode<synchronous>, transform_indices = @transform_4, window_bounds = array<i64: 16, 64>}, {pipeline_mode = #tpu.pipeline_mode<synchronous>, transform_indices = @transform_5, window_bounds = array<i64: 16, 8>}, {pipeline_mode = #tpu.pipeline_mode<synchronous>, transform_indices = @transform_6, window_bounds = array<i64: 16, 8>}, {pipeline_mode = #tpu.pipeline_mode<synchronous>, transform_indices = @transform_7, window_bounds = array<i64: 1, 8>}, {transform_indices = @transform_8, window_bounds = array<i64: 16, 16, 8>}]} {
    %c0 = arith.constant 0 : index
    %c0_0 = arith.constant 0 : index
    %c0_1 = arith.constant 0 : index
    %0 = vector.load %arg1[%c0, %c0_0, %c0_1] : memref<16x16x8xbf16, #tpu.memory_space<vmem>>, vector<16x16x8xbf16>
    %1 = vector.shape_cast %0 : vector<16x16x8xbf16> to vector<256x8xbf16>
    %c0_2 = arith.constant 0 : index
    %c0_3 = arith.constant 0 : index
    %2 = vector.load %arg2[%c0_2, %c0_3] : memref<8x128xbf16, #tpu.memory_space<vmem>>, vector<8x128xbf16>
    %cst = arith.constant dense<0.000000e+00> : vector<256x128xf32>
    %3 = tpu.matmul %1, %2, %cst {dimension_numbers = #tpu.dot_dimension_numbers<[1], [0], [0], [1], [0, 0, 1, 1], [], []>} : vector<256x8xbf16>, vector<8x128xbf16>, vector<256x128xf32> -> vector<256x128xf32>
    %c0_4 = arith.constant 0 : index
    %c0_5 = arith.constant 0 : index
    %4 = vector.load %arg3[%c0_4, %c0_5] : memref<1x128xf32, #tpu.memory_space<vmem>>, vector<1x128xf32>
    %5 = vector.broadcast %4 : vector<1x128xf32> to vector<256x128xf32>
    %6 = arith.addf %3, %5 : vector<256x128xf32>
    %7 = vector.shape_cast %6 : vector<256x128xf32> to vector<16x16x128xf32>
    %c0_6 = arith.constant 0 : index
    %c0_7 = arith.constant 0 : index
    %c0_8 = arith.constant 0 : index
    %8 = vector.load %arg10[%c0_6, %c0_7, %c0_8] : memref<16x16x128xf32, #tpu.memory_space<vmem>>, vector<16x16x128xf32>
    tpu.vector_store %arg10[%c0_6, %c0_7, %c0_8], %7 {strides = array<i32>} : memref<16x16x128xf32, #tpu.memory_space<vmem>>, vector<16x16x128xf32>,
    %cst_9 = arith.constant 0.000000e+00 : f32
    %9 = vector.broadcast %cst_9 : f32 to vector<16x16xf32>
    %c0_10 = arith.constant 0 : index
    %c0_11 = arith.constant 0 : index
    %10 = vector.load %arg13[%c0_10, %c0_11] : memref<16x16xf32, #tpu.memory_space<vmem>>, vector<16x16xf32>
    tpu.vector_store %arg13[%c0_10, %c0_11], %9 {strides = array<i32>} : memref<16x16xf32, #tpu.memory_space<vmem>>, vector<16x16xf32>,
    %c0_12 = arith.constant 0 : index
    %c0_13 = arith.constant 0 : index
    %11 = vector.load %arg14[%c0_12, %c0_13] : memref<16x16xf32, #tpu.memory_space<vmem>>, vector<16x16xf32>
    tpu.vector_store %arg14[%c0_12, %c0_13], %9 {strides = array<i32>} : memref<16x16xf32, #tpu.memory_space<vmem>>, vector<16x16xf32>,
    %c0_14 = arith.constant 0 : index
    %c0_15 = arith.constant 0 : index
    %12 = vector.load %arg15[%c0_14, %c0_15] : memref<16x16xf32, #tpu.memory_space<vmem>>, vector<16x16xf32>
    tpu.vector_store %arg15[%c0_14, %c0_15], %9 {strides = array<i32>} : memref<16x16xf32, #tpu.memory_space<vmem>>, vector<16x16xf32>,
    %c0_16 = arith.constant 0 : index
    %c0_17 = arith.constant 0 : index
    %13 = vector.load %arg16[%c0_16, %c0_17] : memref<16x16xf32, #tpu.memory_space<vmem>>, vector<16x16xf32>
    tpu.vector_store %arg16[%c0_16, %c0_17], %9 {strides = array<i32>} : memref<16x16xf32, #tpu.memory_space<vmem>>, vector<16x16xf32>,
    %c0_i32 = arith.constant 0 : i32
    %c16_i32 = arith.constant 16 : i32
    %14 = arith.addi %c0_i32, %c16_i32 : i32
    %c1_i32 = arith.constant 1 : i32
    scf.for %arg17 = %c0_i32 to %14 step %c1_i32  : i32 {
      %c1_i32_36 = arith.constant 1 : i32
      %31 = arith.muli %arg17, %c1_i32_36 : i32
      %c0_i32_37 = arith.constant 0 : i32
      %32 = arith.addi %c0_i32_37, %31 : i32
      %c15_i32 = arith.constant 15 : i32
      %33 = arith.subi %c15_i32, %32 : i32
      %34 = arith.index_cast %32 : i32 to index
      %c0_38 = arith.constant 0 : index
      %c0_39 = arith.constant 0 : index
      %35 = vector.load %arg10[%34, %c0_38, %c0_39] : memref<16x16x128xf32, #tpu.memory_space<vmem>>, vector<1x16x128xf32>
      %36 = vector.shape_cast %35 : vector<1x16x128xf32> to vector<16x128xf32>
      %37 = vector.extract_strided_slice %36 {offsets = [0, 0], sizes = [16, 64], strides = [1, 1]} : vector<16x128xf32> to vector<16x64xf32>
      %c0_40 = arith.constant 0 : index
      %c0_41 = arith.constant 0 : index
      %38 = vector.load %arg13[%c0_40, %c0_41] : memref<16x16xf32, #tpu.memory_space<vmem>>, vector<16x16xf32>
      %39 = arith.truncf %38 : vector<16x16xf32> to vector<16x16xbf16>
      %c0_42 = arith.constant 0 : index
      %c0_43 = arith.constant 0 : index
      %40 = vector.load %arg4[%c0_42, %c0_43] : memref<16x64xbf16, #tpu.memory_space<vmem>>, vector<16x64xbf16>
      %cst_44 = arith.constant dense<0.000000e+00> : vector<16x64xf32>
      %41 = tpu.matmul %39, %40, %cst_44 {dimension_numbers = #tpu.dot_dimension_numbers<[1], [0], [0], [1], [0, 0, 1, 1], [], []>} : vector<16x16xbf16>, vector<16x64xbf16>, vector<16x64xf32> -> vector<16x64xf32>
      %42 = arith.addf %37, %41 : vector<16x64xf32>
      %c0_45 = arith.constant 0 : index
      %c0_46 = arith.constant 0 : index
      %43 = vector.load %arg14[%c0_45, %c0_46] : memref<16x16xf32, #tpu.memory_space<vmem>>, vector<16x16xf32>
      %44 = vector.extract_strided_slice %42 {offsets = [0, 0], sizes = [16, 16], strides = [1, 1]} : vector<16x64xf32> to vector<16x16xf32>
      %45 = arith.negf %44 : vector<16x16xf32>
      %46 = math.exp %45 : vector<16x16xf32>
      %cst_47 = arith.constant 1.000000e+00 : f32
      %47 = vector.broadcast %cst_47 : f32 to vector<16x16xf32>
      %48 = arith.addf %47, %46 : vector<16x16xf32>
      %49 = arith.divf %47, %48 : vector<16x16xf32>
      %50 = vector.extract_strided_slice %42 {offsets = [0, 16], sizes = [16, 16], strides = [1, 1]} : vector<16x64xf32> to vector<16x16xf32>
      %51 = arith.negf %50 : vector<16x16xf32>
      %52 = math.exp %51 : vector<16x16xf32>
      %cst_48 = arith.constant 1.000000e+00 : f32
      %53 = vector.broadcast %cst_48 : f32 to vector<16x16xf32>
      %54 = arith.addf %53, %52 : vector<16x16xf32>
      %55 = arith.divf %53, %54 : vector<16x16xf32>
      %56 = vector.extract_strided_slice %42 {offsets = [0, 32], sizes = [16, 16], strides = [1, 1]} : vector<16x64xf32> to vector<16x16xf32>
      %57 = math.tanh %56 : vector<16x16xf32>
      %58 = vector.extract_strided_slice %42 {offsets = [0, 48], sizes = [16, 16], strides = [1, 1]} : vector<16x64xf32> to vector<16x16xf32>
      %59 = arith.negf %58 : vector<16x16xf32>
      %60 = math.exp %59 : vector<16x16xf32>
      %cst_49 = arith.constant 1.000000e+00 : f32
      %61 = vector.broadcast %cst_49 : f32 to vector<16x16xf32>
      %62 = arith.addf %61, %60 : vector<16x16xf32>
      %63 = arith.divf %61, %62 : vector<16x16xf32>
      %64 = arith.mulf %55, %43 : vector<16x16xf32>
      %65 = arith.mulf %49, %57 : vector<16x16xf32>
      %66 = arith.addf %64, %65 : vector<16x16xf32>
      %67 = math.tanh %66 : vector<16x16xf32>
      %68 = arith.mulf %63, %67 : vector<16x16xf32>
      %c0_50 = arith.constant 0 : index
      %c0_51 = arith.constant 0 : index
      %69 = vector.load %arg13[%c0_50, %c0_51] : memref<16x16xf32, #tpu.memory_space<vmem>>, vector<16x16xf32>
      tpu.vector_store %arg13[%c0_50, %c0_51], %68 {strides = array<i32>} : memref<16x16xf32, #tpu.memory_space<vmem>>, vector<16x16xf32>,
      %c0_52 = arith.constant 0 : index
      %c0_53 = arith.constant 0 : index
      %70 = vector.load %arg14[%c0_52, %c0_53] : memref<16x16xf32, #tpu.memory_space<vmem>>, vector<16x16xf32>
      tpu.vector_store %arg14[%c0_52, %c0_53], %66 {strides = array<i32>} : memref<16x16xf32, #tpu.memory_space<vmem>>, vector<16x16xf32>,
      %71 = arith.index_cast %32 : i32 to index
      %c0_54 = arith.constant 0 : index
      %c0_55 = arith.constant 0 : index
      %72 = vector.load %arg11[%71, %c0_54, %c0_55] : memref<16x16x16xf32, #tpu.memory_space<vmem>>, vector<1x16x16xf32>
      %73 = vector.shape_cast %72 : vector<1x16x16xf32> to vector<16x16xf32>
      %74 = vector.shape_cast %68 : vector<16x16xf32> to vector<1x16x16xf32>
      tpu.vector_store %arg11[%71, %c0_54, %c0_55], %74 {strides = array<i32>} : memref<16x16x16xf32, #tpu.memory_space<vmem>>, vector<1x16x16xf32>,
      %75 = arith.index_cast %33 : i32 to index
      %c0_56 = arith.constant 0 : index
      %c0_57 = arith.constant 0 : index
      %76 = vector.load %arg10[%75, %c0_56, %c0_57] : memref<16x16x128xf32, #tpu.memory_space<vmem>>, vector<1x16x128xf32>
      %77 = vector.shape_cast %76 : vector<1x16x128xf32> to vector<16x128xf32>
      %78 = vector.extract_strided_slice %77 {offsets = [0, 64], sizes = [16, 64], strides = [1, 1]} : vector<16x128xf32> to vector<16x64xf32>
      %c0_58 = arith.constant 0 : index
      %c0_59 = arith.constant 0 : index
      %79 = vector.load %arg15[%c0_58, %c0_59] : memref<16x16xf32, #tpu.memory_space<vmem>>, vector<16x16xf32>
      %80 = arith.truncf %79 : vector<16x16xf32> to vector<16x16xbf16>
      %c0_60 = arith.constant 0 : index
      %c0_61 = arith.constant 0 : index
      %81 = vector.load %arg5[%c0_60, %c0_61] : memref<16x64xbf16, #tpu.memory_space<vmem>>, vector<16x64xbf16>
      %cst_62 = arith.constant dense<0.000000e+00> : vector<16x64xf32>
      %82 = tpu.matmul %80, %81, %cst_62 {dimension_numbers = #tpu.dot_dimension_numbers<[1], [0], [0], [1], [0, 0, 1, 1], [], []>} : vector<16x16xbf16>, vector<16x64xbf16>, vector<16x64xf32> -> vector<16x64xf32>
      %83 = arith.addf %78, %82 : vector<16x64xf32>
      %c0_63 = arith.constant 0 : index
      %c0_64 = arith.constant 0 : index
      %84 = vector.load %arg16[%c0_63, %c0_64] : memref<16x16xf32, #tpu.memory_space<vmem>>, vector<16x16xf32>
      %85 = vector.extract_strided_slice %83 {offsets = [0, 0], sizes = [16, 16], strides = [1, 1]} : vector<16x64xf32> to vector<16x16xf32>
      %86 = arith.negf %85 : vector<16x16xf32>
      %87 = math.exp %86 : vector<16x16xf32>
      %cst_65 = arith.constant 1.000000e+00 : f32
      %88 = vector.broadcast %cst_65 : f32 to vector<16x16xf32>
      %89 = arith.addf %88, %87 : vector<16x16xf32>
      %90 = arith.divf %88, %89 : vector<16x16xf32>
      %91 = vector.extract_strided_slice %83 {offsets = [0, 16], sizes = [16, 16], strides = [1, 1]} : vector<16x64xf32> to vector<16x16xf32>
      %92 = arith.negf %91 : vector<16x16xf32>
      %93 = math.exp %92 : vector<16x16xf32>
      %cst_66 = arith.constant 1.000000e+00 : f32
      %94 = vector.broadcast %cst_66 : f32 to vector<16x16xf32>
      %95 = arith.addf %94, %93 : vector<16x16xf32>
      %96 = arith.divf %94, %95 : vector<16x16xf32>
      %97 = vector.extract_strided_slice %83 {offsets = [0, 32], sizes = [16, 16], strides = [1, 1]} : vector<16x64xf32> to vector<16x16xf32>
      %98 = math.tanh %97 : vector<16x16xf32>
      %99 = vector.extract_strided_slice %83 {offsets = [0, 48], sizes = [16, 16], strides = [1, 1]} : vector<16x64xf32> to vector<16x16xf32>
      %100 = arith.negf %99 : vector<16x16xf32>
      %101 = math.exp %100 : vector<16x16xf32>
      %cst_67 = arith.constant 1.000000e+00 : f32
      %102 = vector.broadcast %cst_67 : f32 to vector<16x16xf32>
      %103 = arith.addf %102, %101 : vector<16x16xf32>
      %104 = arith.divf %102, %103 : vector<16x16xf32>
      %105 = arith.mulf %96, %84 : vector<16x16xf32>
      %106 = arith.mulf %90, %98 : vector<16x16xf32>
      %107 = arith.addf %105, %106 : vector<16x16xf32>
      %108 = math.tanh %107 : vector<16x16xf32>
      %109 = arith.mulf %104, %108 : vector<16x16xf32>
      %c0_68 = arith.constant 0 : index
      %c0_69 = arith.constant 0 : index
      %110 = vector.load %arg15[%c0_68, %c0_69] : memref<16x16xf32, #tpu.memory_space<vmem>>, vector<16x16xf32>
      tpu.vector_store %arg15[%c0_68, %c0_69], %109 {strides = array<i32>} : memref<16x16xf32, #tpu.memory_space<vmem>>, vector<16x16xf32>,
      %c0_70 = arith.constant 0 : index
      %c0_71 = arith.constant 0 : index
      %111 = vector.load %arg16[%c0_70, %c0_71] : memref<16x16xf32, #tpu.memory_space<vmem>>, vector<16x16xf32>
      tpu.vector_store %arg16[%c0_70, %c0_71], %107 {strides = array<i32>} : memref<16x16xf32, #tpu.memory_space<vmem>>, vector<16x16xf32>,
      %112 = arith.index_cast %33 : i32 to index
      %c0_72 = arith.constant 0 : index
      %c0_73 = arith.constant 0 : index
      %113 = vector.load %arg12[%112, %c0_72, %c0_73] : memref<16x16x16xf32, #tpu.memory_space<vmem>>, vector<1x16x16xf32>
      %114 = vector.shape_cast %113 : vector<1x16x16xf32> to vector<16x16xf32>
      %115 = vector.shape_cast %109 : vector<16x16xf32> to vector<1x16x16xf32>
      tpu.vector_store %arg12[%112, %c0_72, %c0_73], %115 {strides = array<i32>} : memref<16x16x16xf32, #tpu.memory_space<vmem>>, vector<1x16x16xf32>,
    }
    %c16_i32_18 = arith.constant 16 : i32
    %c0_19 = arith.constant 0 : index
    %c0_20 = arith.constant 0 : index
    %c0_21 = arith.constant 0 : index
    %15 = vector.load %arg11[%c0_19, %c0_20, %c0_21] : memref<16x16x16xf32, #tpu.memory_space<vmem>>, vector<16x16x16xf32>
    %16 = vector.shape_cast %15 : vector<16x16x16xf32> to vector<256x16xf32>
    %17 = arith.truncf %16 : vector<256x16xf32> to vector<256x16xbf16>
    %c0_22 = arith.constant 0 : index
    %c0_23 = arith.constant 0 : index
    %c0_24 = arith.constant 0 : index
    %18 = vector.load %arg12[%c0_22, %c0_23, %c0_24] : memref<16x16x16xf32, #tpu.memory_space<vmem>>, vector<16x16x16xf32>
    %19 = vector.shape_cast %18 : vector<16x16x16xf32> to vector<256x16xf32>
    %20 = arith.truncf %19 : vector<256x16xf32> to vector<256x16xbf16>
    %c0_25 = arith.constant 0 : index
    %c0_26 = arith.constant 0 : index
    %21 = vector.load %arg6[%c0_25, %c0_26] : memref<16x8xbf16, #tpu.memory_space<vmem>>, vector<16x8xbf16>
    %cst_27 = arith.constant dense<0.000000e+00> : vector<256x8xf32>
    %22 = tpu.matmul %17, %21, %cst_27 {dimension_numbers = #tpu.dot_dimension_numbers<[1], [0], [0], [1], [0, 0, 1, 1], [], []>} : vector<256x16xbf16>, vector<16x8xbf16>, vector<256x8xf32> -> vector<256x8xf32>
    %c0_28 = arith.constant 0 : index
    %c0_29 = arith.constant 0 : index
    %23 = vector.load %arg7[%c0_28, %c0_29] : memref<16x8xbf16, #tpu.memory_space<vmem>>, vector<16x8xbf16>
    %cst_30 = arith.constant dense<0.000000e+00> : vector<256x8xf32>
    %24 = tpu.matmul %20, %23, %cst_30 {dimension_numbers = #tpu.dot_dimension_numbers<[1], [0], [0], [1], [0, 0, 1, 1], [], []>} : vector<256x16xbf16>, vector<16x8xbf16>, vector<256x8xf32> -> vector<256x8xf32>
    %25 = arith.addf %22, %24 : vector<256x8xf32>
    %c0_31 = arith.constant 0 : index
    %c0_32 = arith.constant 0 : index
    %26 = vector.load %arg8[%c0_31, %c0_32] : memref<1x8xf32, #tpu.memory_space<vmem>>, vector<1x8xf32>
    %27 = vector.broadcast %26 : vector<1x8xf32> to vector<256x8xf32>
    %28 = arith.addf %25, %27 : vector<256x8xf32>
    %29 = vector.shape_cast %28 : vector<256x8xf32> to vector<16x16x8xf32>
    %c0_33 = arith.constant 0 : index
    %c0_34 = arith.constant 0 : index
    %c0_35 = arith.constant 0 : index
    %30 = vector.load %arg9[%c0_33, %c0_34, %c0_35] : memref<16x16x8xf32, #tpu.memory_space<vmem>>, vector<16x16x8xf32>
    tpu.vector_store %arg9[%c0_33, %c0_34, %c0_35], %29 {strides = array<i32>} : memref<16x16x8xf32, #tpu.memory_space<vmem>>, vector<16x16x8xf32>,
    return
  }
  func.func @transform_0(%arg0: i32) -> (i32, i32, i32) {
    %c0_i32 = arith.constant 0 : i32
    %c0_i32_0 = arith.constant 0 : i32
    %c0_i32_1 = arith.constant 0 : i32
    return %c0_i32, %arg0, %c0_i32_0 : i32, i32, i32
  }
  func.func @transform_1(%arg0: i32) -> (i32, i32) {
    %c0_i32 = arith.constant 0 : i32
    %c0_i32_0 = arith.constant 0 : i32
    %c0_i32_1 = arith.constant 0 : i32
    return %c0_i32, %c0_i32_0 : i32, i32
  }
  func.func @transform_2(%arg0: i32) -> (i32, i32) {
    %c0_i32 = arith.constant 0 : i32
    %c0_i32_0 = arith.constant 0 : i32
    %c0_i32_1 = arith.constant 0 : i32
    return %c0_i32, %c0_i32_0 : i32, i32
  }
  func.func @transform_3(%arg0: i32) -> (i32, i32) {
    %c0_i32 = arith.constant 0 : i32
    %c0_i32_0 = arith.constant 0 : i32
    %c0_i32_1 = arith.constant 0 : i32
    return %c0_i32, %c0_i32_0 : i32, i32
  }
  func.func @transform_4(%arg0: i32) -> (i32, i32) {
    %c0_i32 = arith.constant 0 : i32
    %c0_i32_0 = arith.constant 0 : i32
    %c0_i32_1 = arith.constant 0 : i32
    return %c0_i32, %c0_i32_0 : i32, i32
  }
  func.func @transform_5(%arg0: i32) -> (i32, i32) {
    %c0_i32 = arith.constant 0 : i32
    %c0_i32_0 = arith.constant 0 : i32
    %c0_i32_1 = arith.constant 0 : i32
    return %c0_i32, %c0_i32_0 : i32, i32
  }
  func.func @transform_6(%arg0: i32) -> (i32, i32) {
    %c0_i32 = arith.constant 0 : i32
    %c0_i32_0 = arith.constant 0 : i32
    %c0_i32_1 = arith.constant 0 : i32
    return %c0_i32, %c0_i32_0 : i32, i32
  }
  func.func @transform_7(%arg0: i32) -> (i32, i32) {
    %c0_i32 = arith.constant 0 : i32
    %c0_i32_0 = arith.constant 0 : i32
    %c0_i32_1 = arith.constant 0 : i32
    return %c0_i32, %c0_i32_0 : i32, i32
  }
  func.func @transform_8(%arg0: i32) -> (i32, i32, i32) {
    %c0_i32 = arith.constant 0 : i32
    %c0_i32_0 = arith.constant 0 : i32
    %c0_i32_1 = arith.constant 0 : i32
    return %c0_i32, %arg0, %c0_i32_0 : i32, i32, i32
  }
}

module attributes {stable_mosaic.version = 11 : i64} {
  func.func @gln_residual_kernel(%arg0: i32, %arg1: memref<1x8x128xf32, #tpu.memory_space<vmem>>, %arg2: memref<1x8x128xf32, #tpu.memory_space<vmem>>, %arg3: memref<1x8x1xf32, #tpu.memory_space<vmem>>, %arg4: memref<1x8x1xf32, #tpu.memory_space<vmem>>, %arg5: memref<1x8x128xf32, #tpu.memory_space<vmem>>) attributes {dimension_semantics = [#tpu.dimension_semantics<parallel>], iteration_bounds = array<i64: 2>, scalar_prefetch = 0 : i64, scratch_operands = 0 : i64, tpu.core_type = #tpu.core_type<tc>, window_params = [{transform_indices = @transform_0, window_bounds = array<i64: 1, 8, 128>}, {transform_indices = @transform_1, window_bounds = array<i64: 1, 8, 128>}, {pipeline_mode = #tpu.pipeline_mode<synchronous>, transform_indices = @transform_2, window_bounds = array<i64: 1, 8, 1>}, {pipeline_mode = #tpu.pipeline_mode<synchronous>, transform_indices = @transform_3, window_bounds = array<i64: 1, 8, 1>}, {transform_indices = @transform_4, window_bounds = array<i64: 1, 8, 128>}]} {
    %c0 = arith.constant 0 : index
    %c0_0 = arith.constant 0 : index
    %c0_1 = arith.constant 0 : index
    %0 = vector.load %arg2[%c0, %c0_0, %c0_1] : memref<1x8x128xf32, #tpu.memory_space<vmem>>, vector<1x8x128xf32>
    %cst = arith.constant dense<0.000000e+00> : vector<1xf32>
    %1 = vector.multi_reduction <add>, %0, %cst [1, 2] : vector<1x8x128xf32> to vector<1xf32>
    %2 = vector.shape_cast %1 : vector<1xf32> to vector<1x1x1xf32>
    %cst_2 = arith.constant 1.024000e+03 : f32
    %3 = vector.broadcast %cst_2 : f32 to vector<1x1x1xf32>
    %4 = arith.divf %2, %3 : vector<1x1x1xf32>
    %5 = vector.broadcast %4 : vector<1x1x1xf32> to vector<1x8x128xf32>
    %6 = arith.subf %0, %5 : vector<1x8x128xf32>
    %7 = arith.mulf %6, %6 : vector<1x8x128xf32>
    %cst_3 = arith.constant dense<0.000000e+00> : vector<1xf32>
    %8 = vector.multi_reduction <add>, %7, %cst_3 [1, 2] : vector<1x8x128xf32> to vector<1xf32>
    %9 = vector.shape_cast %8 : vector<1xf32> to vector<1x1x1xf32>
    %cst_4 = arith.constant 1.024000e+03 : f32
    %10 = vector.broadcast %cst_4 : f32 to vector<1x1x1xf32>
    %11 = arith.divf %9, %10 : vector<1x1x1xf32>
    %12 = vector.broadcast %4 : vector<1x1x1xf32> to vector<1x8x128xf32>
    %13 = arith.subf %0, %12 : vector<1x8x128xf32>
    %cst_5 = arith.constant 9.99999993E-9 : f32
    %14 = vector.broadcast %cst_5 : f32 to vector<1x1x1xf32>
    %15 = arith.addf %11, %14 : vector<1x1x1xf32>
    %16 = math.rsqrt %15 : vector<1x1x1xf32>
    %17 = vector.broadcast %16 : vector<1x1x1xf32> to vector<1x8x128xf32>
    %18 = arith.mulf %13, %17 : vector<1x8x128xf32>
    %c0_6 = arith.constant 0 : index
    %c0_7 = arith.constant 0 : index
    %c0_8 = arith.constant 0 : index
    %19 = vector.load %arg1[%c0_6, %c0_7, %c0_8] : memref<1x8x128xf32, #tpu.memory_space<vmem>>, vector<1x8x128xf32>
    %c0_9 = arith.constant 0 : index
    %c0_10 = arith.constant 0 : index
    %c0_11 = arith.constant 0 : index
    %20 = vector.load %arg3[%c0_9, %c0_10, %c0_11] : memref<1x8x1xf32, #tpu.memory_space<vmem>>, vector<1x8x1xf32>
    %21 = vector.broadcast %20 : vector<1x8x1xf32> to vector<1x8x128xf32>
    %22 = arith.mulf %18, %21 : vector<1x8x128xf32>
    %23 = arith.addf %19, %22 : vector<1x8x128xf32>
    %c0_12 = arith.constant 0 : index
    %c0_13 = arith.constant 0 : index
    %c0_14 = arith.constant 0 : index
    %24 = vector.load %arg4[%c0_12, %c0_13, %c0_14] : memref<1x8x1xf32, #tpu.memory_space<vmem>>, vector<1x8x1xf32>
    %25 = vector.broadcast %24 : vector<1x8x1xf32> to vector<1x8x128xf32>
    %26 = arith.addf %23, %25 : vector<1x8x128xf32>
    %c0_15 = arith.constant 0 : index
    %c0_16 = arith.constant 0 : index
    %c0_17 = arith.constant 0 : index
    %27 = vector.load %arg5[%c0_15, %c0_16, %c0_17] : memref<1x8x128xf32, #tpu.memory_space<vmem>>, vector<1x8x128xf32>
    tpu.vector_store %arg5[%c0_15, %c0_16, %c0_17], %26 {strides = array<i32>} : memref<1x8x128xf32, #tpu.memory_space<vmem>>, vector<1x8x128xf32>,
    return
  }
  func.func @transform_0(%arg0: i32) -> (i32, i32, i32) {
    %c0_i32 = arith.constant 0 : i32
    %c0_i32_0 = arith.constant 0 : i32
    %c0_i32_1 = arith.constant 0 : i32
    return %arg0, %c0_i32, %c0_i32_0 : i32, i32, i32
  }
  func.func @transform_1(%arg0: i32) -> (i32, i32, i32) {
    %c0_i32 = arith.constant 0 : i32
    %c0_i32_0 = arith.constant 0 : i32
    %c0_i32_1 = arith.constant 0 : i32
    return %arg0, %c0_i32, %c0_i32_0 : i32, i32, i32
  }
  func.func @transform_2(%arg0: i32) -> (i32, i32, i32) {
    %c0_i32 = arith.constant 0 : i32
    %c0_i32_0 = arith.constant 0 : i32
    %c0_i32_1 = arith.constant 0 : i32
    %c0_i32_2 = arith.constant 0 : i32
    return %c0_i32, %c0_i32_0, %c0_i32_1 : i32, i32, i32
  }
  func.func @transform_3(%arg0: i32) -> (i32, i32, i32) {
    %c0_i32 = arith.constant 0 : i32
    %c0_i32_0 = arith.constant 0 : i32
    %c0_i32_1 = arith.constant 0 : i32
    %c0_i32_2 = arith.constant 0 : i32
    return %c0_i32, %c0_i32_0, %c0_i32_1 : i32, i32, i32
  }
  func.func @transform_4(%arg0: i32) -> (i32, i32, i32) {
    %c0_i32 = arith.constant 0 : i32
    %c0_i32_0 = arith.constant 0 : i32
    %c0_i32_1 = arith.constant 0 : i32
    return %arg0, %c0_i32, %c0_i32_0 : i32, i32, i32
  }
}

module attributes {stable_mosaic.version = 11 : i64} {
  func.func @bilstm_linear_kernel(%arg0: i32, %arg1: memref<8x32x8xbf16, #tpu.memory_space<vmem>>, %arg2: memref<8x128xbf16, #tpu.memory_space<vmem>>, %arg3: memref<1x128xf32, #tpu.memory_space<vmem>>, %arg4: memref<16x64xbf16, #tpu.memory_space<vmem>>, %arg5: memref<16x64xbf16, #tpu.memory_space<vmem>>, %arg6: memref<16x8xbf16, #tpu.memory_space<vmem>>, %arg7: memref<16x8xbf16, #tpu.memory_space<vmem>>, %arg8: memref<1x8xf32, #tpu.memory_space<vmem>>, %arg9: memref<8x32x8xf32, #tpu.memory_space<vmem>>, %arg10: memref<8x32x128xf32, #tpu.memory_space<vmem>>, %arg11: memref<8x32x16xf32, #tpu.memory_space<vmem>>, %arg12: memref<8x32x16xf32, #tpu.memory_space<vmem>>, %arg13: memref<32x16xf32, #tpu.memory_space<vmem>>, %arg14: memref<32x16xf32, #tpu.memory_space<vmem>>, %arg15: memref<32x16xf32, #tpu.memory_space<vmem>>, %arg16: memref<32x16xf32, #tpu.memory_space<vmem>>) attributes {dimension_semantics = [#tpu.dimension_semantics<parallel>], iteration_bounds = array<i64: 1>, scalar_prefetch = 0 : i64, scratch_operands = 7 : i64, tpu.core_type = #tpu.core_type<tc>, window_params = [{transform_indices = @transform_0, window_bounds = array<i64: 8, 32, 8>}, {pipeline_mode = #tpu.pipeline_mode<synchronous>, transform_indices = @transform_1, window_bounds = array<i64: 8, 128>}, {pipeline_mode = #tpu.pipeline_mode<synchronous>, transform_indices = @transform_2, window_bounds = array<i64: 1, 128>}, {pipeline_mode = #tpu.pipeline_mode<synchronous>, transform_indices = @transform_3, window_bounds = array<i64: 16, 64>}, {pipeline_mode = #tpu.pipeline_mode<synchronous>, transform_indices = @transform_4, window_bounds = array<i64: 16, 64>}, {pipeline_mode = #tpu.pipeline_mode<synchronous>, transform_indices = @transform_5, window_bounds = array<i64: 16, 8>}, {pipeline_mode = #tpu.pipeline_mode<synchronous>, transform_indices = @transform_6, window_bounds = array<i64: 16, 8>}, {pipeline_mode = #tpu.pipeline_mode<synchronous>, transform_indices = @transform_7, window_bounds = array<i64: 1, 8>}, {transform_indices = @transform_8, window_bounds = array<i64: 8, 32, 8>}]} {
    %c0 = arith.constant 0 : index
    %c0_0 = arith.constant 0 : index
    %c0_1 = arith.constant 0 : index
    %0 = vector.load %arg1[%c0, %c0_0, %c0_1] : memref<8x32x8xbf16, #tpu.memory_space<vmem>>, vector<8x32x8xbf16>
    %1 = vector.shape_cast %0 : vector<8x32x8xbf16> to vector<256x8xbf16>
    %c0_2 = arith.constant 0 : index
    %c0_3 = arith.constant 0 : index
    %2 = vector.load %arg2[%c0_2, %c0_3] : memref<8x128xbf16, #tpu.memory_space<vmem>>, vector<8x128xbf16>
    %cst = arith.constant dense<0.000000e+00> : vector<256x128xf32>
    %3 = tpu.matmul %1, %2, %cst {dimension_numbers = #tpu.dot_dimension_numbers<[1], [0], [0], [1], [0, 0, 1, 1], [], []>} : vector<256x8xbf16>, vector<8x128xbf16>, vector<256x128xf32> -> vector<256x128xf32>
    %c0_4 = arith.constant 0 : index
    %c0_5 = arith.constant 0 : index
    %4 = vector.load %arg3[%c0_4, %c0_5] : memref<1x128xf32, #tpu.memory_space<vmem>>, vector<1x128xf32>
    %5 = vector.broadcast %4 : vector<1x128xf32> to vector<256x128xf32>
    %6 = arith.addf %3, %5 : vector<256x128xf32>
    %7 = vector.shape_cast %6 : vector<256x128xf32> to vector<8x32x128xf32>
    %c0_6 = arith.constant 0 : index
    %c0_7 = arith.constant 0 : index
    %c0_8 = arith.constant 0 : index
    %8 = vector.load %arg10[%c0_6, %c0_7, %c0_8] : memref<8x32x128xf32, #tpu.memory_space<vmem>>, vector<8x32x128xf32>
    tpu.vector_store %arg10[%c0_6, %c0_7, %c0_8], %7 {strides = array<i32>} : memref<8x32x128xf32, #tpu.memory_space<vmem>>, vector<8x32x128xf32>,
    %cst_9 = arith.constant 0.000000e+00 : f32
    %9 = vector.broadcast %cst_9 : f32 to vector<32x16xf32>
    %c0_10 = arith.constant 0 : index
    %c0_11 = arith.constant 0 : index
    %10 = vector.load %arg13[%c0_10, %c0_11] : memref<32x16xf32, #tpu.memory_space<vmem>>, vector<32x16xf32>
    tpu.vector_store %arg13[%c0_10, %c0_11], %9 {strides = array<i32>} : memref<32x16xf32, #tpu.memory_space<vmem>>, vector<32x16xf32>,
    %c0_12 = arith.constant 0 : index
    %c0_13 = arith.constant 0 : index
    %11 = vector.load %arg14[%c0_12, %c0_13] : memref<32x16xf32, #tpu.memory_space<vmem>>, vector<32x16xf32>
    tpu.vector_store %arg14[%c0_12, %c0_13], %9 {strides = array<i32>} : memref<32x16xf32, #tpu.memory_space<vmem>>, vector<32x16xf32>,
    %c0_14 = arith.constant 0 : index
    %c0_15 = arith.constant 0 : index
    %12 = vector.load %arg15[%c0_14, %c0_15] : memref<32x16xf32, #tpu.memory_space<vmem>>, vector<32x16xf32>
    tpu.vector_store %arg15[%c0_14, %c0_15], %9 {strides = array<i32>} : memref<32x16xf32, #tpu.memory_space<vmem>>, vector<32x16xf32>,
    %c0_16 = arith.constant 0 : index
    %c0_17 = arith.constant 0 : index
    %13 = vector.load %arg16[%c0_16, %c0_17] : memref<32x16xf32, #tpu.memory_space<vmem>>, vector<32x16xf32>
    tpu.vector_store %arg16[%c0_16, %c0_17], %9 {strides = array<i32>} : memref<32x16xf32, #tpu.memory_space<vmem>>, vector<32x16xf32>,
    %c0_i32 = arith.constant 0 : i32
    %c8_i32 = arith.constant 8 : i32
    %14 = arith.addi %c0_i32, %c8_i32 : i32
    %c1_i32 = arith.constant 1 : i32
    scf.for %arg17 = %c0_i32 to %14 step %c1_i32  : i32 {
      %c1_i32_36 = arith.constant 1 : i32
      %31 = arith.muli %arg17, %c1_i32_36 : i32
      %c0_i32_37 = arith.constant 0 : i32
      %32 = arith.addi %c0_i32_37, %31 : i32
      %c7_i32 = arith.constant 7 : i32
      %33 = arith.subi %c7_i32, %32 : i32
      %34 = arith.index_cast %32 : i32 to index
      %c0_38 = arith.constant 0 : index
      %c0_39 = arith.constant 0 : index
      %35 = vector.load %arg10[%34, %c0_38, %c0_39] : memref<8x32x128xf32, #tpu.memory_space<vmem>>, vector<1x32x128xf32>
      %36 = vector.shape_cast %35 : vector<1x32x128xf32> to vector<32x128xf32>
      %37 = vector.extract_strided_slice %36 {offsets = [0, 0], sizes = [32, 64], strides = [1, 1]} : vector<32x128xf32> to vector<32x64xf32>
      %c0_40 = arith.constant 0 : index
      %c0_41 = arith.constant 0 : index
      %38 = vector.load %arg13[%c0_40, %c0_41] : memref<32x16xf32, #tpu.memory_space<vmem>>, vector<32x16xf32>
      %39 = arith.truncf %38 : vector<32x16xf32> to vector<32x16xbf16>
      %c0_42 = arith.constant 0 : index
      %c0_43 = arith.constant 0 : index
      %40 = vector.load %arg4[%c0_42, %c0_43] : memref<16x64xbf16, #tpu.memory_space<vmem>>, vector<16x64xbf16>
      %cst_44 = arith.constant dense<0.000000e+00> : vector<32x64xf32>
      %41 = tpu.matmul %39, %40, %cst_44 {dimension_numbers = #tpu.dot_dimension_numbers<[1], [0], [0], [1], [0, 0, 1, 1], [], []>} : vector<32x16xbf16>, vector<16x64xbf16>, vector<32x64xf32> -> vector<32x64xf32>
      %42 = arith.addf %37, %41 : vector<32x64xf32>
      %c0_45 = arith.constant 0 : index
      %c0_46 = arith.constant 0 : index
      %43 = vector.load %arg14[%c0_45, %c0_46] : memref<32x16xf32, #tpu.memory_space<vmem>>, vector<32x16xf32>
      %44 = vector.extract_strided_slice %42 {offsets = [0, 0], sizes = [32, 16], strides = [1, 1]} : vector<32x64xf32> to vector<32x16xf32>
      %45 = arith.negf %44 : vector<32x16xf32>
      %46 = math.exp %45 : vector<32x16xf32>
      %cst_47 = arith.constant 1.000000e+00 : f32
      %47 = vector.broadcast %cst_47 : f32 to vector<32x16xf32>
      %48 = arith.addf %47, %46 : vector<32x16xf32>
      %49 = arith.divf %47, %48 : vector<32x16xf32>
      %50 = vector.extract_strided_slice %42 {offsets = [0, 16], sizes = [32, 16], strides = [1, 1]} : vector<32x64xf32> to vector<32x16xf32>
      %51 = arith.negf %50 : vector<32x16xf32>
      %52 = math.exp %51 : vector<32x16xf32>
      %cst_48 = arith.constant 1.000000e+00 : f32
      %53 = vector.broadcast %cst_48 : f32 to vector<32x16xf32>
      %54 = arith.addf %53, %52 : vector<32x16xf32>
      %55 = arith.divf %53, %54 : vector<32x16xf32>
      %56 = vector.extract_strided_slice %42 {offsets = [0, 32], sizes = [32, 16], strides = [1, 1]} : vector<32x64xf32> to vector<32x16xf32>
      %57 = math.tanh %56 : vector<32x16xf32>
      %58 = vector.extract_strided_slice %42 {offsets = [0, 48], sizes = [32, 16], strides = [1, 1]} : vector<32x64xf32> to vector<32x16xf32>
      %59 = arith.negf %58 : vector<32x16xf32>
      %60 = math.exp %59 : vector<32x16xf32>
      %cst_49 = arith.constant 1.000000e+00 : f32
      %61 = vector.broadcast %cst_49 : f32 to vector<32x16xf32>
      %62 = arith.addf %61, %60 : vector<32x16xf32>
      %63 = arith.divf %61, %62 : vector<32x16xf32>
      %64 = arith.mulf %55, %43 : vector<32x16xf32>
      %65 = arith.mulf %49, %57 : vector<32x16xf32>
      %66 = arith.addf %64, %65 : vector<32x16xf32>
      %67 = math.tanh %66 : vector<32x16xf32>
      %68 = arith.mulf %63, %67 : vector<32x16xf32>
      %c0_50 = arith.constant 0 : index
      %c0_51 = arith.constant 0 : index
      %69 = vector.load %arg13[%c0_50, %c0_51] : memref<32x16xf32, #tpu.memory_space<vmem>>, vector<32x16xf32>
      tpu.vector_store %arg13[%c0_50, %c0_51], %68 {strides = array<i32>} : memref<32x16xf32, #tpu.memory_space<vmem>>, vector<32x16xf32>,
      %c0_52 = arith.constant 0 : index
      %c0_53 = arith.constant 0 : index
      %70 = vector.load %arg14[%c0_52, %c0_53] : memref<32x16xf32, #tpu.memory_space<vmem>>, vector<32x16xf32>
      tpu.vector_store %arg14[%c0_52, %c0_53], %66 {strides = array<i32>} : memref<32x16xf32, #tpu.memory_space<vmem>>, vector<32x16xf32>,
      %71 = arith.index_cast %32 : i32 to index
      %c0_54 = arith.constant 0 : index
      %c0_55 = arith.constant 0 : index
      %72 = vector.load %arg11[%71, %c0_54, %c0_55] : memref<8x32x16xf32, #tpu.memory_space<vmem>>, vector<1x32x16xf32>
      %73 = vector.shape_cast %72 : vector<1x32x16xf32> to vector<32x16xf32>
      %74 = vector.shape_cast %68 : vector<32x16xf32> to vector<1x32x16xf32>
      tpu.vector_store %arg11[%71, %c0_54, %c0_55], %74 {strides = array<i32>} : memref<8x32x16xf32, #tpu.memory_space<vmem>>, vector<1x32x16xf32>,
      %75 = arith.index_cast %33 : i32 to index
      %c0_56 = arith.constant 0 : index
      %c0_57 = arith.constant 0 : index
      %76 = vector.load %arg10[%75, %c0_56, %c0_57] : memref<8x32x128xf32, #tpu.memory_space<vmem>>, vector<1x32x128xf32>
      %77 = vector.shape_cast %76 : vector<1x32x128xf32> to vector<32x128xf32>
      %78 = vector.extract_strided_slice %77 {offsets = [0, 64], sizes = [32, 64], strides = [1, 1]} : vector<32x128xf32> to vector<32x64xf32>
      %c0_58 = arith.constant 0 : index
      %c0_59 = arith.constant 0 : index
      %79 = vector.load %arg15[%c0_58, %c0_59] : memref<32x16xf32, #tpu.memory_space<vmem>>, vector<32x16xf32>
      %80 = arith.truncf %79 : vector<32x16xf32> to vector<32x16xbf16>
      %c0_60 = arith.constant 0 : index
      %c0_61 = arith.constant 0 : index
      %81 = vector.load %arg5[%c0_60, %c0_61] : memref<16x64xbf16, #tpu.memory_space<vmem>>, vector<16x64xbf16>
      %cst_62 = arith.constant dense<0.000000e+00> : vector<32x64xf32>
      %82 = tpu.matmul %80, %81, %cst_62 {dimension_numbers = #tpu.dot_dimension_numbers<[1], [0], [0], [1], [0, 0, 1, 1], [], []>} : vector<32x16xbf16>, vector<16x64xbf16>, vector<32x64xf32> -> vector<32x64xf32>
      %83 = arith.addf %78, %82 : vector<32x64xf32>
      %c0_63 = arith.constant 0 : index
      %c0_64 = arith.constant 0 : index
      %84 = vector.load %arg16[%c0_63, %c0_64] : memref<32x16xf32, #tpu.memory_space<vmem>>, vector<32x16xf32>
      %85 = vector.extract_strided_slice %83 {offsets = [0, 0], sizes = [32, 16], strides = [1, 1]} : vector<32x64xf32> to vector<32x16xf32>
      %86 = arith.negf %85 : vector<32x16xf32>
      %87 = math.exp %86 : vector<32x16xf32>
      %cst_65 = arith.constant 1.000000e+00 : f32
      %88 = vector.broadcast %cst_65 : f32 to vector<32x16xf32>
      %89 = arith.addf %88, %87 : vector<32x16xf32>
      %90 = arith.divf %88, %89 : vector<32x16xf32>
      %91 = vector.extract_strided_slice %83 {offsets = [0, 16], sizes = [32, 16], strides = [1, 1]} : vector<32x64xf32> to vector<32x16xf32>
      %92 = arith.negf %91 : vector<32x16xf32>
      %93 = math.exp %92 : vector<32x16xf32>
      %cst_66 = arith.constant 1.000000e+00 : f32
      %94 = vector.broadcast %cst_66 : f32 to vector<32x16xf32>
      %95 = arith.addf %94, %93 : vector<32x16xf32>
      %96 = arith.divf %94, %95 : vector<32x16xf32>
      %97 = vector.extract_strided_slice %83 {offsets = [0, 32], sizes = [32, 16], strides = [1, 1]} : vector<32x64xf32> to vector<32x16xf32>
      %98 = math.tanh %97 : vector<32x16xf32>
      %99 = vector.extract_strided_slice %83 {offsets = [0, 48], sizes = [32, 16], strides = [1, 1]} : vector<32x64xf32> to vector<32x16xf32>
      %100 = arith.negf %99 : vector<32x16xf32>
      %101 = math.exp %100 : vector<32x16xf32>
      %cst_67 = arith.constant 1.000000e+00 : f32
      %102 = vector.broadcast %cst_67 : f32 to vector<32x16xf32>
      %103 = arith.addf %102, %101 : vector<32x16xf32>
      %104 = arith.divf %102, %103 : vector<32x16xf32>
      %105 = arith.mulf %96, %84 : vector<32x16xf32>
      %106 = arith.mulf %90, %98 : vector<32x16xf32>
      %107 = arith.addf %105, %106 : vector<32x16xf32>
      %108 = math.tanh %107 : vector<32x16xf32>
      %109 = arith.mulf %104, %108 : vector<32x16xf32>
      %c0_68 = arith.constant 0 : index
      %c0_69 = arith.constant 0 : index
      %110 = vector.load %arg15[%c0_68, %c0_69] : memref<32x16xf32, #tpu.memory_space<vmem>>, vector<32x16xf32>
      tpu.vector_store %arg15[%c0_68, %c0_69], %109 {strides = array<i32>} : memref<32x16xf32, #tpu.memory_space<vmem>>, vector<32x16xf32>,
      %c0_70 = arith.constant 0 : index
      %c0_71 = arith.constant 0 : index
      %111 = vector.load %arg16[%c0_70, %c0_71] : memref<32x16xf32, #tpu.memory_space<vmem>>, vector<32x16xf32>
      tpu.vector_store %arg16[%c0_70, %c0_71], %107 {strides = array<i32>} : memref<32x16xf32, #tpu.memory_space<vmem>>, vector<32x16xf32>,
      %112 = arith.index_cast %33 : i32 to index
      %c0_72 = arith.constant 0 : index
      %c0_73 = arith.constant 0 : index
      %113 = vector.load %arg12[%112, %c0_72, %c0_73] : memref<8x32x16xf32, #tpu.memory_space<vmem>>, vector<1x32x16xf32>
      %114 = vector.shape_cast %113 : vector<1x32x16xf32> to vector<32x16xf32>
      %115 = vector.shape_cast %109 : vector<32x16xf32> to vector<1x32x16xf32>
      tpu.vector_store %arg12[%112, %c0_72, %c0_73], %115 {strides = array<i32>} : memref<8x32x16xf32, #tpu.memory_space<vmem>>, vector<1x32x16xf32>,
    }
    %c8_i32_18 = arith.constant 8 : i32
    %c0_19 = arith.constant 0 : index
    %c0_20 = arith.constant 0 : index
    %c0_21 = arith.constant 0 : index
    %15 = vector.load %arg11[%c0_19, %c0_20, %c0_21] : memref<8x32x16xf32, #tpu.memory_space<vmem>>, vector<8x32x16xf32>
    %16 = vector.shape_cast %15 : vector<8x32x16xf32> to vector<256x16xf32>
    %17 = arith.truncf %16 : vector<256x16xf32> to vector<256x16xbf16>
    %c0_22 = arith.constant 0 : index
    %c0_23 = arith.constant 0 : index
    %c0_24 = arith.constant 0 : index
    %18 = vector.load %arg12[%c0_22, %c0_23, %c0_24] : memref<8x32x16xf32, #tpu.memory_space<vmem>>, vector<8x32x16xf32>
    %19 = vector.shape_cast %18 : vector<8x32x16xf32> to vector<256x16xf32>
    %20 = arith.truncf %19 : vector<256x16xf32> to vector<256x16xbf16>
    %c0_25 = arith.constant 0 : index
    %c0_26 = arith.constant 0 : index
    %21 = vector.load %arg6[%c0_25, %c0_26] : memref<16x8xbf16, #tpu.memory_space<vmem>>, vector<16x8xbf16>
    %cst_27 = arith.constant dense<0.000000e+00> : vector<256x8xf32>
    %22 = tpu.matmul %17, %21, %cst_27 {dimension_numbers = #tpu.dot_dimension_numbers<[1], [0], [0], [1], [0, 0, 1, 1], [], []>} : vector<256x16xbf16>, vector<16x8xbf16>, vector<256x8xf32> -> vector<256x8xf32>
    %c0_28 = arith.constant 0 : index
    %c0_29 = arith.constant 0 : index
    %23 = vector.load %arg7[%c0_28, %c0_29] : memref<16x8xbf16, #tpu.memory_space<vmem>>, vector<16x8xbf16>
    %cst_30 = arith.constant dense<0.000000e+00> : vector<256x8xf32>
    %24 = tpu.matmul %20, %23, %cst_30 {dimension_numbers = #tpu.dot_dimension_numbers<[1], [0], [0], [1], [0, 0, 1, 1], [], []>} : vector<256x16xbf16>, vector<16x8xbf16>, vector<256x8xf32> -> vector<256x8xf32>
    %25 = arith.addf %22, %24 : vector<256x8xf32>
    %c0_31 = arith.constant 0 : index
    %c0_32 = arith.constant 0 : index
    %26 = vector.load %arg8[%c0_31, %c0_32] : memref<1x8xf32, #tpu.memory_space<vmem>>, vector<1x8xf32>
    %27 = vector.broadcast %26 : vector<1x8xf32> to vector<256x8xf32>
    %28 = arith.addf %25, %27 : vector<256x8xf32>
    %29 = vector.shape_cast %28 : vector<256x8xf32> to vector<8x32x8xf32>
    %c0_33 = arith.constant 0 : index
    %c0_34 = arith.constant 0 : index
    %c0_35 = arith.constant 0 : index
    %30 = vector.load %arg9[%c0_33, %c0_34, %c0_35] : memref<8x32x8xf32, #tpu.memory_space<vmem>>, vector<8x32x8xf32>
    tpu.vector_store %arg9[%c0_33, %c0_34, %c0_35], %29 {strides = array<i32>} : memref<8x32x8xf32, #tpu.memory_space<vmem>>, vector<8x32x8xf32>,
    return
  }
  func.func @transform_0(%arg0: i32) -> (i32, i32, i32) {
    %c0_i32 = arith.constant 0 : i32
    %c0_i32_0 = arith.constant 0 : i32
    %c0_i32_1 = arith.constant 0 : i32
    return %c0_i32, %arg0, %c0_i32_0 : i32, i32, i32
  }
  func.func @transform_1(%arg0: i32) -> (i32, i32) {
    %c0_i32 = arith.constant 0 : i32
    %c0_i32_0 = arith.constant 0 : i32
    %c0_i32_1 = arith.constant 0 : i32
    return %c0_i32, %c0_i32_0 : i32, i32
  }
  func.func @transform_2(%arg0: i32) -> (i32, i32) {
    %c0_i32 = arith.constant 0 : i32
    %c0_i32_0 = arith.constant 0 : i32
    %c0_i32_1 = arith.constant 0 : i32
    return %c0_i32, %c0_i32_0 : i32, i32
  }
  func.func @transform_3(%arg0: i32) -> (i32, i32) {
    %c0_i32 = arith.constant 0 : i32
    %c0_i32_0 = arith.constant 0 : i32
    %c0_i32_1 = arith.constant 0 : i32
    return %c0_i32, %c0_i32_0 : i32, i32
  }
  func.func @transform_4(%arg0: i32) -> (i32, i32) {
    %c0_i32 = arith.constant 0 : i32
    %c0_i32_0 = arith.constant 0 : i32
    %c0_i32_1 = arith.constant 0 : i32
    return %c0_i32, %c0_i32_0 : i32, i32
  }
  func.func @transform_5(%arg0: i32) -> (i32, i32) {
    %c0_i32 = arith.constant 0 : i32
    %c0_i32_0 = arith.constant 0 : i32
    %c0_i32_1 = arith.constant 0 : i32
    return %c0_i32, %c0_i32_0 : i32, i32
  }
  func.func @transform_6(%arg0: i32) -> (i32, i32) {
    %c0_i32 = arith.constant 0 : i32
    %c0_i32_0 = arith.constant 0 : i32
    %c0_i32_1 = arith.constant 0 : i32
    return %c0_i32, %c0_i32_0 : i32, i32
  }
  func.func @transform_7(%arg0: i32) -> (i32, i32) {
    %c0_i32 = arith.constant 0 : i32
    %c0_i32_0 = arith.constant 0 : i32
    %c0_i32_1 = arith.constant 0 : i32
    return %c0_i32, %c0_i32_0 : i32, i32
  }
  func.func @transform_8(%arg0: i32) -> (i32, i32, i32) {
    %c0_i32 = arith.constant 0 : i32
    %c0_i32_0 = arith.constant 0 : i32
    %c0_i32_1 = arith.constant 0 : i32
    return %c0_i32, %arg0, %c0_i32_0 : i32, i32, i32
  }
}

</mosaic_0001>

<bundles_post_ra>
// kernel: recurrent_block.5
= control target key start
LH: loop header
LB: loop body
LE: loop exit
PB: predicated region body
PF: predicated region fallthrough
CT: control target
= control target key end

     0   :  { %s374_s15 = smov 0   ;;  %s405_s0 = inlined_call_operand.vmem [shape: f32[2,8,128], index: 0, kind: input, shape index: {}]   ;;  %s406_s1 = inlined_call_operand.vmem [shape: f32[2,8,128], index: 1, kind: input, shape index: {}]   ;;  %s407_s2 = inlined_call_operand.vmem [shape: f32[1,8,1], index: 2, kind: input, shape index: {}]   ;;  %s408_s3 = inlined_call_operand.vmem [shape: f32[1,8,1], index: 3, kind: input, shape index: {}]   ;;  %s409_s4 = inlined_call_operand.vmem [shape: f32[2,8,128], index: 4, kind: output, shape index: {}]  }
   0x1 LB: > { %s317_s16 = sadd.s32 4294967295, %s346_s15   ;;  %p321_p0 = scmp.ge.s32.totalorder %s346_s15, 1  ;;  %s346_s15 = sphi %s374_s15, %s14_s15  }
   0x2   : > { %p170_p1 = scmp.lt.s32.totalorder %s346_s15, 3 }
   0x4   : > { %p171_p2 = pnand %p321_p0, %p170_p1 }
   0x5   : > { %p198_p3 = scmp.lt.s32.totalorder (!%p171_p2), %s317_s16, 1 }
   0x6   : > { %174 = sbr.rel (%p171_p2) target bundleno = 348 (0x15c), region = 36 }
   0xb   : > { %s411_s16 = smov (!%p198_p3, %s317_s16), 1  ;;  %v236_v1 = vld [vmem:[%s407_s2] sm:$0xff]  ;;  %v348_v2 = vmov 0  }
   0xc   : > { %s382_s17 = sshll.u32 %s411_s16, 3  ;;  %336 = vset.pattern.permute.xlu1 %v348_v2  ;;  %337 = vset.pattern.permute.xlu0 %v348_v2  ;;  %v244_v3 = vld [vmem:[%s408_s3] sm:$0xff] }
   0xd   : > { %s205_s20 = scalar_lea.vmem %s406_s1, %s382_s17  ;;  %239 = vperm.xlu1 %336, %v236_v1   ;;  %s201_s27 = scalar_lea.vmem %s405_s0, %s382_s17 }
   0xe   : > { %v210_v0 = vld [vmem:[%s205_s20] sm:$0xff]  ;;  %s209_s30 = scalar_lea.vmem %s409_s4, %s382_s17 }
   0xf   : > { %211 = vadd.xlane.f32.xlu0 %v210_v0  ;;  %v235_v26 = vld [vmem:[%s201_s27] sm:$0xff] }
  0x11   : > { %247 = vperm.xlu1 %336, %v244_v3  }
  0x88   : > { %v240_v24 = vpop.permute.xlu1 %239 }
  0x8c   : > { %v248_v29 = vpop.permute.xlu1 %247 }
  0x98   : > { %v212_v4 = vpop.xlane.xlu0 %211 }
  0x99   : > { %v213_v5 = vrot.slane %v212_v4, 4 }
  0x9b   : > { %v214_v6 = vadd.f32 %v213_v5, %v212_v4 }
  0x9d   : > { %v215_v7 = vrot.slane %v214_v6, 2 }
  0x9f   : > { %v216_v8 = vadd.f32 %v215_v7, %v214_v6 }
  0xa1   : > { %v217_v9 = vrot.slane %v216_v8, 1 }
  0xa3   : > { %v218_v10 = vadd.f32 %v217_v9, %v216_v8 }
  0xa5   : > { %v220_v11 = vmul.f32 0.0009765625, %v218_v10 }
  0xa7   : > { %v221_v12 = vsub.f32 %v210_v0, %v220_v11 }
  0xa9   : > { %v222_v13 = vmul.f32 %v221_v12, %v221_v12 }
  0xab   : > { %223 = vadd.xlane.f32.xlu0 %v222_v13 }
 0x134   : > { %v224_v14 = vpop.xlane.xlu0 %223 }
 0x135   : > { %v225_v15 = vrot.slane %v224_v14, 4 }
 0x137   : > { %v226_v16 = vadd.f32 %v225_v15, %v224_v14 }
 0x139   : > { %v227_v17 = vrot.slane %v226_v16, 2 }
 0x13b   : > { %v228_v18 = vadd.f32 %v227_v17, %v226_v16 }
 0x13d   : > { %v229_v19 = vrot.slane %v228_v18, 1 }
 0x13f   : > { %v230_v20 = vadd.f32 %v229_v19, %v228_v18 }
 0x141   : > { %v231_v21 = vmul.f32 0.0009765625, %v230_v20 }
 0x143   : > { %v232_v22 = vadd.f32 1e-08, %v231_v21 }
 0x145   : > { %338 = vrsqrt.f32 %v232_v22 }
 0x152   : > { %v339_v23 = vpop.eup %338 }
 0x153   : > { %v234_v25 = vmul.f32 %v339_v23, %v221_v12 }
 0x155   : > { %v242_v27 = vmul.f32 %v240_v24, %v234_v25 }
 0x157   : > { %v243_v28 = vadd.f32 %v242_v27, %v235_v26 }
 0x159   : > { %v250_v30 = vadd.f32 %v248_v29, %v243_v28 }
 0x15b   : > { %251 = vst [vmem:[%s209_s30] sm:$0xff] %v250_v30 }
 0x15c PF: > { %s14_s15 = sadd.s32 1, %s346_s15  }
 0x15d   : > { %p11_p4 = scmp.ge.s32.totalorder %s14_s15, 4  }
 0x15f   :  { %13 = sbr.rel (!%p11_p4) target bundleno = 1 (0x1), region = 69 }

// kernel: recurrent_block.4
= control target key start
LH: loop header
LB: loop body
LE: loop exit
PB: predicated region body
PF: predicated region fallthrough
CT: control target
= control target key end

     0   :  { %vm199_vm0 = vcmask 1043456   ;;  %vm150_vm1 = vcmask 64512   ;;  %vm396_vm2 = vcmask 130048   ;;  %v1651_v18 = vmov 0.0   ;;  %s2076_s1 = inlined_call_operand.vmem [shape: bf16[8,128], index: 1, kind: input, shape index: {}]   ;;  %s2077_s3 = inlined_call_operand.vmem [shape: bf16[16,64], index: 3, kind: input, shape index: {}]   ;;  %s2078_s4 = inlined_call_operand.vmem [shape: bf16[16,64], index: 4, kind: input, shape index: {}]   ;;  %s2079_s5 = inlined_call_operand.vmem [shape: bf16[16,8], index: 5, kind: input, shape index: {}]   ;;  %s2080_s6 = inlined_call_operand.vmem [shape: bf16[16,8], index: 6, kind: input, shape index: {}]   ;;  %s2081_s7 = inlined_call_operand.vmem [shape: f32[1,8], index: 7, kind: input, shape index: {}]   ;;  %s2082_s8 = inlined_call_operand.vmem [shape: f32[16,16,8], index: 8, kind: output, shape index: {}]   ;;  %s2083_s0 = inlined_call_operand.vmem [shape: bf16[16,16,8], index: 0, kind: input, shape index: {}]   ;;  %s2084_s2 = inlined_call_operand.vmem [shape: f32[1,128], index: 2, kind: input, shape index: {}]  }
   0x1   :  { %v62_v0 = vld [vmem:[%s2076_s1] sm:$0xf]  ;;  %v1593_v4 = vld [vmem:[%s2083_s0 + $0x8] sm:$0xff]   ;;  %v1595_v6 = vld [vmem:[%s2083_s0 + $0x10] sm:$0xff]   ;;  %397 = vst.msk [vmem:[#allocation5] sm:$0xff] %vm396_vm2, %v1651_v18 }
   0x2   :  { %1571 = vmatprep.subr.msk.bf16.mxu0 %vm199_vm0, %v62_v0  ;;  %1572 = vmatprep.subr.msk.bf16.mxu1 %vm199_vm0, %v62_v0  ;;  %v201_v1 = vsel %vm199_vm0, %v62_v0, 0  ;;  %v1591_v2 = vld [vmem:[%s2083_s0] sm:$0xff]   ;;  %v1594_v5 = vld [vmem:[%s2083_s0 + $0x48] sm:$0xff]   ;;  %v1596_v7 = vld [vmem:[%s2083_s0 + $0x50] sm:$0xff]   ;;  %398 = vst.msk [vmem:[#allocation5 + $0x8] sm:$0xff] %vm396_vm2, %v1651_v18 }
   0x3   :  { %1456 = vmatpush3.bf16.msra.mxu0 %v201_v1  ;;  %1570 = vmatpush3.bf16.msra.mxu1 %v201_v1  ;;  %v1592_v3 = vld [vmem:[%s2083_s0 + $0x40] sm:$0xff]   ;;  %v1597_v8 = vld [vmem:[%s2083_s0 + $0x18] sm:$0xff]   ;;  %v1601_v12 = vld [vmem:[%s2083_s0 + $0x28] sm:$0xff]   ;;  %399 = vst.msk [vmem:[#allocation6] sm:$0xff] %vm396_vm2, %v1651_v18 }
   0x4   :  { %1457 = vmatprep.mubr.msk.bf16.mxu0 %vm150_vm1, %v1591_v2  ;;  %1473 = vmatprep.mubr.msk.bf16.mxu1 %vm150_vm1, %v1592_v3  ;;  %v1598_v9 = vld [vmem:[%s2083_s0 + $0x58] sm:$0xff]   ;;  %v1599_v10 = vld [vmem:[%s2083_s0 + $0x20] sm:$0xff]   ;;  %v1602_v13 = vld [vmem:[%s2083_s0 + $0x68] sm:$0xff]   ;;  %400 = vst.msk [vmem:[#allocation6 + $0x8] sm:$0xff] %vm396_vm2, %v1651_v18 }
   0x5   :  { %v1600_v11 = vld [vmem:[%s2083_s0 + $0x60] sm:$0xff]   ;;  %v1603_v14 = vld [vmem:[%s2083_s0 + $0x30] sm:$0xff]   ;;  %v1605_v16 = vld [vmem:[%s2083_s0 + $0x38] sm:$0xff]   ;;  %401 = vst.msk [vmem:[#allocation7] sm:$0xff] %vm396_vm2, %v1651_v18 }
   0x6   :  { %1458 = vmatmul.mubr.msk.bf16.vlgmr.msra.gmra.mxu0 %vm150_vm1, %v1593_v4  ;;  %1474 = vmatmul.mubr.msk.bf16.vlgmr.msra.gmra.mxu1 %vm150_vm1, %v1594_v5  ;;  %v1604_v15 = vld [vmem:[%s2083_s0 + $0x70] sm:$0xff]   ;;  %v1606_v17 = vld [vmem:[%s2083_s0 + $0x78] sm:$0xff]   ;;  %402 = vst.msk [vmem:[#allocation7 + $0x8] sm:$0xff] %vm396_vm2, %v1651_v18  ;;  %403 = vst.msk [vmem:[#allocation8] sm:$0xff] %vm396_vm2, %v1651_v18 }
   0x7   :  { %1461 = vmatprep.mubr.msk.bf16.mxu0 %vm150_vm1, %v1595_v6  ;;  %1477 = vmatprep.mubr.msk.bf16.mxu1 %vm150_vm1, %v1596_v7  ;;  %404 = vst.msk [vmem:[#allocation8 + $0x8] sm:$0xff] %vm396_vm2, %v1651_v18  ;;  %v1784_v19 = vld [vmem:[%s2084_s2] ss:$0 sm:$0xff]  ;;  %s1818_s2 = smov 0  }
   0xe   :  { %1462 = vmatmul.mubr.msk.bf16.gmra.mxu0 %vm150_vm1, %v1597_v8  ;;  %1478 = vmatmul.mubr.msk.bf16.gmra.mxu1 %vm150_vm1, %v1598_v9 }
   0xf   :  { %1465 = vmatprep.mubr.msk.bf16.mxu0 %vm150_vm1, %v1599_v10  ;;  %1481 = vmatprep.mubr.msk.bf16.mxu1 %vm150_vm1, %v1600_v11 }
  0x16   :  { %1466 = vmatmul.mubr.msk.bf16.gmra.mxu0 %vm150_vm1, %v1601_v12  ;;  %1482 = vmatmul.mubr.msk.bf16.gmra.mxu1 %vm150_vm1, %v1602_v13 }
  0x17   :  { %1469 = vmatprep.mubr.msk.bf16.mxu0 %vm150_vm1, %v1603_v14  ;;  %1485 = vmatprep.mubr.msk.bf16.mxu1 %vm150_vm1, %v1604_v15 }
  0x1e   :  { %1470 = vmatmul.mubr.msk.bf16.gmra.mxu0 %vm150_vm1, %v1605_v16  ;;  %1486 = vmatmul.mubr.msk.bf16.gmra.mxu1 %vm150_vm1, %v1606_v17 }
  0xc6   :  { %v1459_v20 = vpop.f32.mrf.mxu0  ;;  %v1475_v22 = vpop.f32.mrf.mxu1 }
  0xc7   :  { %v246_v21 = vadd.f32 %v1459_v20, %v1784_v19  ;;  %v310_v23 = vadd.f32 %v1475_v22, %v1784_v19 }
  0xc8   :  { %v237_v24 = vpop.f32.mrf.mxu0  ;;  %v301_v26 = vpop.f32.mrf.mxu1 }
  0xc9   :  { %366 = vst [vmem:[#allocation2 + $0x10] sm:$0xff] %v246_v21  ;;  %v238_v25 = vadd.f32 %v1784_v19, %v237_v24  ;;  %382 = vst [vmem:[#allocation2 + $0x90] sm:$0xff] %v310_v23  ;;  %v302_v27 = vadd.f32 %v1784_v19, %v301_v26 }
  0xca   :  { %v1460_v28 = vpop.f32.mrf.mxu0  ;;  %v1476_v30 = vpop.f32.mrf.mxu1 }
  0xcb   :  { %364 = vst [vmem:[#allocation2] sm:$0xff] %v238_v25  ;;  %v249_v29 = vadd.f32 %v1460_v28, %v1784_v19  ;;  %380 = vst [vmem:[#allocation2 + $0x80] sm:$0xff] %v302_v27  ;;  %v313_v31 = vadd.f32 %v1476_v30, %v1784_v19 }
  0xcc   :  { %v240_v32 = vpop.f32.mrf.mxu0  ;;  %v304_v34 = vpop.f32.mrf.mxu1 }
  0xcd   :  { %367 = vst [vmem:[#allocation2 + $0x18] sm:$0xff] %v249_v29  ;;  %v241_v33 = vadd.f32 %v1784_v19, %v240_v32  ;;  %383 = vst [vmem:[#allocation2 + $0x98] sm:$0xff] %v313_v31  ;;  %v305_v35 = vadd.f32 %v1784_v19, %v304_v34 }
  0xce   :  { %v1463_v36 = vpop.f32.mrf.mxu0  ;;  %v1479_v38 = vpop.f32.mrf.mxu1 }
  0xcf   :  { %365 = vst [vmem:[#allocation2 + $0x8] sm:$0xff] %v241_v33  ;;  %v262_v37 = vadd.f32 %v1463_v36, %v1784_v19  ;;  %381 = vst [vmem:[#allocation2 + $0x88] sm:$0xff] %v305_v35  ;;  %v326_v39 = vadd.f32 %v1479_v38, %v1784_v19 }
  0xd0   :  { %v253_v40 = vpop.f32.mrf.mxu0  ;;  %v317_v42 = vpop.f32.mrf.mxu1 }
  0xd1   :  { %370 = vst [vmem:[#allocation2 + $0x30] sm:$0xff] %v262_v37  ;;  %v254_v41 = vadd.f32 %v1784_v19, %v253_v40  ;;  %386 = vst [vmem:[#allocation2 + $0xb0] sm:$0xff] %v326_v39  ;;  %v318_v43 = vadd.f32 %v1784_v19, %v317_v42 }
  0xd2   :  { %v1464_v44 = vpop.f32.mrf.mxu0  ;;  %v1480_v46 = vpop.f32.mrf.mxu1 }
  0xd3   :  { %368 = vst [vmem:[#allocation2 + $0x20] sm:$0xff] %v254_v41  ;;  %v265_v45 = vadd.f32 %v1464_v44, %v1784_v19  ;;  %384 = vst [vmem:[#allocation2 + $0xa0] sm:$0xff] %v318_v43  ;;  %v329_v47 = vadd.f32 %v1480_v46, %v1784_v19 }
  0xd4   :  { %v256_v48 = vpop.f32.mrf.mxu0  ;;  %v320_v50 = vpop.f32.mrf.mxu1 }
  0xd5   :  { %371 = vst [vmem:[#allocation2 + $0x38] sm:$0xff] %v265_v45  ;;  %v257_v49 = vadd.f32 %v1784_v19, %v256_v48  ;;  %387 = vst [vmem:[#allocation2 + $0xb8] sm:$0xff] %v329_v47  ;;  %v321_v51 = vadd.f32 %v1784_v19, %v320_v50 }
  0xd6   :  { %v1467_v52 = vpop.f32.mrf.mxu0  ;;  %v1483_v54 = vpop.f32.mrf.mxu1 }
  0xd7   :  { %369 = vst [vmem:[#allocation2 + $0x28] sm:$0xff] %v257_v49  ;;  %v278_v53 = vadd.f32 %v1467_v52, %v1784_v19  ;;  %385 = vst [vmem:[#allocation2 + $0xa8] sm:$0xff] %v321_v51  ;;  %v342_v55 = vadd.f32 %v1483_v54, %v1784_v19 }
  0xd8   :  { %v269_v56 = vpop.f32.mrf.mxu0  ;;  %v333_v58 = vpop.f32.mrf.mxu1 }
  0xd9   :  { %374 = vst [vmem:[#allocation2 + $0x50] sm:$0xff] %v278_v53  ;;  %v270_v57 = vadd.f32 %v1784_v19, %v269_v56  ;;  %390 = vst [vmem:[#allocation2 + $0xd0] sm:$0xff] %v342_v55  ;;  %v334_v59 = vadd.f32 %v1784_v19, %v333_v58 }
  0xda   :  { %v1468_v60 = vpop.f32.mrf.mxu0  ;;  %v1484_v62 = vpop.f32.mrf.mxu1 }
  0xdb   :  { %372 = vst [vmem:[#allocation2 + $0x40] sm:$0xff] %v270_v57  ;;  %v281_v61 = vadd.f32 %v1468_v60, %v1784_v19  ;;  %388 = vst [vmem:[#allocation2 + $0xc0] sm:$0xff] %v334_v59  ;;  %v345_v63 = vadd.f32 %v1484_v62, %v1784_v19 }
  0xdc   :  { %v272_v0 = vpop.f32.mrf.mxu0  ;;  %v336_v2 = vpop.f32.mrf.mxu1 }
  0xdd   :  { %375 = vst [vmem:[#allocation2 + $0x58] sm:$0xff] %v281_v61  ;;  %v273_v1 = vadd.f32 %v1784_v19, %v272_v0  ;;  %391 = vst [vmem:[#allocation2 + $0xd8] sm:$0xff] %v345_v63  ;;  %v337_v3 = vadd.f32 %v1784_v19, %v336_v2 }
  0xde   :  { %v1471_v4 = vpop.f32.mrf.mxu0  ;;  %v1487_v6 = vpop.f32.mrf.mxu1 }
  0xdf   :  { %373 = vst [vmem:[#allocation2 + $0x48] sm:$0xff] %v273_v1  ;;  %v294_v5 = vadd.f32 %v1471_v4, %v1784_v19  ;;  %389 = vst [vmem:[#allocation2 + $0xc8] sm:$0xff] %v337_v3  ;;  %v358_v7 = vadd.f32 %v1487_v6, %v1784_v19 }
  0xe0   :  { %v285_v8 = vpop.f32.mrf.mxu0  ;;  %v349_v10 = vpop.f32.mrf.mxu1 }
  0xe1   :  { %378 = vst [vmem:[#allocation2 + $0x70] sm:$0xff] %v294_v5  ;;  %v286_v9 = vadd.f32 %v1784_v19, %v285_v8  ;;  %394 = vst [vmem:[#allocation2 + $0xf0] sm:$0xff] %v358_v7  ;;  %v350_v11 = vadd.f32 %v1784_v19, %v349_v10 }
  0xe2   :  { %v1472_v12 = vpop.f32.mrf.mxu0  ;;  %v1488_v14 = vpop.f32.mrf.mxu1 }
  0xe3   :  { %376 = vst [vmem:[#allocation2 + $0x60] sm:$0xff] %v286_v9  ;;  %v297_v13 = vadd.f32 %v1472_v12, %v1784_v19  ;;  %392 = vst [vmem:[#allocation2 + $0xe0] sm:$0xff] %v350_v11  ;;  %v361_v15 = vadd.f32 %v1488_v14, %v1784_v19 }
  0xe4   :  { %v288_v16 = vpop.f32.mrf.mxu0  ;;  %v352_v18 = vpop.f32.mrf.mxu1 }
  0xe5   :  { %379 = vst [vmem:[#allocation2 + $0x78] sm:$0xff] %v297_v13  ;;  %v289_v17 = vadd.f32 %v1784_v19, %v288_v16  ;;  %395 = vst [vmem:[#allocation2 + $0xf8] sm:$0xff] %v361_v15  ;;  %v353_v20 = vadd.f32 %v1784_v19, %v352_v18 }
  0xe7   :  { %377 = vst [vmem:[#allocation2 + $0x68] sm:$0xff] %v289_v17  ;;  %393 = vst [vmem:[#allocation2 + $0xe8] sm:$0xff] %v353_v20 }
  0xe8 LB: > { %v1607_v21 = vld [vmem:[%s2078_s4] sm:$0xff]   ;;  %v1652_v22 = vmov 0.0   ;;  %v559_v24 = vld [vmem:[#allocation7 + $0x8] sm:$0xff]  ;;  %vm1653_vm3 = vmmov 0   ;;  %s1355_s20 = sshll.u32 %s1649_s2, 4  ;;  %s1654_s22 = smov 64   ;;  %s1649_s2 = sphi %s1818_s2, %s410_s2  }
  0xe9   : > { %1495 = vmatprep.subr.bf16.mxu1 %v1652_v22  ;;  %v558_v23 = vld [vmem:[#allocation7] sm:$0xff]  ;;  %1489 = vmatprep.subr.bf16.mxu0 %v1652_v22  ;;  %v417_v27 = vld [vmem:[#allocation5 + $0x8] sm:$0xff]  ;;  %s413_s21 = scalar_lea.vmem [#allocation2], %s1355_s20  ;;  %s1655_s23 = smov 96   ;;  %v473_v56 = vld [vmem:[#allocation6] sm:$0xff] }
  0xea   : > { %1496 = vmatpush3.bf16.msra.mxu1 %v1607_v21  ;;  %1497 = vmatprep.mubr.msk.bf16.mxu1 %vm1653_vm3, %v1652_v22  ;;  %v560_v19 = vpack.c.bf16 %v559_v24, %v558_v23  ;;  %v1608_v25 = vld [vmem:[%s2077_s3] sm:$0xff]   ;;  %s411_s24 = ssub.s32 15, %s1649_s2  ;;  %s1656_s27 = smov 16   ;;  %v474_v60 = vld [vmem:[#allocation6 + $0x8] sm:$0xff]  ;;  %v623_v61 = vld [vmem:[#allocation8] sm:$0xff] }
  0xeb   : > { %v416_v26 = vld [vmem:[#allocation5] sm:$0xff]  ;;  %1491 = vmatprep.mubr.msk.bf16.mxu0 %vm1653_vm3, %v1652_v22  ;;  %1490 = vmatpush3.bf16.msra.mxu0 %v1608_v25  ;;  %s1835_s25 = sshll.u32 %s411_s24, 4  ;;  %s1657_s28 = smov 80   ;;  %v624_v0 = vld [vmem:[#allocation8 + $0x8] sm:$0xff] }
  0xec   : > { %v418_v28 = vpack.c.bf16 %v417_v27, %v416_v26  ;;  %s555_s26 = scalar_lea.vmem [#allocation2], %s1835_s25  ;;  %s1658_s29 = smov 32  }
  0xed   : > { %1498 = vmatmul.mubr.msk.bf16.vlgmr.msra.gmra.mxu1 %vm396_vm2, %v560_v19  ;;  %s1659_s30 = smov 112   ;;  %s1660_s9 = smov 48  }
  0xee   : > { %1492 = vmatmul.mubr.msk.bf16.vlgmr.msra.gmra.mxu0 %vm396_vm2, %v418_v28  ;;  %v414_v30 = vld [vmem:[%s413_s21] sm:$0xff]  ;;  %v415_v36 = vld [vmem:[%s413_s21 + $0x8] sm:$0xff]  ;;  %s551_s10 = scalar_lea.vmem [#allocation3], %s1355_s20  ;;  %s701_s11 = scalar_lea.vmem [#allocation4], %s1835_s25 }
  0xef   : > { %v556_v45 = vld [vmem:[%s555_s26] sm:$0xff]  ;;  %v557_v49 = vld [vmem:[%s555_s26 + $0x8] sm:$0xff]  ;;  %s410_s2 = sadd.s32 1, %s1649_s2  }
  0xf0   : > { %p407_p0 = scmp.ge.s32.totalorder %s410_s2, 16  }
 0x1ad   : > { %v606_v29 = vpop.f32.mrf.mxu1 }
 0x1ae   : > { %615 = vrot.lane.b32.xlu0 %v606_v29, %s1654_s22  ;;  %v464_v32 = vpop.f32.mrf.mxu0 }
 0x1af   : > { %v1499_v31 = vpop.f32.mrf.mxu1  ;;  %v471_v33 = vadd.f32 %v464_v32, %v414_v30 }
 0x1b0   : > { %v1493_v35 = vpop.f32.mrf.mxu0 }
 0x1b1   : > { %v609_v34 = vpop.f32.mrf.mxu1  ;;  %1609 = vtanh.f32 %v471_v33  ;;  %v1358_v43 = vmul.f32 -1.442695, %v471_v33 }
 0x1b2   : > { %617 = vrot.lane.b32.xlu0 %v609_v34, %s1654_s22  ;;  %v467_v38 = vpop.f32.mrf.mxu0 }
 0x1b3   : > { %v1500_v37 = vpop.f32.mrf.mxu1  ;;  %v472_v39 = vadd.f32 %v467_v38, %v415_v36 }
 0x1b4   : > { %v1494_v40 = vpop.f32.mrf.mxu0 }
 0x1b5   : > { %1611 = vtanh.f32 %v472_v39  ;;  %v1359_v44 = vmul.f32 -1.442695, %v472_v39 }
 0x1b6   : > { %1613 = vpow2.f32 %v1358_v43 }
 0x1b7   : > { %1615 = vpow2.f32 %v1359_v44 }
 0x1be   : > { %v1610_v41 = vpop.eup %1609 }
 0x1bf   : > { %501 = vrot.lane.b32.xlu1 %v1610_v41, %s1655_s23 }
 0x1c2   : > { %v1612_v42 = vpop.eup %1611 }
 0x1c3   : > { %503 = vrot.lane.b32.xlu1 %v1612_v42, %s1655_s23  ;;  %v1614_v48 = vpop.eup %1613 }
 0x1c4   : > { %v481_v51 = vadd.f32 1.0, %v1614_v48  ;;  %v1616_v53 = vpop.eup %1615 }
 0x1c5   : > { %v482_v54 = vadd.f32 1.0, %v1616_v53 }
 0x220   : > { %v616_v46 = vpop.permute.xlu0 %615 }
 0x221   : > { %v621_v47 = vadd.f32 %v616_v46, %v556_v45 }
 0x223   : > { %1617 = vtanh.f32 %v621_v47  ;;  %v1363_v3 = vmul.f32 -1.442695, %v621_v47 }
 0x224   : > { %v618_v50 = vpop.permute.xlu0 %617 }
 0x225   : > { %v622_v52 = vadd.f32 %v618_v50, %v557_v49 }
 0x227   : > { %1619 = vtanh.f32 %v622_v52  ;;  %v1364_v4 = vmul.f32 -1.442695, %v622_v52  ;;  %v1642_v52 = vld [vmem:[%s2079_s5] sm:$0xff] (%p407_p0)  }
 0x228   : > { %1621 = vrcp.f32 %v481_v51  ;;  %v1641_v51 = vld [vmem:[%s2080_s6] sm:$0xff] (%p407_p0)   ;;  %1535 = vmatprep.subr.bf16.mxu1 (%p407_p0), %v1642_v52 }
 0x229   : > { %1623 = vrcp.f32 %v482_v54  ;;  %1501 = vmatprep.subr.bf16.mxu0 (%p407_p0), %v1641_v51  ;;  %1536 = vmatpush3.bf16.msra.mxu1 (%p407_p0), %v1642_v52 }
 0x22a   : > { %1625 = vpow2.f32 %v1363_v3  ;;  %1502 = vmatpush3.bf16.msra.mxu0 (%p407_p0), %v1641_v51 }
 0x22b   : > { %1627 = vpow2.f32 %v1364_v4 }
 0x230   : > { %v1618_v55 = vpop.eup %1617 }
 0x231   : > { %651 = vrot.lane.b32.xlu0 %v1618_v55, %s1655_s23  ;;  %v502_v58 = vpop.permute.xlu1 %501 }
 0x234   : > { %v1620_v57 = vpop.eup %1619 }
 0x235   : > { %653 = vrot.lane.b32.xlu1 %v1620_v57, %s1655_s23  ;;  %491 = vrot.lane.b32.xlu0 %v473_v56, %s1656_s27  ;;  %v1839_v59 = vpop.eup %1621  ;;  %v504_v1 = vpop.permute.xlu1 %503 }
 0x236   : > { %v507_v62 = vmul.f32 %v1839_v59, %v502_v58  ;;  %v1624_v63 = vpop.eup %1623 }
 0x237   : > { %v508_v2 = vmul.f32 %v1624_v63, %v504_v1  ;;  %v1626_v5 = vpop.eup %1625 }
 0x238   : > { %v631_v6 = vadd.f32 1.0, %v1626_v5  ;;  %v1628_v7 = vpop.eup %1627 }
 0x239   : > { %493 = vrot.lane.b32.xlu1 %v474_v60, %s1656_s27  ;;  %641 = vrot.lane.b32.xlu0 %v623_v61, %s1657_s28  ;;  %v632_v8 = vadd.f32 1.0, %v1628_v7 }
 0x23a   : > { %1629 = vrcp.f32 %v631_v6 }
 0x23b   : > { %1631 = vrcp.f32 %v632_v8 }
 0x23d   : > { %643 = vrot.lane.b32.xlu1 %v624_v0, %s1657_s28  ;;  %511 = vrot.lane.b32.xlu0 %v507_v62, %s1656_s27 }
 0x241   : > { %513 = vrot.lane.b32.xlu1 %v508_v2, %s1656_s27 }
 0x247   : > { %v1630_v9 = vpop.eup %1629 }
 0x248   : > { %v1632_v12 = vpop.eup %1631 }
 0x2a3   : > { %v652_v10 = vpop.permute.xlu0 %651 }
 0x2a4   : > { %v657_v11 = vmul.f32 %v1630_v9, %v652_v10 }
 0x2a6   : > { %661 = vrot.lane.b32.xlu0 %v657_v11, %s1656_s27 }
 0x2a7   : > { %v654_v13 = vpop.permute.xlu1 %653  ;;  %v492_v14 = vpop.permute.xlu0 %491 }
 0x2a8   : > { %v658_v15 = vmul.f32 %v1632_v12, %v654_v13  ;;  %v497_v18 = vmul.f32 %v1839_v59, %v492_v14 }
 0x2aa   : > { %663 = vrot.lane.b32.xlu1 %v658_v15, %s1656_s27 }
 0x2ab   : > { %v494_v16 = vpop.permute.xlu1 %493  ;;  %v642_v17 = vpop.permute.xlu0 %641 }
 0x2ac   : > { %v498_v23 = vmul.f32 %v1624_v63, %v494_v16  ;;  %v647_v27 = vmul.f32 %v1630_v9, %v642_v17 }
 0x2af   : > { %v644_v20 = vpop.permute.xlu1 %643  ;;  %v512_v21 = vpop.permute.xlu0 %511 }
 0x2b0   : > { %v517_v22 = vadd.f32 %v512_v21, %v497_v18  ;;  %v648_v30 = vmul.f32 %v1632_v12, %v644_v20 }
 0x2b2   : > { %1633 = vtanh.f32 %v517_v22 }
 0x2b3   : > { %v514_v24 = vpop.permute.xlu1 %513 }
 0x2b4   : > { %v518_v19 = vadd.f32 %v514_v24, %v498_v23 }
 0x2b6   : > { %1635 = vtanh.f32 %v518_v19 }
 0x2bf   : > { %v1634_v25 = vpop.eup %1633 }
 0x2c0   : > { %523 = vrot.lane.b32.xlu0 %v1634_v25, %s1658_s29 }
 0x2c3   : > { %v1636_v26 = vpop.eup %1635 }
 0x2c4   : > { %525 = vrot.lane.b32.xlu1 %v1636_v26, %s1658_s29 }
 0x318   : > { %v662_v28 = vpop.permute.xlu0 %661 }
 0x319   : > { %v667_v29 = vadd.f32 %v662_v28, %v647_v27 }
 0x31b   : > { %1637 = vtanh.f32 %v667_v29 }
 0x31c   : > { %v664_v31 = vpop.permute.xlu1 %663 }
 0x31d   : > { %v668_v32 = vadd.f32 %v664_v31, %v648_v30 }
 0x31f   : > { %1639 = vtanh.f32 %v668_v32 }
 0x328   : > { %v1638_v33 = vpop.eup %1637 }
 0x329   : > { %673 = vrot.lane.b32.xlu0 %v1638_v33, %s1658_s29 }
 0x32c   : > { %v1640_v34 = vpop.eup %1639 }
 0x32d   : > { %675 = vrot.lane.b32.xlu1 %v1640_v34, %s1658_s29 }
 0x331   : > { %545 = vrot.lane.b32.xlu1 %v518_v19, %s1659_s30 }
 0x332   : > { %v524_v35 = vpop.permute.xlu0 %523 }
 0x333   : > { %v529_v36 = vmul.f32 %v1839_v59, %v524_v35 }
 0x335   : > { %533 = vrot.lane.b32.xlu0 %v529_v36, %s1657_s28 }
 0x336   : > { %v526_v37 = vpop.permute.xlu1 %525 }
 0x337   : > { %v530_v38 = vmul.f32 %v1624_v63, %v526_v37 }
 0x339   : > { %535 = vrot.lane.b32.xlu1 %v530_v38, %s1657_s28  ;;  %543 = vrot.lane.b32.xlu0 %v517_v22, %s1659_s30 }
 0x39b   : > { %v674_v39 = vpop.permute.xlu0 %673 }
 0x39c   : > { %v679_v40 = vmul.f32 %v1630_v9, %v674_v39 }
 0x39e   : > { %683 = vrot.lane.b32.xlu0 %v679_v40, %s1656_s27 }
 0x39f   : > { %v676_v41 = vpop.permute.xlu1 %675 }
 0x3a0   : > { %v680_v42 = vmul.f32 %v1632_v12, %v676_v41 }
 0x3a2   : > { %685 = vrot.lane.b32.xlu1 %v680_v42, %s1656_s27  ;;  %693 = vrot.lane.b32.xlu0 %v667_v29, %s1660_s9 }
 0x3a3   : > { %v546_v43 = vpop.permute.xlu1 %545 }
 0x3a4   : > { %550 = vst.msk [vmem:[#allocation6 + $0x8] sm:$0xff] %vm396_vm2, %v546_v43 }
 0x3a6   : > { %695 = vrot.lane.b32.xlu1 %v668_v32, %s1660_s9 }
 0x3a7   : > { %v534_v44 = vpop.permute.xlu0 %533 }
 0x3a8   : > { %539 = vst.msk [vmem:[#allocation5] sm:$0xff] %vm396_vm2, %v534_v44  ;;  %552 = vst.msk [vmem:[%s551_s10] sm:$0xff] %vm396_vm2, %v534_v44 }
 0x3ab   : > { %v536_v45 = vpop.permute.xlu1 %535  ;;  %v544_v46 = vpop.permute.xlu0 %543 }
 0x3ac   : > { %540 = vst.msk [vmem:[#allocation5 + $0x8] sm:$0xff] %vm396_vm2, %v536_v45  ;;  %553 = vst.msk [vmem:[%s551_s10 + $0x8] sm:$0xff] %vm396_vm2, %v536_v45 }
 0x3ad   : > { %549 = vst.msk [vmem:[#allocation6] sm:$0xff] %vm396_vm2, %v544_v46 }
 0x3b3   :  { %v704_v55 = vld [vmem:[#allocation3] sm:$0xff] (%p407_p0)  ;;  %v705_v57 = vld [vmem:[#allocation3 + $0x8] sm:$0xff] (%p407_p0)  ;;  %v706_v62 = vld [vmem:[#allocation3 + $0x10] sm:$0xff] (%p407_p0) }
 0x3b4   :  { %v736_v60 = vpack.c.bf16 (%p407_p0), %v705_v57, %v704_v55  ;;  %v707_v63 = vld [vmem:[#allocation3 + $0x18] sm:$0xff] (%p407_p0)  ;;  %v708_v3 = vld [vmem:[#allocation3 + $0x20] sm:$0xff] (%p407_p0)  ;;  %v709_v4 = vld [vmem:[#allocation3 + $0x28] sm:$0xff] (%p407_p0) }
 0x3b5   :  { %v737_v1 = vpack.c.bf16 (%p407_p0), %v707_v63, %v706_v62  ;;  %v738_v6 = vpack.c.bf16 (%p407_p0), %v709_v4, %v708_v3  ;;  %v710_v9 = vld [vmem:[#allocation3 + $0x30] sm:$0xff] (%p407_p0)  ;;  %v711_v10 = vld [vmem:[#allocation3 + $0x38] sm:$0xff] (%p407_p0)  ;;  %v712_v13 = vld [vmem:[#allocation3 + $0x40] sm:$0xff] (%p407_p0) }
 0x3b6   :  { %1537 = vmatprep.mubr.msk.bf16.mxu1 (%p407_p0), %vm396_vm2, %v736_v60  ;;  %v713_v14 = vld [vmem:[#allocation3 + $0x48] sm:$0xff] (%p407_p0)  ;;  %v739_v16 = vpack.c.bf16 (%p407_p0), %v711_v10, %v710_v9  ;;  %v714_v22 = vld [vmem:[#allocation3 + $0x50] sm:$0xff] (%p407_p0)  ;;  %v715_v23 = vld [vmem:[#allocation3 + $0x58] sm:$0xff] (%p407_p0) }
 0x3b7   :  { %1538 = vmatmul.mubr.msk.bf16.vlgmr.msra.gmra.mxu1 (%p407_p0), %vm396_vm2, %v737_v1  ;;  %v740_v18 = vpack.c.bf16 (%p407_p0), %v713_v14, %v712_v13  ;;  %v716_v25 = vld [vmem:[#allocation3 + $0x60] sm:$0xff] (%p407_p0)  ;;  %v717_v26 = vld [vmem:[#allocation3 + $0x68] sm:$0xff] (%p407_p0)  ;;  %v741_v28 = vpack.c.bf16 (%p407_p0), %v715_v23, %v714_v22  ;;  %v718_v33 = vld [vmem:[#allocation3 + $0x70] sm:$0xff] (%p407_p0) }
 0x3b8   :  { %1541 = vmatprep.mubr.msk.bf16.mxu1 (%p407_p0), %vm396_vm2, %v738_v6  ;;  %v742_v30 = vpack.c.bf16 (%p407_p0), %v717_v26, %v716_v25  ;;  %v719_v34 = vld [vmem:[#allocation3 + $0x78] sm:$0xff] (%p407_p0)  ;;  %v720_v37 = vld [vmem:[#allocation3 + $0x80] sm:$0xff] (%p407_p0)  ;;  %v721_v38 = vld [vmem:[#allocation3 + $0x88] sm:$0xff] (%p407_p0) }
 0x3b9   :  { %v743_v40 = vpack.c.bf16 (%p407_p0), %v719_v34, %v718_v33  ;;  %v744_v42 = vpack.c.bf16 (%p407_p0), %v721_v38, %v720_v37  ;;  %v722_v45 = vld [vmem:[#allocation3 + $0x90] sm:$0xff] (%p407_p0)  ;;  %v723_v46 = vld [vmem:[#allocation3 + $0x98] sm:$0xff] (%p407_p0)  ;;  %v729_v62 = vld [vmem:[#allocation3 + $0xc8] sm:$0xff] (%p407_p0) }
 0x3ba   :  { %v745_v52 = vpack.c.bf16 (%p407_p0), %v723_v46, %v722_v45  ;;  %v726_v57 = vld [vmem:[#allocation3 + $0xb0] sm:$0xff] (%p407_p0)  ;;  %v731_v6 = vld [vmem:[#allocation3 + $0xd8] sm:$0xff] (%p407_p0)  ;;  %v732_v9 = vld [vmem:[#allocation3 + $0xe0] sm:$0xff] (%p407_p0) }
 0x3bb   :  { %v733_v10 = vld [vmem:[#allocation3 + $0xe8] sm:$0xff] (%p407_p0) }
 0x3bc   :  { %v750_v14 = vpack.c.bf16 (%p407_p0), %v733_v10, %v732_v9 }
 0x3bf   :  { %1542 = vmatmul.mubr.msk.bf16.gmra.mxu1 (%p407_p0), %vm396_vm2, %v739_v16 }
 0x3c0   :  { %1545 = vmatprep.mubr.msk.bf16.mxu1 (%p407_p0), %vm396_vm2, %v740_v18  ;;  %v735_v18 = vld [vmem:[#allocation3 + $0xf8] sm:$0xff] (%p407_p0) }
 0x3c7   :  { %1546 = vmatmul.mubr.msk.bf16.gmra.mxu1 (%p407_p0), %vm396_vm2, %v741_v28 }
 0x3c8   :  { %1549 = vmatprep.mubr.msk.bf16.mxu1 (%p407_p0), %vm396_vm2, %v742_v30 }
 0x3cf   :  { %1550 = vmatmul.mubr.msk.bf16.gmra.mxu1 (%p407_p0), %vm396_vm2, %v743_v40 }
 0x3d0   :  { %1553 = vmatprep.mubr.msk.bf16.mxu1 (%p407_p0), %vm396_vm2, %v744_v42 }
 0x3d7   :  { %1554 = vmatmul.mubr.msk.bf16.gmra.mxu1 (%p407_p0), %vm396_vm2, %v745_v52 }
 0x410   : > { %v684_v47 = vpop.permute.xlu0 %683 }
 0x411   : > { %689 = vst.msk [vmem:[#allocation7] sm:$0xff] %vm396_vm2, %v684_v47  ;;  %702 = vst.msk [vmem:[%s701_s11] sm:$0xff] %vm396_vm2, %v684_v47 }
 0x414   : > { %v686_v48 = vpop.permute.xlu1 %685  ;;  %v694_v49 = vpop.permute.xlu0 %693 }
 0x415   : > { %690 = vst.msk [vmem:[#allocation7 + $0x8] sm:$0xff] %vm396_vm2, %v686_v48  ;;  %703 = vst.msk [vmem:[%s701_s11 + $0x8] sm:$0xff] %vm396_vm2, %v686_v48 }
 0x416   : > { %699 = vst.msk [vmem:[#allocation8] sm:$0xff] %vm396_vm2, %v694_v49  ;;  %v724_v49 = vld [vmem:[#allocation3 + $0xa0] sm:$0xff] (%p407_p0) }
 0x418   : > { %v696_v50 = vpop.permute.xlu1 %695 }
 0x419   : > { %700 = vst.msk [vmem:[#allocation8 + $0x8] sm:$0xff] %vm396_vm2, %v696_v50  ;;  %v725_v50 = vld [vmem:[#allocation3 + $0xa8] sm:$0xff] (%p407_p0) }
 0x41a   :  { %409 = sbr.rel (!%p407_p0) target bundleno = 232 (0xe8), region = 63 }
 0x41c   :  { %v752_v53 = vld [vmem:[#allocation4] sm:$0xff] (%p407_p0)  ;;  %v753_v54 = vld [vmem:[#allocation4 + $0x8] sm:$0xff] (%p407_p0)  ;;  %v754_v58 = vld [vmem:[#allocation4 + $0x10] sm:$0xff] (%p407_p0) }
 0x41d   :  { %v784_v56 = vpack.c.bf16 (%p407_p0), %v753_v54, %v752_v53  ;;  %v755_v59 = vld [vmem:[#allocation4 + $0x18] sm:$0xff] (%p407_p0)  ;;  %v756_v0 = vld [vmem:[#allocation4 + $0x20] sm:$0xff] (%p407_p0)  ;;  %v757_v2 = vld [vmem:[#allocation4 + $0x28] sm:$0xff] (%p407_p0)  ;;  %v746_v54 = vpack.c.bf16 (%p407_p0), %v725_v50, %v724_v49 }
 0x41e   :  { %v785_v61 = vpack.c.bf16 (%p407_p0), %v755_v59, %v754_v58  ;;  %v786_v5 = vpack.c.bf16 (%p407_p0), %v757_v2, %v756_v0  ;;  %v758_v7 = vld [vmem:[#allocation4 + $0x30] sm:$0xff] (%p407_p0)  ;;  %v759_v8 = vld [vmem:[#allocation4 + $0x38] sm:$0xff] (%p407_p0)  ;;  %v760_v11 = vld [vmem:[#allocation4 + $0x40] sm:$0xff] (%p407_p0) }
 0x41f   :  { %1503 = vmatprep.mubr.msk.bf16.mxu0 %vm396_vm2, %v784_v56  ;;  %v761_v12 = vld [vmem:[#allocation4 + $0x48] sm:$0xff]  ;;  %v787_v15 = vpack.c.bf16 %v759_v8, %v758_v7  ;;  %v762_v20 = vld [vmem:[#allocation4 + $0x50] sm:$0xff]  ;;  %v763_v21 = vld [vmem:[#allocation4 + $0x58] sm:$0xff]  ;;  %1557 = vmatprep.mubr.msk.bf16.mxu1 %vm396_vm2, %v746_v54 }
 0x420   :  { %1504 = vmatmul.mubr.msk.bf16.vlgmr.msra.gmra.mxu0 %vm396_vm2, %v785_v61  ;;  %v788_v17 = vpack.c.bf16 %v761_v12, %v760_v11  ;;  %v764_v24 = vld [vmem:[#allocation4 + $0x60] sm:$0xff]  ;;  %v765_v19 = vld [vmem:[#allocation4 + $0x68] sm:$0xff]  ;;  %v789_v27 = vpack.c.bf16 %v763_v21, %v762_v20  ;;  %v766_v31 = vld [vmem:[#allocation4 + $0x70] sm:$0xff] }
 0x421   :  { %1507 = vmatprep.mubr.msk.bf16.mxu0 %vm396_vm2, %v786_v5  ;;  %v790_v29 = vpack.c.bf16 %v765_v19, %v764_v24  ;;  %v767_v32 = vld [vmem:[#allocation4 + $0x78] sm:$0xff]  ;;  %v768_v35 = vld [vmem:[#allocation4 + $0x80] sm:$0xff]  ;;  %v769_v36 = vld [vmem:[#allocation4 + $0x88] sm:$0xff] }
 0x422   :  { %v791_v39 = vpack.c.bf16 %v767_v32, %v766_v31  ;;  %v792_v41 = vpack.c.bf16 %v769_v36, %v768_v35  ;;  %v770_v43 = vld [vmem:[#allocation4 + $0x90] sm:$0xff]  ;;  %v771_v44 = vld [vmem:[#allocation4 + $0x98] sm:$0xff]  ;;  %v772_v47 = vld [vmem:[#allocation4 + $0xa0] sm:$0xff] }
 0x423   :  { %v773_v48 = vld [vmem:[#allocation4 + $0xa8] sm:$0xff]  ;;  %v793_v51 = vpack.c.bf16 %v771_v44, %v770_v43  ;;  %v774_v55 = vld [vmem:[#allocation4 + $0xb0] sm:$0xff]  ;;  %v775_v56 = vld [vmem:[#allocation4 + $0xb8] sm:$0xff] }
 0x424   :  { %v794_v53 = vpack.c.bf16 %v773_v48, %v772_v47  ;;  %v727_v58 = vld [vmem:[#allocation3 + $0xb8] sm:$0xff]  ;;  %v776_v59 = vld [vmem:[#allocation4 + $0xc0] sm:$0xff]  ;;  %v777_v60 = vld [vmem:[#allocation4 + $0xc8] sm:$0xff]  ;;  %v795_v63 = vpack.c.bf16 %v775_v56, %v774_v55 }
 0x425   :  { %v728_v61 = vld [vmem:[#allocation3 + $0xc0] sm:$0xff]  ;;  %v747_v0 = vpack.c.bf16 %v727_v58, %v726_v57  ;;  %v796_v1 = vpack.c.bf16 %v777_v60, %v776_v59  ;;  %v778_v3 = vld [vmem:[#allocation4 + $0xd0] sm:$0xff]  ;;  %v779_v4 = vld [vmem:[#allocation4 + $0xd8] sm:$0xff] }
 0x426   :  { %v748_v2 = vpack.c.bf16 %v729_v62, %v728_v61  ;;  %v730_v5 = vld [vmem:[#allocation3 + $0xd0] sm:$0xff]  ;;  %v780_v7 = vld [vmem:[#allocation4 + $0xe0] sm:$0xff]  ;;  %v781_v8 = vld [vmem:[#allocation4 + $0xe8] sm:$0xff]  ;;  %v797_v11 = vpack.c.bf16 %v779_v4, %v778_v3 }
 0x427   :  { %1558 = vmatmul.mubr.msk.bf16.gmra.mxu1 %vm396_vm2, %v747_v0  ;;  %v749_v12 = vpack.c.bf16 %v731_v6, %v730_v5  ;;  %v798_v13 = vpack.c.bf16 %v781_v8, %v780_v7  ;;  %v783_v16 = vld [vmem:[#allocation4 + $0xf8] sm:$0xff]  ;;  %v1914_v24 = vld [vmem:[%s2081_s7] ss:$0 sm:$0xff] }
 0x428   :  { %1508 = vmatmul.mubr.msk.bf16.gmra.mxu0 %vm396_vm2, %v787_v15  ;;  %1561 = vmatprep.mubr.msk.bf16.mxu1 %vm396_vm2, %v748_v2  ;;  %v782_v15 = vld [vmem:[#allocation4 + $0xf0] sm:$0xff] }
 0x429   :  { %1511 = vmatprep.mubr.msk.bf16.mxu0 %vm396_vm2, %v788_v17  ;;  %v734_v17 = vld [vmem:[#allocation3 + $0xf0] sm:$0xff]  ;;  %v799_v20 = vpack.c.bf16 %v783_v16, %v782_v15 }
 0x42a   :  { %v751_v21 = vpack.c.bf16 %v735_v18, %v734_v17 }
 0x42f   :  { %1562 = vmatmul.mubr.msk.bf16.gmra.mxu1 %vm396_vm2, %v749_v12 }
 0x430   :  { %1512 = vmatmul.mubr.msk.bf16.gmra.mxu0 %vm396_vm2, %v789_v27  ;;  %1565 = vmatprep.mubr.msk.bf16.mxu1 %vm396_vm2, %v750_v14 }
 0x431   :  { %1515 = vmatprep.mubr.msk.bf16.mxu0 %vm396_vm2, %v790_v29 }
 0x437   :  { %1566 = vmatmul.mubr.msk.bf16.gmra.mxu1 %vm396_vm2, %v751_v21 }
 0x438   :  { %1516 = vmatmul.mubr.msk.bf16.gmra.mxu0 %vm396_vm2, %v791_v39 }
 0x439   :  { %1519 = vmatprep.mubr.msk.bf16.mxu0 %vm396_vm2, %v792_v41 }
 0x440   :  { %1520 = vmatmul.mubr.msk.bf16.gmra.mxu0 %vm396_vm2, %v793_v51 }
 0x441   :  { %1523 = vmatprep.mubr.msk.bf16.mxu0 %vm396_vm2, %v794_v53 }
 0x448   :  { %1524 = vmatmul.mubr.msk.bf16.gmra.mxu0 %vm396_vm2, %v795_v63 }
 0x449   :  { %1527 = vmatprep.mubr.msk.bf16.mxu0 %vm396_vm2, %v796_v1 }
 0x450   :  { %1528 = vmatmul.mubr.msk.bf16.gmra.mxu0 %vm396_vm2, %v797_v11 }
 0x451   :  { %1531 = vmatprep.mubr.msk.bf16.mxu0 %vm396_vm2, %v798_v13 }
 0x458   :  { %1532 = vmatmul.mubr.msk.bf16.gmra.mxu0 %vm396_vm2, %v799_v20 }
 0x477   :  { %v1539_v23 = vpop.f32.mrf.mxu1 }
 0x479   :  { %v1107_v26 = vpop.f32.mrf.mxu1 }
 0x47b   :  { %v1540_v30 = vpop.f32.mrf.mxu1 }
 0x47d   :  { %v1110_v34 = vpop.f32.mrf.mxu1 }
 0x47f   :  { %v1543_v38 = vpop.f32.mrf.mxu1 }
 0x481   :  { %v1123_v42 = vpop.f32.mrf.mxu1 }
 0x483   :  { %v1544_v46 = vpop.f32.mrf.mxu1 }
 0x485   :  { %v1126_v50 = vpop.f32.mrf.mxu1 }
 0x487   :  { %v1547_v54 = vpop.f32.mrf.mxu1 }
 0x489   :  { %v1139_v58 = vpop.f32.mrf.mxu1 }
 0x48b   :  { %v1548_v62 = vpop.f32.mrf.mxu1 }
 0x48d   :  { %v1142_v2 = vpop.f32.mrf.mxu1 }
 0x48f   :  { %v1551_v6 = vpop.f32.mrf.mxu1 }
 0x491   :  { %v1155_v10 = vpop.f32.mrf.mxu1 }
 0x493   :  { %v1552_v14 = vpop.f32.mrf.mxu1 }
 0x495   :  { %v1158_v18 = vpop.f32.mrf.mxu1 }
 0x4e0   :  { %v1505_v22 = vpop.f32.mrf.mxu0 }
 0x4e1   :  { %v1116_v19 = vadd.f32 %v1539_v23, %v1505_v22  ;;  %v1555_v23 = vpop.f32.mrf.mxu1 }
 0x4e2   :  { %v892_v25 = vpop.f32.mrf.mxu0 }
 0x4e3   :  { %v1243_v27 = vadd.f32 %v1914_v24, %v1116_v19  ;;  %v1108_v28 = vadd.f32 %v1107_v26, %v892_v25 }
 0x4e4   :  { %v1506_v29 = vpop.f32.mrf.mxu0 }
 0x4e5   :  { %1275 = vst.msk [vmem:[%s2082_s8 + $0x10] sm:$0xff] %vm150_vm1, %v1243_v27  ;;  %v1241_v31 = vadd.f32 %v1914_v24, %v1108_v28  ;;  %v1119_v32 = vadd.f32 %v1540_v30, %v1506_v29  ;;  %v1171_v27 = vpop.f32.mrf.mxu1 }
 0x4e6   :  { %v895_v33 = vpop.f32.mrf.mxu0 }
 0x4e7   :  { %1273 = vst.msk [vmem:[%s2082_s8] sm:$0xff] %vm150_vm1, %v1241_v31  ;;  %v1244_v35 = vadd.f32 %v1914_v24, %v1119_v32  ;;  %v1111_v36 = vadd.f32 %v1110_v34, %v895_v33  ;;  %v1556_v31 = vpop.f32.mrf.mxu1 }
 0x4e8   :  { %v1509_v37 = vpop.f32.mrf.mxu0 }
 0x4e9   :  { %1276 = vst.msk [vmem:[%s2082_s8 + $0x18] sm:$0xff] %vm150_vm1, %v1244_v35  ;;  %v1242_v39 = vadd.f32 %v1914_v24, %v1111_v36  ;;  %v1132_v40 = vadd.f32 %v1543_v38, %v1509_v37  ;;  %v1174_v35 = vpop.f32.mrf.mxu1 }
 0x4ea   :  { %v908_v41 = vpop.f32.mrf.mxu0 }
 0x4eb   :  { %1274 = vst.msk [vmem:[%s2082_s8 + $0x8] sm:$0xff] %vm150_vm1, %v1242_v39  ;;  %v1247_v43 = vadd.f32 %v1914_v24, %v1132_v40  ;;  %v1124_v44 = vadd.f32 %v1123_v42, %v908_v41  ;;  %v1559_v39 = vpop.f32.mrf.mxu1 }
 0x4ec   :  { %v1510_v45 = vpop.f32.mrf.mxu0 }
 0x4ed   :  { %1279 = vst.msk [vmem:[%s2082_s8 + $0x30] sm:$0xff] %vm150_vm1, %v1247_v43  ;;  %v1245_v47 = vadd.f32 %v1914_v24, %v1124_v44  ;;  %v1135_v48 = vadd.f32 %v1544_v46, %v1510_v45  ;;  %v1187_v43 = vpop.f32.mrf.mxu1 }
 0x4ee   :  { %v911_v49 = vpop.f32.mrf.mxu0 }
 0x4ef   :  { %1277 = vst.msk [vmem:[%s2082_s8 + $0x20] sm:$0xff] %vm150_vm1, %v1245_v47  ;;  %v1248_v51 = vadd.f32 %v1914_v24, %v1135_v48  ;;  %v1127_v52 = vadd.f32 %v1126_v50, %v911_v49  ;;  %v1560_v47 = vpop.f32.mrf.mxu1 }
 0x4f0   :  { %v1513_v53 = vpop.f32.mrf.mxu0 }
 0x4f1   :  { %1280 = vst.msk [vmem:[%s2082_s8 + $0x38] sm:$0xff] %vm150_vm1, %v1248_v51  ;;  %v1246_v55 = vadd.f32 %v1914_v24, %v1127_v52  ;;  %v1148_v56 = vadd.f32 %v1547_v54, %v1513_v53  ;;  %v1190_v51 = vpop.f32.mrf.mxu1 }
 0x4f2   :  { %v924_v57 = vpop.f32.mrf.mxu0 }
 0x4f3   :  { %1278 = vst.msk [vmem:[%s2082_s8 + $0x28] sm:$0xff] %vm150_vm1, %v1246_v55  ;;  %v1251_v59 = vadd.f32 %v1914_v24, %v1148_v56  ;;  %v1140_v60 = vadd.f32 %v1139_v58, %v924_v57  ;;  %v1563_v55 = vpop.f32.mrf.mxu1 }
 0x4f4   :  { %v1514_v61 = vpop.f32.mrf.mxu0 }
 0x4f5   :  { %1283 = vst.msk [vmem:[%s2082_s8 + $0x50] sm:$0xff] %vm150_vm1, %v1251_v59  ;;  %v1249_v63 = vadd.f32 %v1914_v24, %v1140_v60  ;;  %v1151_v0 = vadd.f32 %v1548_v62, %v1514_v61  ;;  %v1203_v59 = vpop.f32.mrf.mxu1 }
 0x4f6   :  { %v927_v1 = vpop.f32.mrf.mxu0 }
 0x4f7   :  { %1281 = vst.msk [vmem:[%s2082_s8 + $0x40] sm:$0xff] %vm150_vm1, %v1249_v63  ;;  %v1252_v3 = vadd.f32 %v1914_v24, %v1151_v0  ;;  %v1143_v4 = vadd.f32 %v1142_v2, %v927_v1  ;;  %v1564_v63 = vpop.f32.mrf.mxu1 }
 0x4f8   :  { %v1517_v5 = vpop.f32.mrf.mxu0 }
 0x4f9   :  { %1284 = vst.msk [vmem:[%s2082_s8 + $0x58] sm:$0xff] %vm150_vm1, %v1252_v3  ;;  %v1250_v7 = vadd.f32 %v1914_v24, %v1143_v4  ;;  %v1164_v8 = vadd.f32 %v1551_v6, %v1517_v5  ;;  %v1206_v3 = vpop.f32.mrf.mxu1 }
 0x4fa   :  { %v940_v9 = vpop.f32.mrf.mxu0 }
 0x4fb   :  { %1282 = vst.msk [vmem:[%s2082_s8 + $0x48] sm:$0xff] %vm150_vm1, %v1250_v7  ;;  %v1255_v11 = vadd.f32 %v1914_v24, %v1164_v8  ;;  %v1156_v12 = vadd.f32 %v1155_v10, %v940_v9  ;;  %v1567_v7 = vpop.f32.mrf.mxu1 }
 0x4fc   :  { %v1518_v13 = vpop.f32.mrf.mxu0 }
 0x4fd   :  { %1287 = vst.msk [vmem:[%s2082_s8 + $0x70] sm:$0xff] %vm150_vm1, %v1255_v11  ;;  %v1253_v15 = vadd.f32 %v1914_v24, %v1156_v12  ;;  %v1167_v16 = vadd.f32 %v1552_v14, %v1518_v13  ;;  %v1219_v11 = vpop.f32.mrf.mxu1 }
 0x4fe   :  { %v943_v17 = vpop.f32.mrf.mxu0 }
 0x4ff   :  { %1285 = vst.msk [vmem:[%s2082_s8 + $0x60] sm:$0xff] %vm150_vm1, %v1253_v15  ;;  %v1256_v20 = vadd.f32 %v1914_v24, %v1167_v16  ;;  %v1159_v21 = vadd.f32 %v1158_v18, %v943_v17  ;;  %v1568_v15 = vpop.f32.mrf.mxu1 }
 0x500   :  { %v1521_v22 = vpop.f32.mrf.mxu0 }
 0x501   :  { %1288 = vst.msk [vmem:[%s2082_s8 + $0x78] sm:$0xff] %vm150_vm1, %v1256_v20  ;;  %v1254_v19 = vadd.f32 %v1914_v24, %v1159_v21  ;;  %v1180_v25 = vadd.f32 %v1555_v23, %v1521_v22  ;;  %v1222_v20 = vpop.f32.mrf.mxu1 }
 0x502   :  { %v956_v26 = vpop.f32.mrf.mxu0 }
 0x503   :  { %1286 = vst.msk [vmem:[%s2082_s8 + $0x68] sm:$0xff] %vm150_vm1, %v1254_v19  ;;  %v1259_v28 = vadd.f32 %v1914_v24, %v1180_v25  ;;  %v1172_v29 = vadd.f32 %v1171_v27, %v956_v26 }
 0x504   :  { %v1522_v30 = vpop.f32.mrf.mxu0 }
 0x505   :  { %1291 = vst.msk [vmem:[%s2082_s8 + $0x90] sm:$0xff] %vm150_vm1, %v1259_v28  ;;  %v1257_v32 = vadd.f32 %v1914_v24, %v1172_v29  ;;  %v1183_v33 = vadd.f32 %v1556_v31, %v1522_v30 }
 0x506   :  { %v959_v34 = vpop.f32.mrf.mxu0 }
 0x507   :  { %1289 = vst.msk [vmem:[%s2082_s8 + $0x80] sm:$0xff] %vm150_vm1, %v1257_v32  ;;  %v1260_v36 = vadd.f32 %v1914_v24, %v1183_v33  ;;  %v1175_v37 = vadd.f32 %v1174_v35, %v959_v34 }
 0x508   :  { %v1525_v38 = vpop.f32.mrf.mxu0 }
 0x509   :  { %1292 = vst.msk [vmem:[%s2082_s8 + $0x98] sm:$0xff] %vm150_vm1, %v1260_v36  ;;  %v1258_v40 = vadd.f32 %v1914_v24, %v1175_v37  ;;  %v1196_v41 = vadd.f32 %v1559_v39, %v1525_v38 }
 0x50a   :  { %v972_v42 = vpop.f32.mrf.mxu0 }
 0x50b   :  { %1290 = vst.msk [vmem:[%s2082_s8 + $0x88] sm:$0xff] %vm150_vm1, %v1258_v40  ;;  %v1263_v44 = vadd.f32 %v1914_v24, %v1196_v41  ;;  %v1188_v45 = vadd.f32 %v1187_v43, %v972_v42 }
 0x50c   :  { %v1526_v46 = vpop.f32.mrf.mxu0 }
 0x50d   :  { %1295 = vst.msk [vmem:[%s2082_s8 + $0xb0] sm:$0xff] %vm150_vm1, %v1263_v44  ;;  %v1261_v48 = vadd.f32 %v1914_v24, %v1188_v45  ;;  %v1199_v49 = vadd.f32 %v1560_v47, %v1526_v46 }
 0x50e   :  { %v975_v50 = vpop.f32.mrf.mxu0 }
 0x50f   :  { %1293 = vst.msk [vmem:[%s2082_s8 + $0xa0] sm:$0xff] %vm150_vm1, %v1261_v48  ;;  %v1264_v52 = vadd.f32 %v1914_v24, %v1199_v49  ;;  %v1191_v53 = vadd.f32 %v1190_v51, %v975_v50 }
 0x510   :  { %v1529_v54 = vpop.f32.mrf.mxu0 }
 0x511   :  { %1296 = vst.msk [vmem:[%s2082_s8 + $0xb8] sm:$0xff] %vm150_vm1, %v1264_v52  ;;  %v1262_v56 = vadd.f32 %v1914_v24, %v1191_v53  ;;  %v1212_v57 = vadd.f32 %v1563_v55, %v1529_v54 }
 0x512   :  { %v988_v58 = vpop.f32.mrf.mxu0 }
 0x513   :  { %1294 = vst.msk [vmem:[%s2082_s8 + $0xa8] sm:$0xff] %vm150_vm1, %v1262_v56  ;;  %v1267_v60 = vadd.f32 %v1914_v24, %v1212_v57  ;;  %v1204_v61 = vadd.f32 %v1203_v59, %v988_v58 }
 0x514   :  { %v1530_v62 = vpop.f32.mrf.mxu0 }
 0x515   :  { %1299 = vst.msk [vmem:[%s2082_s8 + $0xd0] sm:$0xff] %vm150_vm1, %v1267_v60  ;;  %v1265_v0 = vadd.f32 %v1914_v24, %v1204_v61  ;;  %v1215_v1 = vadd.f32 %v1564_v63, %v1530_v62 }
 0x516   :  { %v991_v2 = vpop.f32.mrf.mxu0 }
 0x517   :  { %1297 = vst.msk [vmem:[%s2082_s8 + $0xc0] sm:$0xff] %vm150_vm1, %v1265_v0  ;;  %v1268_v4 = vadd.f32 %v1914_v24, %v1215_v1  ;;  %v1207_v5 = vadd.f32 %v1206_v3, %v991_v2 }
 0x518   :  { %v1533_v6 = vpop.f32.mrf.mxu0 }
 0x519   :  { %1300 = vst.msk [vmem:[%s2082_s8 + $0xd8] sm:$0xff] %vm150_vm1, %v1268_v4  ;;  %v1266_v8 = vadd.f32 %v1914_v24, %v1207_v5  ;;  %v1228_v9 = vadd.f32 %v1567_v7, %v1533_v6 }
 0x51a   :  { %v1004_v10 = vpop.f32.mrf.mxu0 }
 0x51b   :  { %1298 = vst.msk [vmem:[%s2082_s8 + $0xc8] sm:$0xff] %vm150_vm1, %v1266_v8  ;;  %v1271_v12 = vadd.f32 %v1914_v24, %v1228_v9  ;;  %v1220_v13 = vadd.f32 %v1219_v11, %v1004_v10 }
 0x51c   :  { %v1534_v14 = vpop.f32.mrf.mxu0 }
 0x51d   :  { %1303 = vst.msk [vmem:[%s2082_s8 + $0xf0] sm:$0xff] %vm150_vm1, %v1271_v12  ;;  %v1269_v16 = vadd.f32 %v1914_v24, %v1220_v13  ;;  %v1231_v17 = vadd.f32 %v1568_v15, %v1534_v14 }
 0x51e   :  { %v1007_v18 = vpop.f32.mrf.mxu0 }
 0x51f   :  { %1301 = vst.msk [vmem:[%s2082_s8 + $0xe0] sm:$0xff] %vm150_vm1, %v1269_v16  ;;  %v1272_v21 = vadd.f32 %v1914_v24, %v1231_v17  ;;  %v1223_v22 = vadd.f32 %v1222_v20, %v1007_v18 }
 0x521   :  { %1304 = vst.msk [vmem:[%s2082_s8 + $0xf8] sm:$0xff] %vm150_vm1, %v1272_v21  ;;  %v1270_v23 = vadd.f32 %v1914_v24, %v1223_v22 }
 0x523   :  { %1302 = vst.msk [vmem:[%s2082_s8 + $0xe8] sm:$0xff] %vm150_vm1, %v1270_v23 }

// kernel: recurrent_block.6
= control target key start
LH: loop header
LB: loop body
LE: loop exit
PB: predicated region body
PF: predicated region fallthrough
CT: control target
= control target key end

     0   :  { %vm199_vm0 = vcmask 1043456   ;;  %vm150_vm1 = vcmask 64512   ;;  %vm396_vm2 = vcmask 130048   ;;  %v1901_v18 = vmov 0.0   ;;  %s2421_s1 = inlined_call_operand.vmem [shape: bf16[8,128], index: 1, kind: input, shape index: {}]   ;;  %s2422_s3 = inlined_call_operand.vmem [shape: bf16[16,64], index: 3, kind: input, shape index: {}]   ;;  %s2423_s4 = inlined_call_operand.vmem [shape: bf16[16,64], index: 4, kind: input, shape index: {}]   ;;  %s2424_s5 = inlined_call_operand.vmem [shape: bf16[16,8], index: 5, kind: input, shape index: {}]   ;;  %s2425_s6 = inlined_call_operand.vmem [shape: bf16[16,8], index: 6, kind: input, shape index: {}]   ;;  %s2426_s7 = inlined_call_operand.vmem [shape: f32[1,8], index: 7, kind: input, shape index: {}]   ;;  %s2427_s8 = inlined_call_operand.vmem [shape: f32[8,32,8], index: 8, kind: output, shape index: {}]   ;;  %s2428_s0 = inlined_call_operand.vmem [shape: bf16[8,32,8], index: 0, kind: input, shape index: {}]   ;;  %s2429_s2 = inlined_call_operand.vmem [shape: f32[1,128], index: 2, kind: input, shape index: {}]  }
   0x1   :  { %v62_v0 = vld [vmem:[%s2421_s1] sm:$0xf]  ;;  %v1811_v4 = vld [vmem:[%s2428_s0 + $0x8] sm:$0xff]   ;;  %v1813_v6 = vld [vmem:[%s2428_s0 + $0x10] sm:$0xff]   ;;  %397 = vst.msk [vmem:[#allocation5] sm:$0xff] %vm396_vm2, %v1901_v18 }
   0x2   :  { %1791 = vmatprep.subr.msk.bf16.mxu0 %vm199_vm0, %v62_v0  ;;  %1792 = vmatprep.subr.msk.bf16.mxu1 %vm199_vm0, %v62_v0  ;;  %v201_v1 = vsel %vm199_vm0, %v62_v0, 0  ;;  %v1809_v2 = vld [vmem:[%s2428_s0] sm:$0xff]   ;;  %v1812_v5 = vld [vmem:[%s2428_s0 + $0x48] sm:$0xff]   ;;  %v1814_v7 = vld [vmem:[%s2428_s0 + $0x50] sm:$0xff]   ;;  %398 = vst.msk [vmem:[#allocation5 + $0x8] sm:$0xff] %vm396_vm2, %v1901_v18 }
   0x3   :  { %1676 = vmatpush3.bf16.msra.mxu0 %v201_v1  ;;  %1790 = vmatpush3.bf16.msra.mxu1 %v201_v1  ;;  %v1810_v3 = vld [vmem:[%s2428_s0 + $0x40] sm:$0xff]   ;;  %v1815_v8 = vld [vmem:[%s2428_s0 + $0x18] sm:$0xff]   ;;  %v1819_v12 = vld [vmem:[%s2428_s0 + $0x28] sm:$0xff]   ;;  %399 = vst.msk [vmem:[#allocation5 + $0x10] sm:$0xff] %vm396_vm2, %v1901_v18 }
   0x4   :  { %1677 = vmatprep.mubr.msk.bf16.mxu0 %vm150_vm1, %v1809_v2  ;;  %1693 = vmatprep.mubr.msk.bf16.mxu1 %vm150_vm1, %v1810_v3  ;;  %v1816_v9 = vld [vmem:[%s2428_s0 + $0x58] sm:$0xff]   ;;  %v1817_v10 = vld [vmem:[%s2428_s0 + $0x20] sm:$0xff]   ;;  %v1820_v13 = vld [vmem:[%s2428_s0 + $0x68] sm:$0xff]   ;;  %400 = vst.msk [vmem:[#allocation5 + $0x18] sm:$0xff] %vm396_vm2, %v1901_v18 }
   0x5   :  { %v1818_v11 = vld [vmem:[%s2428_s0 + $0x60] sm:$0xff]   ;;  %v1821_v14 = vld [vmem:[%s2428_s0 + $0x30] sm:$0xff]   ;;  %v1823_v16 = vld [vmem:[%s2428_s0 + $0x38] sm:$0xff]   ;;  %401 = vst.msk [vmem:[#allocation6] sm:$0xff] %vm396_vm2, %v1901_v18 }
   0x6   :  { %1678 = vmatmul.mubr.msk.bf16.vlgmr.msra.gmra.mxu0 %vm150_vm1, %v1811_v4  ;;  %1694 = vmatmul.mubr.msk.bf16.vlgmr.msra.gmra.mxu1 %vm150_vm1, %v1812_v5  ;;  %v1822_v15 = vld [vmem:[%s2428_s0 + $0x70] sm:$0xff]   ;;  %v1824_v17 = vld [vmem:[%s2428_s0 + $0x78] sm:$0xff]   ;;  %402 = vst.msk [vmem:[#allocation6 + $0x8] sm:$0xff] %vm396_vm2, %v1901_v18  ;;  %403 = vst.msk [vmem:[#allocation6 + $0x10] sm:$0xff] %vm396_vm2, %v1901_v18 }
   0x7   :  { %1681 = vmatprep.mubr.msk.bf16.mxu0 %vm150_vm1, %v1813_v6  ;;  %1697 = vmatprep.mubr.msk.bf16.mxu1 %vm150_vm1, %v1814_v7  ;;  %404 = vst.msk [vmem:[#allocation6 + $0x18] sm:$0xff] %vm396_vm2, %v1901_v18  ;;  %405 = vst.msk [vmem:[#allocation7] sm:$0xff] %vm396_vm2, %v1901_v18  ;;  %v2040_v19 = vld [vmem:[%s2429_s2] ss:$0 sm:$0xff]  ;;  %s2074_s2 = smov 0  }
   0x8   :  { %406 = vst.msk [vmem:[#allocation7 + $0x8] sm:$0xff] %vm396_vm2, %v1901_v18  ;;  %407 = vst.msk [vmem:[#allocation7 + $0x10] sm:$0xff] %vm396_vm2, %v1901_v18 }
   0x9   :  { %408 = vst.msk [vmem:[#allocation7 + $0x18] sm:$0xff] %vm396_vm2, %v1901_v18  ;;  %409 = vst.msk [vmem:[#allocation8] sm:$0xff] %vm396_vm2, %v1901_v18 }
   0xa   :  { %410 = vst.msk [vmem:[#allocation8 + $0x8] sm:$0xff] %vm396_vm2, %v1901_v18  ;;  %411 = vst.msk [vmem:[#allocation8 + $0x10] sm:$0xff] %vm396_vm2, %v1901_v18 }
   0xb   :  { %412 = vst.msk [vmem:[#allocation8 + $0x18] sm:$0xff] %vm396_vm2, %v1901_v18 }
   0xe   :  { %1682 = vmatmul.mubr.msk.bf16.gmra.mxu0 %vm150_vm1, %v1815_v8  ;;  %1698 = vmatmul.mubr.msk.bf16.gmra.mxu1 %vm150_vm1, %v1816_v9 }
   0xf   :  { %1685 = vmatprep.mubr.msk.bf16.mxu0 %vm150_vm1, %v1817_v10  ;;  %1701 = vmatprep.mubr.msk.bf16.mxu1 %vm150_vm1, %v1818_v11 }
  0x16   :  { %1686 = vmatmul.mubr.msk.bf16.gmra.mxu0 %vm150_vm1, %v1819_v12  ;;  %1702 = vmatmul.mubr.msk.bf16.gmra.mxu1 %vm150_vm1, %v1820_v13 }
  0x17   :  { %1689 = vmatprep.mubr.msk.bf16.mxu0 %vm150_vm1, %v1821_v14  ;;  %1705 = vmatprep.mubr.msk.bf16.mxu1 %vm150_vm1, %v1822_v15 }
  0x1e   :  { %1690 = vmatmul.mubr.msk.bf16.gmra.mxu0 %vm150_vm1, %v1823_v16  ;;  %1706 = vmatmul.mubr.msk.bf16.gmra.mxu1 %vm150_vm1, %v1824_v17 }
  0xc6   :  { %v1679_v20 = vpop.f32.mrf.mxu0  ;;  %v1695_v22 = vpop.f32.mrf.mxu1 }
  0xc7   :  { %v246_v21 = vadd.f32 %v1679_v20, %v2040_v19  ;;  %v310_v23 = vadd.f32 %v1695_v22, %v2040_v19 }
  0xc8   :  { %v237_v24 = vpop.f32.mrf.mxu0  ;;  %v301_v26 = vpop.f32.mrf.mxu1 }
  0xc9   :  { %366 = vst [vmem:[#allocation2 + $0x10] sm:$0xff] %v246_v21  ;;  %v238_v25 = vadd.f32 %v2040_v19, %v237_v24  ;;  %382 = vst [vmem:[#allocation2 + $0x90] sm:$0xff] %v310_v23  ;;  %v302_v27 = vadd.f32 %v2040_v19, %v301_v26 }
  0xca   :  { %v1680_v28 = vpop.f32.mrf.mxu0  ;;  %v1696_v30 = vpop.f32.mrf.mxu1 }
  0xcb   :  { %364 = vst [vmem:[#allocation2] sm:$0xff] %v238_v25  ;;  %v249_v29 = vadd.f32 %v1680_v28, %v2040_v19  ;;  %380 = vst [vmem:[#allocation2 + $0x80] sm:$0xff] %v302_v27  ;;  %v313_v31 = vadd.f32 %v1696_v30, %v2040_v19 }
  0xcc   :  { %v240_v32 = vpop.f32.mrf.mxu0  ;;  %v304_v34 = vpop.f32.mrf.mxu1 }
  0xcd   :  { %367 = vst [vmem:[#allocation2 + $0x18] sm:$0xff] %v249_v29  ;;  %v241_v33 = vadd.f32 %v2040_v19, %v240_v32  ;;  %383 = vst [vmem:[#allocation2 + $0x98] sm:$0xff] %v313_v31  ;;  %v305_v35 = vadd.f32 %v2040_v19, %v304_v34 }
  0xce   :  { %v1683_v36 = vpop.f32.mrf.mxu0  ;;  %v1699_v38 = vpop.f32.mrf.mxu1 }
  0xcf   :  { %365 = vst [vmem:[#allocation2 + $0x8] sm:$0xff] %v241_v33  ;;  %v262_v37 = vadd.f32 %v1683_v36, %v2040_v19  ;;  %381 = vst [vmem:[#allocation2 + $0x88] sm:$0xff] %v305_v35  ;;  %v326_v39 = vadd.f32 %v1699_v38, %v2040_v19 }
  0xd0   :  { %v253_v40 = vpop.f32.mrf.mxu0  ;;  %v317_v42 = vpop.f32.mrf.mxu1 }
  0xd1   :  { %370 = vst [vmem:[#allocation2 + $0x30] sm:$0xff] %v262_v37  ;;  %v254_v41 = vadd.f32 %v2040_v19, %v253_v40  ;;  %386 = vst [vmem:[#allocation2 + $0xb0] sm:$0xff] %v326_v39  ;;  %v318_v43 = vadd.f32 %v2040_v19, %v317_v42 }
  0xd2   :  { %v1684_v44 = vpop.f32.mrf.mxu0  ;;  %v1700_v46 = vpop.f32.mrf.mxu1 }
  0xd3   :  { %368 = vst [vmem:[#allocation2 + $0x20] sm:$0xff] %v254_v41  ;;  %v265_v45 = vadd.f32 %v1684_v44, %v2040_v19  ;;  %384 = vst [vmem:[#allocation2 + $0xa0] sm:$0xff] %v318_v43  ;;  %v329_v47 = vadd.f32 %v1700_v46, %v2040_v19 }
  0xd4   :  { %v256_v48 = vpop.f32.mrf.mxu0  ;;  %v320_v50 = vpop.f32.mrf.mxu1 }
  0xd5   :  { %371 = vst [vmem:[#allocation2 + $0x38] sm:$0xff] %v265_v45  ;;  %v257_v49 = vadd.f32 %v2040_v19, %v256_v48  ;;  %387 = vst [vmem:[#allocation2 + $0xb8] sm:$0xff] %v329_v47  ;;  %v321_v51 = vadd.f32 %v2040_v19, %v320_v50 }
  0xd6   :  { %v1687_v52 = vpop.f32.mrf.mxu0  ;;  %v1703_v54 = vpop.f32.mrf.mxu1 }
  0xd7   :  { %369 = vst [vmem:[#allocation2 + $0x28] sm:$0xff] %v257_v49  ;;  %v278_v53 = vadd.f32 %v1687_v52, %v2040_v19  ;;  %385 = vst [vmem:[#allocation2 + $0xa8] sm:$0xff] %v321_v51  ;;  %v342_v55 = vadd.f32 %v1703_v54, %v2040_v19 }
  0xd8   :  { %v269_v56 = vpop.f32.mrf.mxu0  ;;  %v333_v58 = vpop.f32.mrf.mxu1 }
  0xd9   :  { %374 = vst [vmem:[#allocation2 + $0x50] sm:$0xff] %v278_v53  ;;  %v270_v57 = vadd.f32 %v2040_v19, %v269_v56  ;;  %390 = vst [vmem:[#allocation2 + $0xd0] sm:$0xff] %v342_v55  ;;  %v334_v59 = vadd.f32 %v2040_v19, %v333_v58 }
  0xda   :  { %v1688_v60 = vpop.f32.mrf.mxu0  ;;  %v1704_v62 = vpop.f32.mrf.mxu1 }
  0xdb   :  { %372 = vst [vmem:[#allocation2 + $0x40] sm:$0xff] %v270_v57  ;;  %v281_v61 = vadd.f32 %v1688_v60, %v2040_v19  ;;  %388 = vst [vmem:[#allocation2 + $0xc0] sm:$0xff] %v334_v59  ;;  %v345_v63 = vadd.f32 %v1704_v62, %v2040_v19 }
  0xdc   :  { %v272_v0 = vpop.f32.mrf.mxu0  ;;  %v336_v2 = vpop.f32.mrf.mxu1 }
  0xdd   :  { %375 = vst [vmem:[#allocation2 + $0x58] sm:$0xff] %v281_v61  ;;  %v273_v1 = vadd.f32 %v2040_v19, %v272_v0  ;;  %391 = vst [vmem:[#allocation2 + $0xd8] sm:$0xff] %v345_v63  ;;  %v337_v3 = vadd.f32 %v2040_v19, %v336_v2 }
  0xde   :  { %v1691_v4 = vpop.f32.mrf.mxu0  ;;  %v1707_v6 = vpop.f32.mrf.mxu1 }
  0xdf   :  { %373 = vst [vmem:[#allocation2 + $0x48] sm:$0xff] %v273_v1  ;;  %v294_v5 = vadd.f32 %v1691_v4, %v2040_v19  ;;  %389 = vst [vmem:[#allocation2 + $0xc8] sm:$0xff] %v337_v3  ;;  %v358_v7 = vadd.f32 %v1707_v6, %v2040_v19 }
  0xe0   :  { %v285_v8 = vpop.f32.mrf.mxu0  ;;  %v349_v10 = vpop.f32.mrf.mxu1 }
  0xe1   :  { %378 = vst [vmem:[#allocation2 + $0x70] sm:$0xff] %v294_v5  ;;  %v286_v9 = vadd.f32 %v2040_v19, %v285_v8  ;;  %394 = vst [vmem:[#allocation2 + $0xf0] sm:$0xff] %v358_v7  ;;  %v350_v11 = vadd.f32 %v2040_v19, %v349_v10 }
  0xe2   :  { %v1692_v12 = vpop.f32.mrf.mxu0  ;;  %v1708_v14 = vpop.f32.mrf.mxu1 }
  0xe3   :  { %376 = vst [vmem:[#allocation2 + $0x60] sm:$0xff] %v286_v9  ;;  %v297_v13 = vadd.f32 %v1692_v12, %v2040_v19  ;;  %392 = vst [vmem:[#allocation2 + $0xe0] sm:$0xff] %v350_v11  ;;  %v361_v15 = vadd.f32 %v1708_v14, %v2040_v19 }
  0xe4   :  { %v288_v16 = vpop.f32.mrf.mxu0  ;;  %v352_v18 = vpop.f32.mrf.mxu1 }
  0xe5   :  { %379 = vst [vmem:[#allocation2 + $0x78] sm:$0xff] %v297_v13  ;;  %v289_v17 = vadd.f32 %v2040_v19, %v288_v16  ;;  %395 = vst [vmem:[#allocation2 + $0xf8] sm:$0xff] %v361_v15  ;;  %v353_v20 = vadd.f32 %v2040_v19, %v352_v18 }
  0xe7   :  { %377 = vst [vmem:[#allocation2 + $0x68] sm:$0xff] %v289_v17  ;;  %393 = vst [vmem:[#allocation2 + $0xe8] sm:$0xff] %v353_v20 }
  0xe8 LB: > { %v1825_v21 = vld [vmem:[%s2422_s3] sm:$0xff]   ;;  %v427_v19 = vld [vmem:[#allocation5 + $0x8] sm:$0xff]  ;;  %v428_v27 = vld [vmem:[#allocation5 + $0x10] sm:$0xff]  ;;  %s1567_s20 = sshll.u32 %s1899_s2, 5  ;;  %s1902_s22 = smov 64   ;;  %s1899_s2 = sphi %s2074_s2, %s418_s2  }
  0xe9   : > { %v1826_v22 = vld [vmem:[%s2423_s4] sm:$0xff]   ;;  %1709 = vmatprep.subr.bf16.mxu0 %v1825_v21  ;;  %v667_v26 = vld [vmem:[#allocation7 + $0x8] sm:$0xff]  ;;  %v429_v28 = vld [vmem:[#allocation5 + $0x18] sm:$0xff]  ;;  %s421_s21 = scalar_lea.vmem [#allocation2], %s1567_s20  ;;  %s1903_s23 = smov 96  }
  0xea   : > { %v426_v23 = vld [vmem:[#allocation5] sm:$0xff]  ;;  %1715 = vmatprep.subr.bf16.mxu1 %v1826_v22  ;;  %1710 = vmatpush3.bf16.msra.mxu0 %v1825_v21  ;;  %v431_v30 = vpack.c.bf16 %v429_v28, %v428_v27  ;;  %v668_v31 = vld [vmem:[#allocation7 + $0x10] sm:$0xff]  ;;  %v669_v32 = vld [vmem:[#allocation7 + $0x18] sm:$0xff]  ;;  %s419_s24 = ssub.s32 7, %s1899_s2  ;;  %s1904_s27 = smov 16  }
  0xeb   : > { %v666_v24 = vld [vmem:[#allocation7] sm:$0xff]  ;;  %v430_v25 = vpack.c.bf16 %v427_v19, %v426_v23  ;;  %1716 = vmatpush3.bf16.msra.mxu1 %v1826_v22  ;;  %v671_v33 = vpack.c.bf16 %v669_v32, %v668_v31  ;;  %s2097_s25 = sshll.u32 %s419_s24, 5  ;;  %v500_v18 = vld [vmem:[#allocation6 + $0x8] sm:$0xff]  ;;  %v501_v20 = vld [vmem:[#allocation6 + $0x10] sm:$0xff]  ;;  %s1905_s28 = smov 80  }
  0xec   : > { %v670_v29 = vpack.c.bf16 %v667_v26, %v666_v24  ;;  %s661_s26 = scalar_lea.vmem [#allocation2], %s2097_s25  ;;  %v499_v13 = vld [vmem:[#allocation6] sm:$0xff]  ;;  %v502_v23 = vld [vmem:[#allocation6 + $0x18] sm:$0xff]  ;;  %v756_v24 = vld [vmem:[#allocation8 + $0x8] sm:$0xff]  ;;  %s1906_s29 = smov 32  }
  0xed   : > { %1711 = vmatprep.mubr.msk.bf16.mxu0 %vm396_vm2, %v430_v25  ;;  %v755_v19 = vld [vmem:[#allocation8] sm:$0xff]  ;;  %v757_v25 = vld [vmem:[#allocation8 + $0x10] sm:$0xff]  ;;  %s1907_s30 = smov 112   ;;  %s1908_s9 = smov 48  }
  0xee   : > { %1717 = vmatprep.mubr.msk.bf16.mxu1 %vm396_vm2, %v670_v29  ;;  %1712 = vmatmul.mubr.msk.bf16.vlgmr.msra.gmra.mxu0 %vm396_vm2, %v431_v30  ;;  %v424_v34 = vld [vmem:[%s421_s21 + $0x10] sm:$0xff]  ;;  %v422_v36 = vld [vmem:[%s421_s21] sm:$0xff]  ;;  %v425_v40 = vld [vmem:[%s421_s21 + $0x18] sm:$0xff]  ;;  %s655_s10 = scalar_lea.vmem [#allocation3], %s1567_s20  ;;  %s911_s11 = scalar_lea.vmem [#allocation4], %s2097_s25 }
  0xef   : > { %1718 = vmatmul.mubr.msk.bf16.vlgmr.msra.gmra.mxu1 %vm396_vm2, %v671_v33  ;;  %v423_v44 = vld [vmem:[%s421_s21 + $0x8] sm:$0xff]  ;;  %v662_v54 = vld [vmem:[%s661_s26] sm:$0xff]  ;;  %v664_v56 = vld [vmem:[%s661_s26 + $0x10] sm:$0xff]  ;;  %s418_s2 = sadd.s32 1, %s1899_s2  }
  0xf0   : > { %v663_v60 = vld [vmem:[%s661_s26 + $0x8] sm:$0xff]  ;;  %v665_v1 = vld [vmem:[%s661_s26 + $0x18] sm:$0xff]  ;;  %p415_p0 = scmp.ge.s32.totalorder %s418_s2, 8  }
  0xf1   : > { %v758_v29 = vld [vmem:[#allocation8 + $0x18] sm:$0xff] }
 0x1ae   : > { %v1713_v35 = vpop.f32.mrf.mxu0 }
 0x1af   : > { %v497_v37 = vadd.f32 %v1713_v35, %v424_v34  ;;  %v1719_v38 = vpop.f32.mrf.mxu1 }
 0x1b0   : > { %743 = vrot.lane.b32.xlu1 %v1719_v38, %s1902_s22  ;;  %v480_v39 = vpop.f32.mrf.mxu0 }
 0x1b1   : > { %1827 = vtanh.f32 %v497_v37  ;;  %v495_v41 = vadd.f32 %v480_v39, %v422_v36  ;;  %v720_v42 = vpop.f32.mrf.mxu1  ;;  %v1573_v63 = vmul.f32 -1.442695, %v497_v37 }
 0x1b2   : > { %739 = vrot.lane.b32.xlu0 %v720_v42, %s1902_s22  ;;  %v1714_v43 = vpop.f32.mrf.mxu0 }
 0x1b3   : > { %v498_v45 = vadd.f32 %v1714_v43, %v425_v40  ;;  %v1720_v46 = vpop.f32.mrf.mxu1  ;;  %1829 = vtanh.f32 %v495_v41  ;;  %v1571_v59 = vmul.f32 -1.442695, %v495_v41 }
 0x1b4   : > { %745 = vrot.lane.b32.xlu1 %v1720_v46, %s1902_s22  ;;  %v483_v47 = vpop.f32.mrf.mxu0 }
 0x1b5   : > { %v723_v48 = vpop.f32.mrf.mxu1  ;;  %v496_v49 = vadd.f32 %v483_v47, %v423_v44  ;;  %1831 = vtanh.f32 %v498_v45  ;;  %v1574_v3 = vmul.f32 -1.442695, %v498_v45 }
 0x1b6   : > { %741 = vrot.lane.b32.xlu0 %v723_v48, %s1902_s22 }
 0x1b7   : > { %1833 = vtanh.f32 %v496_v49  ;;  %v1572_v5 = vmul.f32 -1.442695, %v496_v49 }
 0x1be   : > { %v1828_v50 = vpop.eup %1827 }
 0x1bf   : > { %559 = vrot.lane.b32.xlu0 %v1828_v50, %s1903_s23 }
 0x1c0   : > { %v1830_v51 = vpop.eup %1829 }
 0x1c2   : > { %v1832_v52 = vpop.eup %1831 }
 0x1c3   : > { %555 = vrot.lane.b32.xlu0 %v1830_v51, %s1903_s23  ;;  %561 = vrot.lane.b32.xlu1 %v1832_v52, %s1903_s23 }
 0x1c4   : > { %v1834_v53 = vpop.eup %1833 }
 0x1c7   : > { %557 = vrot.lane.b32.xlu1 %v1834_v53, %s1903_s23 }
 0x222   : > { %v744_v55 = vpop.permute.xlu1 %743 }
 0x223   : > { %v2102_v61 = vadd.f32 %v744_v55, %v664_v56 }
 0x224   : > { %v740_v57 = vpop.permute.xlu0 %739 }
 0x225   : > { %v2100_v58 = vadd.f32 %v740_v57, %v662_v54  ;;  %v1581_v39 = vmul.f32 -1.442695, %v2102_v61 }
 0x226   : > { %v746_v0 = vpop.permute.xlu1 %745 }
 0x227   : > { %1835 = vtanh.f32 %v2100_v58  ;;  %v2108_v4 = vadd.f32 %v746_v0, %v665_v1  ;;  %v1579_v38 = vmul.f32 -1.442695, %v2100_v58 }
 0x228   : > { %v742_v62 = vpop.permute.xlu0 %741  ;;  %1837 = vpow2.f32 %v1571_v59 }
 0x229   : > { %v2105_v2 = vadd.f32 %v742_v62, %v663_v60  ;;  %1839 = vtanh.f32 %v2102_v61  ;;  %v1582_v41 = vmul.f32 -1.442695, %v2108_v4 }
 0x22b   : > { %1841 = vtanh.f32 %v2105_v2  ;;  %v1580_v40 = vmul.f32 -1.442695, %v2105_v2 }
 0x22c   : > { %1843 = vpow2.f32 %v1573_v63 }
 0x22d   : > { %1845 = vpow2.f32 %v1574_v3 }
 0x22e   : > { %1847 = vtanh.f32 %v2108_v4 }
 0x22f   : > { %1849 = vpow2.f32 %v1572_v5 }
 0x231   : > { %v560_v22 = vpop.permute.xlu0 %559 }
 0x234   : > { %v1836_v6 = vpop.eup %1835 }
 0x235   : > { %811 = vrot.lane.b32.xlu0 %v1836_v6, %s1903_s23  ;;  %v1838_v7 = vpop.eup %1837  ;;  %v556_v26 = vpop.permute.xlu0 %555 }
 0x236   : > { %v1840_v8 = vpop.eup %1839  ;;  %v515_v11 = vadd.f32 1.0, %v1838_v7  ;;  %v562_v28 = vpop.permute.xlu1 %561 }
 0x238   : > { %v1842_v9 = vpop.eup %1841  ;;  %1851 = vrcp.f32 %v515_v11 }
 0x239   : > { %v1844_v10 = vpop.eup %1843  ;;  %813 = vrot.lane.b32.xlu1 %v1842_v9, %s1903_s23  ;;  %815 = vrot.lane.b32.xlu0 %v1840_v8, %s1903_s23 }
 0x23a   : > { %v1846_v12 = vpop.eup %1845  ;;  %v517_v15 = vadd.f32 1.0, %v1844_v10  ;;  %v558_v35 = vpop.permute.xlu1 %557 }
 0x23b   : > { %v1848_v14 = vpop.eup %1847  ;;  %v518_v16 = vadd.f32 1.0, %v1846_v12 }
 0x23c   : > { %v1850_v17 = vpop.eup %1849  ;;  %1853 = vrcp.f32 %v517_v15 }
 0x23d   : > { %817 = vrot.lane.b32.xlu1 %v1848_v14, %s1903_s23  ;;  %535 = vrot.lane.b32.xlu0 %v499_v13, %s1904_s27  ;;  %1855 = vrcp.f32 %v518_v16  ;;  %v516_v21 = vadd.f32 1.0, %v1850_v17 }
 0x23f   : > { %1857 = vrcp.f32 %v516_v21 }
 0x240   : > { %1859 = vpow2.f32 %v1579_v38 }
 0x241   : > { %537 = vrot.lane.b32.xlu1 %v500_v18, %s1904_s27  ;;  %539 = vrot.lane.b32.xlu0 %v501_v20, %s1904_s27  ;;  %1861 = vpow2.f32 %v1581_v39 }
 0x242   : > { %1863 = vpow2.f32 %v1580_v40 }
 0x243   : > { %1865 = vpow2.f32 %v1582_v41 }
 0x245   : > { %541 = vrot.lane.b32.xlu1 %v502_v23, %s1904_s27  ;;  %791 = vrot.lane.b32.xlu0 %v755_v19, %s1905_s28  ;;  %v2123_v27 = vpop.eup %1851 }
 0x246   : > { %v567_v30 = vmul.f32 %v2123_v27, %v556_v26 }
 0x249   : > { %793 = vrot.lane.b32.xlu1 %v756_v24, %s1905_s28  ;;  %795 = vrot.lane.b32.xlu0 %v757_v25, %s1905_s28  ;;  %v2126_v31 = vpop.eup %1853 }
 0x24a   : > { %v2130_v32 = vpop.eup %1855  ;;  %v569_v33 = vmul.f32 %v2126_v31, %v560_v22 }
 0x24b   : > { %v570_v34 = vmul.f32 %v2130_v32, %v562_v28 }
 0x24c   : > { %v2136_v36 = vpop.eup %1857 }
 0x24d   : > { %797 = vrot.lane.b32.xlu1 %v758_v29, %s1905_s28  ;;  %575 = vrot.lane.b32.xlu0 %v567_v30, %s1904_s27  ;;  %v568_v37 = vmul.f32 %v2136_v36, %v558_v35  ;;  %v1860_v42 = vpop.eup %1859 }
 0x24e   : > { %v1862_v43 = vpop.eup %1861  ;;  %v771_v44 = vadd.f32 1.0, %v1860_v42 }
 0x24f   : > { %v1864_v45 = vpop.eup %1863  ;;  %v773_v46 = vadd.f32 1.0, %v1862_v43 }
 0x250   : > { %1867 = vrcp.f32 %v771_v44  ;;  %v772_v47 = vadd.f32 1.0, %v1864_v45  ;;  %v1866_v48 = vpop.eup %1865 }
 0x251   : > { %581 = vrot.lane.b32.xlu1 %v570_v34, %s1904_s27  ;;  %579 = vrot.lane.b32.xlu0 %v569_v33, %s1904_s27  ;;  %1869 = vrcp.f32 %v773_v46  ;;  %v774_v49 = vadd.f32 1.0, %v1866_v48 }
 0x252   : > { %1871 = vrcp.f32 %v772_v47 }
 0x253   : > { %1873 = vrcp.f32 %v774_v49 }
 0x255   : > { %577 = vrot.lane.b32.xlu1 %v568_v37, %s1904_s27 }
 0x25d   : > { %v2144_v50 = vpop.eup %1867 }
 0x25e   : > { %v2147_v53 = vpop.eup %1869 }
 0x25f   : > { %v2150_v54 = vpop.eup %1871 }
 0x260   : > { %v2156_v59 = vpop.eup %1873 }
 0x2a7   : > { %v812_v51 = vpop.permute.xlu0 %811 }
 0x2a8   : > { %v823_v52 = vmul.f32 %v2144_v50, %v812_v51 }
 0x2aa   : > { %831 = vrot.lane.b32.xlu0 %v823_v52, %s1904_s27 }
 0x2ab   : > { %v814_v55 = vpop.permute.xlu1 %813  ;;  %v816_v56 = vpop.permute.xlu0 %815 }
 0x2ac   : > { %v824_v57 = vmul.f32 %v2150_v54, %v814_v55  ;;  %v825_v58 = vmul.f32 %v2147_v53, %v816_v56 }
 0x2ae   : > { %833 = vrot.lane.b32.xlu1 %v824_v57, %s1904_s27  ;;  %835 = vrot.lane.b32.xlu0 %v825_v58, %s1904_s27 }
 0x2af   : > { %v818_v60 = vpop.permute.xlu1 %817  ;;  %v536_v61 = vpop.permute.xlu0 %535 }
 0x2b0   : > { %v826_v62 = vmul.f32 %v2156_v59, %v818_v60  ;;  %v547_v13 = vmul.f32 %v2123_v27, %v536_v61 }
 0x2b2   : > { %837 = vrot.lane.b32.xlu1 %v826_v62, %s1904_s27 }
 0x2b3   : > { %v538_v63 = vpop.permute.xlu1 %537  ;;  %v540_v0 = vpop.permute.xlu0 %539 }
 0x2b4   : > { %v549_v7 = vmul.f32 %v2126_v31, %v540_v0  ;;  %v548_v14 = vmul.f32 %v2136_v36, %v538_v63 }
 0x2b7   : > { %v542_v1 = vpop.permute.xlu1 %541  ;;  %v792_v2 = vpop.permute.xlu0 %791 }
 0x2b8   : > { %v550_v8 = vmul.f32 %v2130_v32, %v542_v1  ;;  %v803_v23 = vmul.f32 %v2144_v50, %v792_v2 }
 0x2bb   : > { %v794_v3 = vpop.permute.xlu1 %793  ;;  %v796_v4 = vpop.permute.xlu0 %795 }
 0x2bc   : > { %v804_v25 = vmul.f32 %v2150_v54, %v794_v3  ;;  %v805_v26 = vmul.f32 %v2147_v53, %v796_v4 }
 0x2bf   : > { %v798_v5 = vpop.permute.xlu1 %797  ;;  %v576_v6 = vpop.permute.xlu0 %575 }
 0x2c0   : > { %v587_v15 = vadd.f32 %v576_v6, %v547_v13  ;;  %v806_v34 = vmul.f32 %v2156_v59, %v798_v5  ;;  %v1891_v6 = vld [vmem:[%s2425_s6] sm:$0xff] (%p415_p0)  }
 0x2c1   :  { %1721 = vmatprep.subr.bf16.mxu0 (%p415_p0), %v1891_v6 }
 0x2c2   :  { %1722 = vmatpush3.bf16.msra.mxu0 (%p415_p0), %v1891_v6 }
 0x2c3   : > { %v582_v9 = vpop.permute.xlu1 %581  ;;  %v580_v10 = vpop.permute.xlu0 %579 }
 0x2c4   : > { %v590_v11 = vadd.f32 %v582_v9, %v550_v8  ;;  %v589_v12 = vadd.f32 %v580_v10, %v549_v7  ;;  %v1892_v7 = vld [vmem:[%s2424_s5] sm:$0xff] (%p415_p0)  }
 0x2c5   :  { %1755 = vmatprep.subr.bf16.mxu1 (%p415_p0), %v1892_v7 }
 0x2c6   : > { %1875 = vtanh.f32 %v590_v11  ;;  %1756 = vmatpush3.bf16.msra.mxu1 (%p415_p0), %v1892_v7 }
 0x2c7   : > { %1877 = vtanh.f32 %v589_v12  ;;  %v578_v16 = vpop.permute.xlu1 %577 }
 0x2c8   : > { %v588_v17 = vadd.f32 %v578_v16, %v548_v14 }
 0x2ca   : > { %1879 = vtanh.f32 %v588_v17 }
 0x2cb   : > { %1881 = vtanh.f32 %v587_v15 }
 0x2d3   : > { %v1876_v18 = vpop.eup %1875 }
 0x2d4   : > { %v1878_v20 = vpop.eup %1877  ;;  %605 = vrot.lane.b32.xlu1 %v1876_v18, %s1906_s29 }
 0x2d5   : > { %603 = vrot.lane.b32.xlu0 %v1878_v20, %s1906_s29 }
 0x2d7   : > { %v1880_v21 = vpop.eup %1879 }
 0x2d8   : > { %v1882_v22 = vpop.eup %1881  ;;  %601 = vrot.lane.b32.xlu1 %v1880_v21, %s1906_s29 }
 0x2d9   : > { %599 = vrot.lane.b32.xlu0 %v1882_v22, %s1906_s29 }
 0x31c   : > { %v832_v19 = vpop.permute.xlu0 %831 }
 0x31d   : > { %v843_v24 = vadd.f32 %v832_v19, %v803_v23 }
 0x31f   : > { %1883 = vtanh.f32 %v843_v24 }
 0x320   : > { %v834_v28 = vpop.permute.xlu1 %833  ;;  %v836_v29 = vpop.permute.xlu0 %835 }
 0x321   : > { %v844_v30 = vadd.f32 %v834_v28, %v804_v25  ;;  %v845_v33 = vadd.f32 %v836_v29, %v805_v26 }
 0x323   : > { %1885 = vtanh.f32 %v844_v30 }
 0x324   : > { %1887 = vtanh.f32 %v845_v33  ;;  %v838_v35 = vpop.permute.xlu1 %837 }
 0x325   : > { %v846_v37 = vadd.f32 %v838_v35, %v806_v34 }
 0x327   : > { %1889 = vtanh.f32 %v846_v37 }
 0x32c   : > { %v1884_v38 = vpop.eup %1883 }
 0x32d   : > { %855 = vrot.lane.b32.xlu0 %v1884_v38, %s1906_s29 }
 0x330   : > { %v1886_v39 = vpop.eup %1885 }
 0x331   : > { %v1888_v40 = vpop.eup %1887  ;;  %857 = vrot.lane.b32.xlu1 %v1886_v39, %s1906_s29 }
 0x332   : > { %859 = vrot.lane.b32.xlu0 %v1888_v40, %s1906_s29 }
 0x334   : > { %v1890_v41 = vpop.eup %1889 }
 0x335   : > { %861 = vrot.lane.b32.xlu1 %v1890_v41, %s1906_s29 }
 0x339   : > { %641 = vrot.lane.b32.xlu1 %v588_v17, %s1907_s30 }
 0x33d   : > { %645 = vrot.lane.b32.xlu1 %v590_v11, %s1907_s30 }
 0x341   : > { %897 = vrot.lane.b32.xlu1 %v844_v30, %s1908_s9 }
 0x346   : > { %v606_v42 = vpop.permute.xlu1 %605 }
 0x347   : > { %v614_v43 = vmul.f32 %v2130_v32, %v606_v42  ;;  %v604_v44 = vpop.permute.xlu0 %603 }
 0x348   : > { %v613_v49 = vmul.f32 %v2126_v31, %v604_v44 }
 0x349   : > { %625 = vrot.lane.b32.xlu1 %v614_v43, %s1905_s28 }
 0x34a   : > { %v602_v45 = vpop.permute.xlu1 %601 }
 0x34b   : > { %v612_v46 = vmul.f32 %v2136_v36, %v602_v45  ;;  %v600_v47 = vpop.permute.xlu0 %599 }
 0x34c   : > { %v611_v48 = vmul.f32 %v2123_v27, %v600_v47 }
 0x34d   : > { %621 = vrot.lane.b32.xlu1 %v612_v46, %s1905_s28 }
 0x34e   : > { %619 = vrot.lane.b32.xlu0 %v611_v48, %s1905_s28 }
 0x352   : > { %623 = vrot.lane.b32.xlu0 %v613_v49, %s1905_s28 }
 0x356   : > { %639 = vrot.lane.b32.xlu0 %v587_v15, %s1907_s30 }
 0x35a   : > { %643 = vrot.lane.b32.xlu0 %v589_v12, %s1907_s30 }
 0x35e   : > { %895 = vrot.lane.b32.xlu0 %v843_v24, %s1908_s9 }
 0x39f   : > { %v856_v32 = vpop.permute.xlu0 %855 }
 0x3a0   : > { %v867_v56 = vmul.f32 %v2144_v50, %v856_v32 }
 0x3a3   : > { %v858_v51 = vpop.permute.xlu1 %857 }
 0x3a4   : > { %v860_v52 = vpop.permute.xlu0 %859  ;;  %v868_v57 = vmul.f32 %v2150_v54, %v858_v51 }
 0x3a5   : > { %v869_v36 = vmul.f32 %v2147_v53, %v860_v52 }
 0x3a7   : > { %879 = vrot.lane.b32.xlu0 %v869_v36, %s1904_s27  ;;  %v862_v27 = vpop.permute.xlu1 %861 }
 0x3a8   : > { %v870_v55 = vmul.f32 %v2156_v59, %v862_v27 }
 0x3aa   : > { %881 = vrot.lane.b32.xlu1 %v870_v55, %s1904_s27 }
 0x3ab   : > { %875 = vrot.lane.b32.xlu0 %v867_v56, %s1904_s27  ;;  %v642_v31 = vpop.permute.xlu1 %641 }
 0x3ac   : > { %652 = vst.msk [vmem:[#allocation6 + $0x8] sm:$0xff] %vm396_vm2, %v642_v31 }
 0x3ae   : > { %877 = vrot.lane.b32.xlu1 %v868_v57, %s1904_s27 }
 0x3af   : > { %899 = vrot.lane.b32.xlu0 %v845_v33, %s1908_s9  ;;  %v646_v53 = vpop.permute.xlu1 %645 }
 0x3b0   : > { %654 = vst.msk [vmem:[#allocation6 + $0x18] sm:$0xff] %vm396_vm2, %v646_v53 }
 0x3b2   : > { %901 = vrot.lane.b32.xlu1 %v846_v37, %s1908_s9 }
 0x3b3   : > { %v898_v58 = vpop.permute.xlu1 %897 }
 0x3b4   : > { %908 = vst.msk [vmem:[#allocation8 + $0x8] sm:$0xff] %vm396_vm2, %v898_v58 }
 0x3bb   : > { %v626_v50 = vpop.permute.xlu1 %625 }
 0x3bc   : > { %634 = vst.msk [vmem:[#allocation5 + $0x18] sm:$0xff] %vm396_vm2, %v626_v50  ;;  %659 = vst.msk [vmem:[%s655_s10 + $0x18] sm:$0xff] %vm396_vm2, %v626_v50 }
 0x3bf   : > { %v622_v54 = vpop.permute.xlu1 %621 }
 0x3c0   : > { %632 = vst.msk [vmem:[#allocation5 + $0x8] sm:$0xff] %vm396_vm2, %v622_v54  ;;  %657 = vst.msk [vmem:[%s655_s10 + $0x8] sm:$0xff] %vm396_vm2, %v622_v54  ;;  %v620_v59 = vpop.permute.xlu0 %619 }
 0x3c1   : > { %631 = vst.msk [vmem:[#allocation5] sm:$0xff] %vm396_vm2, %v620_v59  ;;  %656 = vst.msk [vmem:[%s655_s10] sm:$0xff] %vm396_vm2, %v620_v59 }
 0x3c4   : > { %v624_v60 = vpop.permute.xlu0 %623 }
 0x3c5   : > { %633 = vst.msk [vmem:[#allocation5 + $0x10] sm:$0xff] %vm396_vm2, %v624_v60  ;;  %658 = vst.msk [vmem:[%s655_s10 + $0x10] sm:$0xff] %vm396_vm2, %v624_v60 }
 0x3c8   : > { %v640_v61 = vpop.permute.xlu0 %639 }
 0x3c9   : > { %651 = vst.msk [vmem:[#allocation6] sm:$0xff] %vm396_vm2, %v640_v61 }
 0x3cc   : > { %v644_v62 = vpop.permute.xlu0 %643  ;;  %v916_v10 = vld [vmem:[#allocation3] sm:$0xff] (%p415_p0)  ;;  %v917_v12 = vld [vmem:[#allocation3 + $0x8] sm:$0xff] (%p415_p0)  ;;  %v918_v17 = vld [vmem:[#allocation3 + $0x10] sm:$0xff] (%p415_p0) }
 0x3cd   : > { %653 = vst.msk [vmem:[#allocation6 + $0x10] sm:$0xff] %vm396_vm2, %v644_v62  ;;  %v948_v15 = vpack.c.bf16 (%p415_p0), %v917_v12, %v916_v10  ;;  %v919_v18 = vld [vmem:[#allocation3 + $0x18] sm:$0xff] (%p415_p0)  ;;  %v920_v23 = vld [vmem:[#allocation3 + $0x20] sm:$0xff] (%p415_p0)  ;;  %v921_v19 = vld [vmem:[#allocation3 + $0x28] sm:$0xff] (%p415_p0) }
 0x3ce   :  { %v949_v21 = vpack.c.bf16 (%p415_p0), %v919_v18, %v918_v17  ;;  %v950_v25 = vpack.c.bf16 (%p415_p0), %v921_v19, %v920_v23  ;;  %v922_v29 = vld [vmem:[#allocation3 + $0x30] sm:$0xff] (%p415_p0)  ;;  %v923_v30 = vld [vmem:[#allocation3 + $0x38] sm:$0xff] (%p415_p0)  ;;  %v924_v35 = vld [vmem:[#allocation3 + $0x40] sm:$0xff] (%p415_p0) }
 0x3cf   :  { %1757 = vmatprep.mubr.msk.bf16.mxu1 (%p415_p0), %vm396_vm2, %v948_v15  ;;  %v925_v37 = vld [vmem:[#allocation3 + $0x48] sm:$0xff] (%p415_p0)  ;;  %v951_v39 = vpack.c.bf16 (%p415_p0), %v923_v30, %v922_v29  ;;  %v926_v44 = vld [vmem:[#allocation3 + $0x50] sm:$0xff] (%p415_p0)  ;;  %v927_v45 = vld [vmem:[#allocation3 + $0x58] sm:$0xff] (%p415_p0) }
 0x3d0   : > { %v896_v63 = vpop.permute.xlu0 %895  ;;  %1758 = vmatmul.mubr.msk.bf16.vlgmr.msra.gmra.mxu1 (%p415_p0), %vm396_vm2, %v949_v21  ;;  %v952_v41 = vpack.c.bf16 (%p415_p0), %v925_v37, %v924_v35  ;;  %v928_v48 = vld [vmem:[#allocation3 + $0x60] sm:$0xff] (%p415_p0)  ;;  %v929_v49 = vld [vmem:[#allocation3 + $0x68] sm:$0xff] (%p415_p0)  ;;  %v953_v51 = vpack.c.bf16 (%p415_p0), %v927_v45, %v926_v44  ;;  %v930_v56 = vld [vmem:[#allocation3 + $0x70] sm:$0xff] (%p415_p0) }
 0x3d1   : > { %907 = vst.msk [vmem:[#allocation8] sm:$0xff] %vm396_vm2, %v896_v63  ;;  %1761 = vmatprep.mubr.msk.bf16.mxu1 (%p415_p0), %vm396_vm2, %v950_v25  ;;  %v954_v36 = vpack.c.bf16 (%p415_p0), %v929_v49, %v928_v48  ;;  %v931_v31 = vld [vmem:[#allocation3 + $0x78] sm:$0xff] (%p415_p0)  ;;  %v932_v58 = vld [vmem:[#allocation3 + $0x80] sm:$0xff] (%p415_p0)  ;;  %v933_v50 = vld [vmem:[#allocation3 + $0x88] sm:$0xff] (%p415_p0) }
 0x3d2   :  { %v955_v59 = vpack.c.bf16 (%p415_p0), %v931_v31, %v930_v56  ;;  %v956_v61 = vpack.c.bf16 (%p415_p0), %v933_v50, %v932_v58  ;;  %v938_v12 = vld [vmem:[#allocation3 + $0xb0] sm:$0xff] (%p415_p0)  ;;  %v941_v17 = vld [vmem:[#allocation3 + $0xc8] sm:$0xff] (%p415_p0)  ;;  %v943_v25 = vld [vmem:[#allocation3 + $0xd8] sm:$0xff] (%p415_p0) }
 0x3d3   :  { %v944_v29 = vld [vmem:[#allocation3 + $0xe0] sm:$0xff] (%p415_p0)  ;;  %v945_v30 = vld [vmem:[#allocation3 + $0xe8] sm:$0xff] (%p415_p0) }
 0x3d4   :  { %v962_v37 = vpack.c.bf16 (%p415_p0), %v945_v30, %v944_v29 }
 0x3d8   :  { %1762 = vmatmul.mubr.msk.bf16.gmra.mxu1 (%p415_p0), %vm396_vm2, %v951_v39 }
 0x3d9   :  { %1765 = vmatprep.mubr.msk.bf16.mxu1 (%p415_p0), %vm396_vm2, %v952_v41  ;;  %v947_v41 = vld [vmem:[#allocation3 + $0xf8] sm:$0xff] (%p415_p0) }
 0x3e0   :  { %1766 = vmatmul.mubr.msk.bf16.gmra.mxu1 (%p415_p0), %vm396_vm2, %v953_v51 }
 0x3e1   :  { %1769 = vmatprep.mubr.msk.bf16.mxu1 (%p415_p0), %vm396_vm2, %v954_v36 }
 0x3e8   :  { %1770 = vmatmul.mubr.msk.bf16.gmra.mxu1 (%p415_p0), %vm396_vm2, %v955_v59 }
 0x3e9   :  { %1773 = vmatprep.mubr.msk.bf16.mxu1 (%p415_p0), %vm396_vm2, %v956_v61 }
 0x419   : > { %v880_v0 = vpop.permute.xlu0 %879 }
 0x41a   : > { %889 = vst.msk [vmem:[#allocation7 + $0x10] sm:$0xff] %vm396_vm2, %v880_v0  ;;  %914 = vst.msk [vmem:[%s911_s11 + $0x10] sm:$0xff] %vm396_vm2, %v880_v0  ;;  %v934_v0 = vld [vmem:[#allocation3 + $0x90] sm:$0xff] (%p415_p0) }
 0x41c   : > { %v882_v1 = vpop.permute.xlu1 %881 }
 0x41d   : > { %890 = vst.msk [vmem:[#allocation7 + $0x18] sm:$0xff] %vm396_vm2, %v882_v1  ;;  %915 = vst.msk [vmem:[%s911_s11 + $0x18] sm:$0xff] %vm396_vm2, %v882_v1  ;;  %v876_v2 = vpop.permute.xlu0 %875  ;;  %v935_v1 = vld [vmem:[#allocation3 + $0x98] sm:$0xff] (%p415_p0) }
 0x41e   : > { %887 = vst.msk [vmem:[#allocation7] sm:$0xff] %vm396_vm2, %v876_v2  ;;  %912 = vst.msk [vmem:[%s911_s11] sm:$0xff] %vm396_vm2, %v876_v2  ;;  %v957_v7 = vpack.c.bf16 (%p415_p0), %v935_v1, %v934_v0 }
 0x420   : > { %v878_v3 = vpop.permute.xlu1 %877  ;;  %1774 = vmatmul.mubr.msk.bf16.gmra.mxu1 (%p415_p0), %vm396_vm2, %v957_v7 }
 0x421   : > { %888 = vst.msk [vmem:[#allocation7 + $0x8] sm:$0xff] %vm396_vm2, %v878_v3  ;;  %913 = vst.msk [vmem:[%s911_s11 + $0x8] sm:$0xff] %vm396_vm2, %v878_v3  ;;  %v900_v4 = vpop.permute.xlu0 %899 }
 0x422   : > { %909 = vst.msk [vmem:[#allocation8 + $0x10] sm:$0xff] %vm396_vm2, %v900_v4  ;;  %v936_v4 = vld [vmem:[#allocation3 + $0xa0] sm:$0xff] (%p415_p0) }
 0x424   : > { %v902_v5 = vpop.permute.xlu1 %901 }
 0x425   : > { %910 = vst.msk [vmem:[#allocation8 + $0x18] sm:$0xff] %vm396_vm2, %v902_v5  ;;  %417 = sbr.rel (!%p415_p0) target bundleno = 232 (0xe8), region = 63  ;;  %v937_v5 = vld [vmem:[#allocation3 + $0xa8] sm:$0xff] (%p415_p0) }
 0x428   :  { %v964_v8 = vld [vmem:[#allocation4] sm:$0xff] (%p415_p0)  ;;  %v965_v9 = vld [vmem:[#allocation4 + $0x8] sm:$0xff] (%p415_p0)  ;;  %v966_v13 = vld [vmem:[#allocation4 + $0x10] sm:$0xff] (%p415_p0) }
 0x429   :  { %v996_v11 = vpack.c.bf16 (%p415_p0), %v965_v9, %v964_v8  ;;  %v967_v14 = vld [vmem:[#allocation4 + $0x18] sm:$0xff] (%p415_p0)  ;;  %v968_v20 = vld [vmem:[#allocation4 + $0x20] sm:$0xff] (%p415_p0)  ;;  %v969_v22 = vld [vmem:[#allocation4 + $0x28] sm:$0xff] (%p415_p0)  ;;  %v958_v9 = vpack.c.bf16 (%p415_p0), %v937_v5, %v936_v4 }
 0x42a   :  { %v997_v16 = vpack.c.bf16 %v967_v14, %v966_v13  ;;  %v998_v24 = vpack.c.bf16 %v969_v22, %v968_v20  ;;  %v970_v26 = vld [vmem:[#allocation4 + $0x30] sm:$0xff]  ;;  %v971_v28 = vld [vmem:[#allocation4 + $0x38] sm:$0xff]  ;;  %v972_v33 = vld [vmem:[#allocation4 + $0x40] sm:$0xff] }
 0x42b   :  { %1723 = vmatprep.mubr.msk.bf16.mxu0 %vm396_vm2, %v996_v11  ;;  %v973_v34 = vld [vmem:[#allocation4 + $0x48] sm:$0xff]  ;;  %v999_v38 = vpack.c.bf16 %v971_v28, %v970_v26  ;;  %v974_v42 = vld [vmem:[#allocation4 + $0x50] sm:$0xff]  ;;  %v975_v43 = vld [vmem:[#allocation4 + $0x58] sm:$0xff]  ;;  %1777 = vmatprep.mubr.msk.bf16.mxu1 %vm396_vm2, %v958_v9 }
 0x42c   :  { %1724 = vmatmul.mubr.msk.bf16.vlgmr.msra.gmra.mxu0 %vm396_vm2, %v997_v16  ;;  %v1000_v40 = vpack.c.bf16 %v973_v34, %v972_v33  ;;  %v976_v46 = vld [vmem:[#allocation4 + $0x60] sm:$0xff]  ;;  %v977_v47 = vld [vmem:[#allocation4 + $0x68] sm:$0xff]  ;;  %v1001_v32 = vpack.c.bf16 %v975_v43, %v974_v42  ;;  %v978_v27 = vld [vmem:[#allocation4 + $0x70] sm:$0xff] }
 0x42d   :  { %1727 = vmatprep.mubr.msk.bf16.mxu0 %vm396_vm2, %v998_v24  ;;  %v1002_v52 = vpack.c.bf16 %v977_v47, %v976_v46  ;;  %v979_v55 = vld [vmem:[#allocation4 + $0x78] sm:$0xff]  ;;  %v980_v57 = vld [vmem:[#allocation4 + $0x80] sm:$0xff]  ;;  %v981_v53 = vld [vmem:[#allocation4 + $0x88] sm:$0xff] }
 0x42e   :  { %v1003_v54 = vpack.c.bf16 %v979_v55, %v978_v27  ;;  %v1004_v60 = vpack.c.bf16 %v981_v53, %v980_v57  ;;  %v982_v62 = vld [vmem:[#allocation4 + $0x90] sm:$0xff]  ;;  %v983_v63 = vld [vmem:[#allocation4 + $0x98] sm:$0xff]  ;;  %v984_v2 = vld [vmem:[#allocation4 + $0xa0] sm:$0xff] }
 0x42f   :  { %v985_v3 = vld [vmem:[#allocation4 + $0xa8] sm:$0xff]  ;;  %v1005_v6 = vpack.c.bf16 %v983_v63, %v982_v62  ;;  %v986_v10 = vld [vmem:[#allocation4 + $0xb0] sm:$0xff]  ;;  %v987_v11 = vld [vmem:[#allocation4 + $0xb8] sm:$0xff] }
 0x430   :  { %v1006_v8 = vpack.c.bf16 %v985_v3, %v984_v2  ;;  %v939_v13 = vld [vmem:[#allocation3 + $0xb8] sm:$0xff]  ;;  %v988_v14 = vld [vmem:[#allocation4 + $0xc0] sm:$0xff]  ;;  %v989_v15 = vld [vmem:[#allocation4 + $0xc8] sm:$0xff]  ;;  %v1007_v18 = vpack.c.bf16 %v987_v11, %v986_v10 }
 0x431   :  { %v940_v16 = vld [vmem:[#allocation3 + $0xc0] sm:$0xff]  ;;  %v959_v20 = vpack.c.bf16 %v939_v13, %v938_v12  ;;  %v1008_v21 = vpack.c.bf16 %v989_v15, %v988_v14  ;;  %v990_v23 = vld [vmem:[#allocation4 + $0xd0] sm:$0xff]  ;;  %v991_v19 = vld [vmem:[#allocation4 + $0xd8] sm:$0xff] }
 0x432   :  { %v960_v22 = vpack.c.bf16 %v941_v17, %v940_v16  ;;  %v942_v24 = vld [vmem:[#allocation3 + $0xd0] sm:$0xff]  ;;  %v992_v26 = vld [vmem:[#allocation4 + $0xe0] sm:$0xff]  ;;  %v993_v28 = vld [vmem:[#allocation4 + $0xe8] sm:$0xff]  ;;  %v1009_v33 = vpack.c.bf16 %v991_v19, %v990_v23 }
 0x433   :  { %1778 = vmatmul.mubr.msk.bf16.gmra.mxu1 %vm396_vm2, %v959_v20  ;;  %v961_v34 = vpack.c.bf16 %v943_v25, %v942_v24  ;;  %v1010_v35 = vpack.c.bf16 %v993_v28, %v992_v26  ;;  %v995_v39 = vld [vmem:[#allocation4 + $0xf8] sm:$0xff]  ;;  %v2259_v46 = vld [vmem:[%s2426_s7] ss:$0 sm:$0xff] }
 0x434   :  { %1728 = vmatmul.mubr.msk.bf16.gmra.mxu0 %vm396_vm2, %v999_v38  ;;  %1781 = vmatprep.mubr.msk.bf16.mxu1 %vm396_vm2, %v960_v22  ;;  %v994_v38 = vld [vmem:[#allocation4 + $0xf0] sm:$0xff] }
 0x435   :  { %1731 = vmatprep.mubr.msk.bf16.mxu0 %vm396_vm2, %v1000_v40  ;;  %v946_v40 = vld [vmem:[#allocation3 + $0xf0] sm:$0xff]  ;;  %v1011_v42 = vpack.c.bf16 %v995_v39, %v994_v38 }
 0x436   :  { %v963_v43 = vpack.c.bf16 %v947_v41, %v946_v40 }
 0x43b   :  { %1782 = vmatmul.mubr.msk.bf16.gmra.mxu1 %vm396_vm2, %v961_v34 }
 0x43c   :  { %1732 = vmatmul.mubr.msk.bf16.gmra.mxu0 %vm396_vm2, %v1001_v32  ;;  %1785 = vmatprep.mubr.msk.bf16.mxu1 %vm396_vm2, %v962_v37 }
 0x43d   :  { %1735 = vmatprep.mubr.msk.bf16.mxu0 %vm396_vm2, %v1002_v52 }
 0x443   :  { %1786 = vmatmul.mubr.msk.bf16.gmra.mxu1 %vm396_vm2, %v963_v43 }
 0x444   :  { %1736 = vmatmul.mubr.msk.bf16.gmra.mxu0 %vm396_vm2, %v1003_v54 }
 0x445   :  { %1739 = vmatprep.mubr.msk.bf16.mxu0 %vm396_vm2, %v1004_v60 }
 0x44c   :  { %1740 = vmatmul.mubr.msk.bf16.gmra.mxu0 %vm396_vm2, %v1005_v6 }
 0x44d   :  { %1743 = vmatprep.mubr.msk.bf16.mxu0 %vm396_vm2, %v1006_v8 }
 0x454   :  { %1744 = vmatmul.mubr.msk.bf16.gmra.mxu0 %vm396_vm2, %v1007_v18 }
 0x455   :  { %1747 = vmatprep.mubr.msk.bf16.mxu0 %vm396_vm2, %v1008_v21 }
 0x45c   :  { %1748 = vmatmul.mubr.msk.bf16.gmra.mxu0 %vm396_vm2, %v1009_v33 }
 0x45d   :  { %1751 = vmatprep.mubr.msk.bf16.mxu0 %vm396_vm2, %v1010_v35 }
 0x464   :  { %1752 = vmatmul.mubr.msk.bf16.gmra.mxu0 %vm396_vm2, %v1011_v42 }
 0x490   :  { %v1759_v45 = vpop.f32.mrf.mxu1 }
 0x492   :  { %v1319_v49 = vpop.f32.mrf.mxu1 }
 0x494   :  { %v1760_v36 = vpop.f32.mrf.mxu1 }
 0x496   :  { %v1322_v31 = vpop.f32.mrf.mxu1 }
 0x498   :  { %v1763_v50 = vpop.f32.mrf.mxu1 }
 0x49a   :  { %v1335_v61 = vpop.f32.mrf.mxu1 }
 0x49c   :  { %v1764_v1 = vpop.f32.mrf.mxu1 }
 0x49e   :  { %v1338_v5 = vpop.f32.mrf.mxu1 }
 0x4a0   :  { %v1767_v9 = vpop.f32.mrf.mxu1 }
 0x4a2   :  { %v1351_v13 = vpop.f32.mrf.mxu1 }
 0x4a4   :  { %v1768_v17 = vpop.f32.mrf.mxu1 }
 0x4a6   :  { %v1354_v22 = vpop.f32.mrf.mxu1 }
 0x4a8   :  { %v1771_v25 = vpop.f32.mrf.mxu1 }
 0x4aa   :  { %v1367_v30 = vpop.f32.mrf.mxu1 }
 0x4ac   :  { %v1772_v37 = vpop.f32.mrf.mxu1 }
 0x4ae   :  { %v1370_v41 = vpop.f32.mrf.mxu1 }
 0x4ec   :  { %v1725_v44 = vpop.f32.mrf.mxu0 }
 0x4ed   :  { %v1328_v47 = vadd.f32 %v1759_v45, %v1725_v44  ;;  %v1775_v45 = vpop.f32.mrf.mxu1 }
 0x4ee   :  { %v1104_v48 = vpop.f32.mrf.mxu0 }
 0x4ef   :  { %v1455_v32 = vadd.f32 %v2259_v46, %v1328_v47  ;;  %v1320_v51 = vadd.f32 %v1319_v49, %v1104_v48 }
 0x4f0   :  { %v1726_v52 = vpop.f32.mrf.mxu0 }
 0x4f1   :  { %1487 = vst.msk [vmem:[%s2427_s8 + $0x10] sm:$0xff] %vm150_vm1, %v1455_v32  ;;  %v1453_v27 = vadd.f32 %v2259_v46, %v1320_v51  ;;  %v1331_v55 = vadd.f32 %v1760_v36, %v1726_v52  ;;  %v1383_v32 = vpop.f32.mrf.mxu1 }
 0x4f2   :  { %v1107_v56 = vpop.f32.mrf.mxu0 }
 0x4f3   :  { %1485 = vst.msk [vmem:[%s2427_s8] sm:$0xff] %vm150_vm1, %v1453_v27  ;;  %v1456_v57 = vadd.f32 %v2259_v46, %v1331_v55  ;;  %v1323_v53 = vadd.f32 %v1322_v31, %v1107_v56  ;;  %v1776_v27 = vpop.f32.mrf.mxu1 }
 0x4f4   :  { %v1729_v58 = vpop.f32.mrf.mxu0 }
 0x4f5   :  { %1488 = vst.msk [vmem:[%s2427_s8 + $0x18] sm:$0xff] %vm150_vm1, %v1456_v57  ;;  %v1454_v54 = vadd.f32 %v2259_v46, %v1323_v53  ;;  %v1344_v59 = vadd.f32 %v1763_v50, %v1729_v58  ;;  %v1386_v57 = vpop.f32.mrf.mxu1 }
 0x4f6   :  { %v1120_v60 = vpop.f32.mrf.mxu0 }
 0x4f7   :  { %1486 = vst.msk [vmem:[%s2427_s8 + $0x8] sm:$0xff] %vm150_vm1, %v1454_v54  ;;  %v1459_v62 = vadd.f32 %v2259_v46, %v1344_v59  ;;  %v1336_v63 = vadd.f32 %v1335_v61, %v1120_v60  ;;  %v1779_v54 = vpop.f32.mrf.mxu1 }
 0x4f8   :  { %v1730_v0 = vpop.f32.mrf.mxu0 }
 0x4f9   :  { %1491 = vst.msk [vmem:[%s2427_s8 + $0x30] sm:$0xff] %vm150_vm1, %v1459_v62  ;;  %v1457_v2 = vadd.f32 %v2259_v46, %v1336_v63  ;;  %v1347_v3 = vadd.f32 %v1764_v1, %v1730_v0  ;;  %v1399_v62 = vpop.f32.mrf.mxu1 }
 0x4fa   :  { %v1123_v4 = vpop.f32.mrf.mxu0 }
 0x4fb   :  { %1489 = vst.msk [vmem:[%s2427_s8 + $0x20] sm:$0xff] %vm150_vm1, %v1457_v2  ;;  %v1460_v6 = vadd.f32 %v2259_v46, %v1347_v3  ;;  %v1339_v7 = vadd.f32 %v1338_v5, %v1123_v4  ;;  %v1780_v2 = vpop.f32.mrf.mxu1 }
 0x4fc   :  { %v1733_v8 = vpop.f32.mrf.mxu0 }
 0x4fd   :  { %1492 = vst.msk [vmem:[%s2427_s8 + $0x38] sm:$0xff] %vm150_vm1, %v1460_v6  ;;  %v1458_v10 = vadd.f32 %v2259_v46, %v1339_v7  ;;  %v1360_v11 = vadd.f32 %v1767_v9, %v1733_v8  ;;  %v1402_v6 = vpop.f32.mrf.mxu1 }
 0x4fe   :  { %v1136_v12 = vpop.f32.mrf.mxu0 }
 0x4ff   :  { %1490 = vst.msk [vmem:[%s2427_s8 + $0x28] sm:$0xff] %vm150_vm1, %v1458_v10  ;;  %v1463_v14 = vadd.f32 %v2259_v46, %v1360_v11  ;;  %v1352_v15 = vadd.f32 %v1351_v13, %v1136_v12  ;;  %v1783_v10 = vpop.f32.mrf.mxu1 }
 0x500   :  { %v1734_v16 = vpop.f32.mrf.mxu0 }
 0x501   :  { %1495 = vst.msk [vmem:[%s2427_s8 + $0x50] sm:$0xff] %vm150_vm1, %v1463_v14  ;;  %v1461_v18 = vadd.f32 %v2259_v46, %v1352_v15  ;;  %v1363_v20 = vadd.f32 %v1768_v17, %v1734_v16  ;;  %v1415_v14 = vpop.f32.mrf.mxu1 }
 0x502   :  { %v1139_v21 = vpop.f32.mrf.mxu0 }
 0x503   :  { %1493 = vst.msk [vmem:[%s2427_s8 + $0x40] sm:$0xff] %vm150_vm1, %v1461_v18  ;;  %v1464_v23 = vadd.f32 %v2259_v46, %v1363_v20  ;;  %v1355_v19 = vadd.f32 %v1354_v22, %v1139_v21  ;;  %v1784_v18 = vpop.f32.mrf.mxu1 }
 0x504   :  { %v1737_v24 = vpop.f32.mrf.mxu0 }
 0x505   :  { %1496 = vst.msk [vmem:[%s2427_s8 + $0x58] sm:$0xff] %vm150_vm1, %v1464_v23  ;;  %v1462_v26 = vadd.f32 %v2259_v46, %v1355_v19  ;;  %v1376_v28 = vadd.f32 %v1771_v25, %v1737_v24  ;;  %v1418_v23 = vpop.f32.mrf.mxu1 }
 0x506   :  { %v1152_v29 = vpop.f32.mrf.mxu0 }
 0x507   :  { %1494 = vst.msk [vmem:[%s2427_s8 + $0x48] sm:$0xff] %vm150_vm1, %v1462_v26  ;;  %v1467_v33 = vadd.f32 %v2259_v46, %v1376_v28  ;;  %v1368_v34 = vadd.f32 %v1367_v30, %v1152_v29  ;;  %v1787_v26 = vpop.f32.mrf.mxu1 }
 0x508   :  { %v1738_v35 = vpop.f32.mrf.mxu0 }
 0x509   :  { %1499 = vst.msk [vmem:[%s2427_s8 + $0x70] sm:$0xff] %vm150_vm1, %v1467_v33  ;;  %v1465_v38 = vadd.f32 %v2259_v46, %v1368_v34  ;;  %v1379_v39 = vadd.f32 %v1772_v37, %v1738_v35  ;;  %v1431_v33 = vpop.f32.mrf.mxu1 }
 0x50a   :  { %v1155_v40 = vpop.f32.mrf.mxu0 }
 0x50b   :  { %1497 = vst.msk [vmem:[%s2427_s8 + $0x60] sm:$0xff] %vm150_vm1, %v1465_v38  ;;  %v1468_v42 = vadd.f32 %v2259_v46, %v1379_v39  ;;  %v1371_v43 = vadd.f32 %v1370_v41, %v1155_v40  ;;  %v1788_v38 = vpop.f32.mrf.mxu1 }
 0x50c   :  { %v1741_v44 = vpop.f32.mrf.mxu0 }
 0x50d   :  { %1500 = vst.msk [vmem:[%s2427_s8 + $0x78] sm:$0xff] %vm150_vm1, %v1468_v42  ;;  %v1466_v47 = vadd.f32 %v2259_v46, %v1371_v43  ;;  %v1392_v48 = vadd.f32 %v1775_v45, %v1741_v44  ;;  %v1434_v42 = vpop.f32.mrf.mxu1 }
 0x50e   :  { %v1168_v49 = vpop.f32.mrf.mxu0 }
 0x50f   :  { %1498 = vst.msk [vmem:[%s2427_s8 + $0x68] sm:$0xff] %vm150_vm1, %v1466_v47  ;;  %v1471_v51 = vadd.f32 %v2259_v46, %v1392_v48  ;;  %v1384_v52 = vadd.f32 %v1383_v32, %v1168_v49 }
 0x510   :  { %v1742_v36 = vpop.f32.mrf.mxu0 }
 0x511   :  { %1503 = vst.msk [vmem:[%s2427_s8 + $0x90] sm:$0xff] %vm150_vm1, %v1471_v51  ;;  %v1469_v55 = vadd.f32 %v2259_v46, %v1384_v52  ;;  %v1395_v56 = vadd.f32 %v1776_v27, %v1742_v36 }
 0x512   :  { %v1171_v31 = vpop.f32.mrf.mxu0 }
 0x513   :  { %1501 = vst.msk [vmem:[%s2427_s8 + $0x80] sm:$0xff] %vm150_vm1, %v1469_v55  ;;  %v1472_v53 = vadd.f32 %v2259_v46, %v1395_v56  ;;  %v1387_v58 = vadd.f32 %v1386_v57, %v1171_v31 }
 0x514   :  { %v1745_v50 = vpop.f32.mrf.mxu0 }
 0x515   :  { %1504 = vst.msk [vmem:[%s2427_s8 + $0x98] sm:$0xff] %vm150_vm1, %v1472_v53  ;;  %v1470_v59 = vadd.f32 %v2259_v46, %v1387_v58  ;;  %v1408_v60 = vadd.f32 %v1779_v54, %v1745_v50 }
 0x516   :  { %v1184_v61 = vpop.f32.mrf.mxu0 }
 0x517   :  { %1502 = vst.msk [vmem:[%s2427_s8 + $0x88] sm:$0xff] %vm150_vm1, %v1470_v59  ;;  %v1475_v63 = vadd.f32 %v2259_v46, %v1408_v60  ;;  %v1400_v0 = vadd.f32 %v1399_v62, %v1184_v61 }
 0x518   :  { %v1746_v1 = vpop.f32.mrf.mxu0 }
 0x519   :  { %1507 = vst.msk [vmem:[%s2427_s8 + $0xb0] sm:$0xff] %vm150_vm1, %v1475_v63  ;;  %v1473_v3 = vadd.f32 %v2259_v46, %v1400_v0  ;;  %v1411_v4 = vadd.f32 %v1780_v2, %v1746_v1 }
 0x51a   :  { %v1187_v5 = vpop.f32.mrf.mxu0 }
 0x51b   :  { %1505 = vst.msk [vmem:[%s2427_s8 + $0xa0] sm:$0xff] %vm150_vm1, %v1473_v3  ;;  %v1476_v7 = vadd.f32 %v2259_v46, %v1411_v4  ;;  %v1403_v8 = vadd.f32 %v1402_v6, %v1187_v5 }
 0x51c   :  { %v1749_v9 = vpop.f32.mrf.mxu0 }
 0x51d   :  { %1508 = vst.msk [vmem:[%s2427_s8 + $0xb8] sm:$0xff] %vm150_vm1, %v1476_v7  ;;  %v1474_v11 = vadd.f32 %v2259_v46, %v1403_v8  ;;  %v1424_v12 = vadd.f32 %v1783_v10, %v1749_v9 }
 0x51e   :  { %v1200_v13 = vpop.f32.mrf.mxu0 }
 0x51f   :  { %1506 = vst.msk [vmem:[%s2427_s8 + $0xa8] sm:$0xff] %vm150_vm1, %v1474_v11  ;;  %v1479_v15 = vadd.f32 %v2259_v46, %v1424_v12  ;;  %v1416_v16 = vadd.f32 %v1415_v14, %v1200_v13 }
 0x520   :  { %v1750_v17 = vpop.f32.mrf.mxu0 }
 0x521   :  { %1511 = vst.msk [vmem:[%s2427_s8 + $0xd0] sm:$0xff] %vm150_vm1, %v1479_v15  ;;  %v1477_v20 = vadd.f32 %v2259_v46, %v1416_v16  ;;  %v1427_v21 = vadd.f32 %v1784_v18, %v1750_v17 }
 0x522   :  { %v1203_v22 = vpop.f32.mrf.mxu0 }
 0x523   :  { %1509 = vst.msk [vmem:[%s2427_s8 + $0xc0] sm:$0xff] %vm150_vm1, %v1477_v20  ;;  %v1480_v19 = vadd.f32 %v2259_v46, %v1427_v21  ;;  %v1419_v24 = vadd.f32 %v1418_v23, %v1203_v22 }
 0x524   :  { %v1753_v25 = vpop.f32.mrf.mxu0 }
 0x525   :  { %1512 = vst.msk [vmem:[%s2427_s8 + $0xd8] sm:$0xff] %vm150_vm1, %v1480_v19  ;;  %v1478_v28 = vadd.f32 %v2259_v46, %v1419_v24  ;;  %v1440_v29 = vadd.f32 %v1787_v26, %v1753_v25 }
 0x526   :  { %v1216_v30 = vpop.f32.mrf.mxu0 }
 0x527   :  { %1510 = vst.msk [vmem:[%s2427_s8 + $0xc8] sm:$0xff] %vm150_vm1, %v1478_v28  ;;  %v1483_v34 = vadd.f32 %v2259_v46, %v1440_v29  ;;  %v1432_v35 = vadd.f32 %v1431_v33, %v1216_v30 }
 0x528   :  { %v1754_v37 = vpop.f32.mrf.mxu0 }
 0x529   :  { %1515 = vst.msk [vmem:[%s2427_s8 + $0xf0] sm:$0xff] %vm150_vm1, %v1483_v34  ;;  %v1481_v39 = vadd.f32 %v2259_v46, %v1432_v35  ;;  %v1443_v40 = vadd.f32 %v1788_v38, %v1754_v37 }
 0x52a   :  { %v1219_v41 = vpop.f32.mrf.mxu0 }
 0x52b   :  { %1513 = vst.msk [vmem:[%s2427_s8 + $0xe0] sm:$0xff] %vm150_vm1, %v1481_v39  ;;  %v1484_v43 = vadd.f32 %v2259_v46, %v1443_v40  ;;  %v1435_v44 = vadd.f32 %v1434_v42, %v1219_v41 }
 0x52d   :  { %1516 = vst.msk [vmem:[%s2427_s8 + $0xf8] sm:$0xff] %vm150_vm1, %v1484_v43  ;;  %v1482_v45 = vadd.f32 %v2259_v46, %v1435_v44 }
 0x52f   :  { %1514 = vst.msk [vmem:[%s2427_s8 + $0xe8] sm:$0xff] %vm150_vm1, %v1482_v45 }

</bundles_post_ra>
